<compile_context>
chip_gen: v7x
topology: tpu7x:2x2x1
jax: 0.10.0
libtpu: 0.0.40
codegen_flags: <defaults>
</compile_context>

<pallas_src>
import math
import numpy as np
import jax
import jax.numpy as jnp
from jax.experimental import pallas as pl
from jax.experimental.pallas import tpu as pltpu

# ----------------------------- model sizes (small) -----------------------------
B = 2            # batch
T_FRAMES = 68    # frames_num (not a multiple of 64 -> exercises the bilinear pad)
MELS = 32        # n_mels (128 in the original)
PATCH = 8        # encoder downsample factor in time and freq
C_ENC = 64       # encoder output channels (2048 in the original)
H_GRU = 32       # GRU hidden (1024 in the original); bidirectional -> 2*H == C_ENC
CLASSES = 10     # classes_num (398 in the original)
BN_EPS = 1e-5


# ================================ Pallas kernels ================================

def encoder_kernel(p_ref, w_ref, b_ref, o_ref):
    # p: (1, mp, tp, P*P)   w: (mp, P*P, C)   b: (mp, 1, C)   o: (1, tp, C)
    # bn0 + 3-channel tile are already folded into w/b.  Per freq-patch:
    #   relu(patch @ w[m] + b[m]), then mean over freq patches (torch.mean dim=3).
    _, mp_, tp_, _ = p_ref.shape
    p = p_ref[0]                       # (mp, tp, P*P)
    w = w_ref[...]                     # (mp, P*P, C)
    bb = b_ref[...]                    # (mp, 1, C)
    acc = None
    for m in range(mp_):               # static loop, mp is tiny
        y = jnp.dot(p[m], w[m], preferred_element_type=jnp.float32) + bb[m]
        y = jnp.maximum(y, 0.0)
        acc = y if acc is None else acc + y
    o_ref[...] = (acc * (1.0 / mp_))[None].astype(o_ref.dtype)


def gru_att_frame_kernel(x_ref, wih_ref, bih_ref, whh_ref, bhh_ref,
                         watt_ref, batt_ref, wcla_ref, bcla_ref, wcomb_ref,
                         clip_ref, logit_ref, segout_ref, seglogit_ref,
                         frameout_ref, framelogit_ref,
                         feat_scr):
    # x: (1, T, C)   wih: (2, C, 3H)   whh: (2, H, 3H)   bih/bhh: (2, 1, 3H)
    # watt/wcla: (2H, K)  batt/bcla: (1, K)   wcomb: (F, T)
    # outputs per batch element: clip/logit (1,1,K), seg (1,T,K), frame (1,F,K)
    # feat_scr: (T, 2H) VMEM scratch holding the BiGRU features.
    x = x_ref[0]                       # (T, C)
    t_len = x.shape[0]
    hdim = whh_ref.shape[1]

    for d in range(2):                 # 0 = forward, 1 = backward
        wih = wih_ref[d]               # (C, 3H)
        whh = whh_ref[d]               # (H, 3H)
        bih = bih_ref[d]               # (1, 3H)
        bhh = bhh_ref[d]               # (1, 3H)

        # input projection for the whole sequence (one matmul per direction)
        gi = jnp.dot(x, wih, preferred_element_type=jnp.float32) + bih   # (T, 3H)
        gr = gi[:, :hdim] + bhh[:, :hdim]          # r-gate input part (+ b_hr folded)
        gz = gi[:, hdim:2 * hdim] + bhh[:, hdim:2 * hdim]
        gn = gi[:, 2 * hdim:]
        bhn = bhh[:, 2 * hdim:]
        whr = whh[:, :hdim]
        whz = whh[:, hdim:2 * hdim]
        whn = whh[:, 2 * hdim:]

        h = jnp.zeros((1, hdim), jnp.float32)
        for i in range(t_len):         # statically unrolled recurrence (T' is small)
            t = i if d == 0 else t_len - 1 - i
            r = jax.nn.sigmoid(gr[t:t + 1] +
                               jnp.dot(h, whr, preferred_element_type=jnp.float32))
            z = jax.nn.sigmoid(gz[t:t + 1] +
                               jnp.dot(h, whz, preferred_element_type=jnp.float32))
            n = jnp.tanh(gn[t:t + 1] + r *
                         (jnp.dot(h, whn, preferred_element_type=jnp.float32) + bhn))
            h = (1.0 - z) * n + z * h
            feat_scr[t:t + 1, d * hdim:(d + 1) * hdim] = h

    # ----- AttBlockV2 (softmax over time of tanh(att), sigmoid cla) -----
    feat = feat_scr[...]                                                 # (T, 2H)
    att = jnp.tanh(jnp.dot(feat, watt_ref[...],
                           preferred_element_type=jnp.float32) + batt_ref[...])
    att = att - jnp.max(att, axis=0, keepdims=True)
    e = jnp.exp(att)
    norm_att = e / jnp.sum(e, axis=0, keepdims=True)                     # (T, K)
    cla_logit = jnp.dot(feat, wcla_ref[...],
                        preferred_element_type=jnp.float32) + bcla_ref[...]
    cla = jax.nn.sigmoid(cla_logit)

    clip_ref[...] = jnp.sum(norm_att * cla, axis=0, keepdims=True)[None]
    logit_ref[...] = jnp.sum(norm_att * cla_logit, axis=0, keepdims=True)[None]
    segout_ref[...] = cla[None]
    seglogit_ref[...] = cla_logit[None]

    # ----- framewise upsampling: repeat-interpolate + bilinear pad as one matmul -----
    wcomb = wcomb_ref[...]                                               # (F, T)
    frameout_ref[...] = jnp.dot(wcomb, cla,
                                preferred_element_type=jnp.float32)[None]
    framelogit_ref[...] = jnp.dot(wcomb, cla_logit,
                                  preferred_element_type=jnp.float32)[None]


# ================================ glue helpers ================================

def bilinear_time_matrix(f_out, l_in):
    """align_corners=True bilinear resampling matrix along time (numpy, compile-time)."""
    if l_in == 1 or f_out == 1:
        return np.full((f_out, l_in), 1.0 / l_in, np.float32)
    src = np.arange(f_out, dtype=np.float64) * (l_in - 1) / (f_out - 1)
    lo = np.clip(np.floor(src).astype(np.int64), 0, l_in - 2)
    frac = (src - lo).astype(np.float32)
    w = np.zeros((f_out, l_in), np.float32)
    rows = np.arange(f_out)
    w[rows, lo] += 1.0 - frac
    w[rows, lo + 1] += frac
    return w


def upsample_matrix(frames_num, t_seg):
    """Compose interpolate(repeat by ratio) with the align_corners bilinear pad."""
    ratio = frames_num // t_seg
    rep = np.repeat(np.eye(t_seg, dtype=np.float32), ratio, axis=0)     # (t_seg*ratio, t_seg)
    pad = bilinear_time_matrix(frames_num, t_seg * ratio)               # (F, t_seg*ratio)
    return jnp.asarray(pad @ rep, jnp.float32)                          # (F, t_seg)


def init_params(key):
    ks = jax.random.split(key, 8)
    p = {}
    # bn0 (init_bn: weight=1, bias=0; fresh running stats)
    p["bn_gamma"] = jnp.ones((1, MELS), jnp.float32)
    p["bn_beta"] = jnp.zeros((1, MELS), jnp.float32)
    p["bn_mean"] = jnp.zeros((1, MELS), jnp.float32)
    p["bn_var"] = jnp.ones((1, MELS), jnp.float32)
    # encoder patch conv (xavier-uniform-like), weight (3*P*P, C_ENC), bias 0
    pdim = 3 * PATCH * PATCH
    bound = math.sqrt(6.0 / (pdim + C_ENC))
    p["w_enc"] = jax.random.uniform(ks[0], (pdim, C_ENC), jnp.float32, -bound, bound)
    p["b_enc"] = jnp.zeros((1, C_ENC), jnp.float32)
    # GRU (init_gru: uniform(-sqrt(3/fan_in), sqrt(3/fan_in)), biases 0), stored transposed
    bih = math.sqrt(3.0 / C_ENC)
    bhh = math.sqrt(3.0 / H_GRU)
    p["gru_wih_f"] = jax.random.uniform(ks[1], (C_ENC, 3 * H_GRU), jnp.float32, -bih, bih)
    p["gru_whh_f"] = jax.random.uniform(ks[2], (H_GRU, 3 * H_GRU), jnp.float32, -bhh, bhh)
    p["gru_wih_b"] = jax.random.uniform(ks[3], (C_ENC, 3 * H_GRU), jnp.float32, -bih, bih)
    p["gru_whh_b"] = jax.random.uniform(ks[4], (H_GRU, 3 * H_GRU), jnp.float32, -bhh, bhh)
    p["gru_bih_f"] = jnp.zeros((1, 3 * H_GRU), jnp.float32)
    p["gru_bhh_f"] = jnp.zeros((1, 3 * H_GRU), jnp.float32)
    p["gru_bih_b"] = jnp.zeros((1, 3 * H_GRU), jnp.float32)
    p["gru_bhh_b"] = jnp.zeros((1, 3 * H_GRU), jnp.float32)
    # AttBlockV2: two 1x1 conv1d == matmuls, xavier-uniform, bias 0
    c2 = 2 * H_GRU
    ba = math.sqrt(6.0 / (c2 + CLASSES))
    p["w_att"] = jax.random.uniform(ks[5], (c2, CLASSES), jnp.float32, -ba, ba)
    p["b_att"] = jnp.zeros((1, CLASSES), jnp.float32)
    p["w_cla"] = jax.random.uniform(ks[6], (c2, CLASSES), jnp.float32, -ba, ba)
    p["b_cla"] = jnp.zeros((1, CLASSES), jnp.float32)
    return p


# ================================ forward pass ================================

def sed_forward(x_nchw, p):
    """x_nchw: (B, 1, frames_num, mels) logmel features (post front-end)."""
    b, _, frames_num, mels = x_nchw.shape
    x = x_nchw[:, 0, :, :]                                     # (B, T, M)

    tc = (frames_num // PATCH) * PATCH
    tp, mp = tc // PATCH, mels // PATCH
    p2 = PATCH * PATCH
    parallel1 = pltpu.CompilerParams(dimension_semantics=("parallel",))

    # ---- fold bn0 (eval affine) + 3-channel tile into the patch-conv weights ----
    s = p["bn_gamma"][0] * jax.lax.rsqrt(p["bn_var"][0] + BN_EPS)        # (M,)
    o = p["bn_beta"][0] - p["bn_mean"][0] * s                            # (M,)
    wsum = p["w_enc"].reshape(3, p2, C_ENC).sum(axis=0)                  # channels identical
    s_pat = jnp.tile(s.reshape(mp, PATCH), (1, PATCH))                   # (mp, P*P) [dt fast? no: dm fast]
    o_pat = jnp.tile(o.reshape(mp, PATCH), (1, PATCH))
    w_eff = wsum[None, :, :] * s_pat[:, :, None]                         # (mp, P*P, C)
    b_eff = (p["b_enc"][0][None, :] + o_pat @ wsum)[:, None, :]          # (mp, 1, C)

    # ---- patchify raw input (no BN pass, no 3x channel tile) ----
    patches = (x[:, :tc, :]
               .reshape(b, tp, PATCH, mp, PATCH)
               .transpose(0, 3, 1, 2, 4)
               .reshape(b, mp, tp, p2))                                  # (B, mp, tp, P*P)

    # ---- kernel 1: encoder (patch-conv + ReLU + freq-mean) ----
    enc = pl.pallas_call(
        encoder_kernel,
        out_shape=jax.ShapeDtypeStruct((b, tp, C_ENC), jnp.float32),
        grid=(b,),
        in_specs=[pl.BlockSpec((1, mp, tp, p2), lambda i: (i, 0, 0, 0)),
                  pl.BlockSpec((mp, p2, C_ENC), lambda i: (0, 0, 0)),
                  pl.BlockSpec((mp, 1, C_ENC), lambda i: (0, 0, 0))],
        out_specs=pl.BlockSpec((1, tp, C_ENC), lambda i: (i, 0, 0)),
        compiler_params=parallel1,
    )(patches, w_eff, b_eff)                                             # (B, T', C)

    # ---- stack GRU direction weights, build composed upsample matrix ----
    wih = jnp.stack([p["gru_wih_f"], p["gru_wih_b"]])                    # (2, C, 3H)
    whh = jnp.stack([p["gru_whh_f"], p["gru_whh_b"]])                    # (2, H, 3H)
    bih = jnp.stack([p["gru_bih_f"], p["gru_bih_b"]])                    # (2, 1, 3H)
    bhh = jnp.stack([p["gru_bhh_f"], p["gru_bhh_b"]])                    # (2, 1, 3H)
    wcomb = upsample_matrix(frames_num, tp)                              # (F, T')

    c2 = 2 * H_GRU
    k = CLASSES
    h3 = 3 * H_GRU

    # ---- kernel 2: BiGRU + attention + framewise upsample (fused) ----
    clip3, logit3, seg_out, seg_logit, frame_out, frame_logit = pl.pallas_call(
        gru_att_frame_kernel,
        out_shape=(jax.ShapeDtypeStruct((b, 1, k), jnp.float32),
                   jax.ShapeDtypeStruct((b, 1, k), jnp.float32),
                   jax.ShapeDtypeStruct((b, tp, k), jnp.float32),
                   jax.ShapeDtypeStruct((b, tp, k), jnp.float32),
                   jax.ShapeDtypeStruct((b, frames_num, k), jnp.float32),
                   jax.ShapeDtypeStruct((b, frames_num, k), jnp.float32)),
        grid=(b,),
        in_specs=[pl.BlockSpec((1, tp, C_ENC), lambda i: (i, 0, 0)),
                  pl.BlockSpec((2, C_ENC, h3), lambda i: (0, 0, 0)),
                  pl.BlockSpec((2, 1, h3), lambda i: (0, 0, 0)),
                  pl.BlockSpec((2, H_GRU, h3), lambda i: (0, 0, 0)),
                  pl.BlockSpec((2, 1, h3), lambda i: (0, 0, 0)),
                  pl.BlockSpec((c2, k), lambda i: (0, 0)),
                  pl.BlockSpec((1, k), lambda i: (0, 0)),
                  pl.BlockSpec((c2, k), lambda i: (0, 0)),
                  pl.BlockSpec((1, k), lambda i: (0, 0)),
                  pl.BlockSpec((frames_num, tp), lambda i: (0, 0))],
        out_specs=(pl.BlockSpec((1, 1, k), lambda i: (i, 0, 0)),
                   pl.BlockSpec((1, 1, k), lambda i: (i, 0, 0)),
                   pl.BlockSpec((1, tp, k), lambda i: (i, 0, 0)),
                   pl.BlockSpec((1, tp, k), lambda i: (i, 0, 0)),
                   pl.BlockSpec((1, frames_num, k), lambda i: (i, 0, 0)),
                   pl.BlockSpec((1, frames_num, k), lambda i: (i, 0, 0))),
        scratch_shapes=[pltpu.VMEM((tp, c2), jnp.float32)],
        compiler_params=parallel1,
    )(enc, wih, bih, whh, bhh, p["w_att"], p["b_att"], p["w_cla"], p["b_cla"], wcomb)

    return {"framewise_output": frame_out,
            "segmentwise_output": seg_out,
            "logit": logit3[:, 0, :],
            "framewise_logit": frame_logit,
            "clipwise_output": clip3[:, 0, :]}


if __name__ == "__main__":
    key = jax.random.PRNGKey(0)
    kx, kp = jax.random.split(key)
    params = init_params(kp)
    # synthetic logmel features: (B, 1, frames_num, mels)
    x = jax.random.normal(kx, (B, 1, T_FRAMES, MELS), jnp.float32)
    fwd = jax.jit(sed_forward)
    out = fwd(x, params)
    out = jax.block_until_ready(out)
    assert out["framewise_output"].shape == (B, T_FRAMES, CLASSES)
    assert out["segmentwise_output"].shape == (B, T_FRAMES // PATCH, CLASSES)
    assert out["clipwise_output"].shape == (B, CLASSES)
    assert out["logit"].shape == (B, CLASSES)
    assert out["framewise_logit"].shape == (B, T_FRAMES, CLASSES)
    assert all(bool(jnp.all(jnp.isfinite(v))) for v in out.values())
    print("KERNEL_OK")
</pallas_src>

<mosaic_0001>
module attributes {stable_mosaic.version = 11 : i64} {
  func.func @encoder_kernel(%arg0: i32, %arg1: memref<1x4x8x64xf32, #tpu.memory_space<vmem>>, %arg2: memref<4x64x64xf32, #tpu.memory_space<vmem>>, %arg3: memref<4x1x64xf32, #tpu.memory_space<vmem>>, %arg4: memref<1x8x64xf32, #tpu.memory_space<vmem>>) attributes {dimension_semantics = [#tpu.dimension_semantics<parallel>], iteration_bounds = array<i64: 2>, scalar_prefetch = 0 : i64, scratch_operands = 0 : i64, tpu.core_type = #tpu.core_type<tc>, window_params = [{transform_indices = @transform_0, window_bounds = array<i64: 1, 4, 8, 64>}, {pipeline_mode = #tpu.pipeline_mode<synchronous>, transform_indices = @transform_1, window_bounds = array<i64: 4, 64, 64>}, {pipeline_mode = #tpu.pipeline_mode<synchronous>, transform_indices = @transform_2, window_bounds = array<i64: 4, 1, 64>}, {transform_indices = @transform_3, window_bounds = array<i64: 1, 8, 64>}]} {
    %c0 = arith.constant 0 : index
    %c0_0 = arith.constant 0 : index
    %c0_1 = arith.constant 0 : index
    %c0_2 = arith.constant 0 : index
    %0 = vector.load %arg1[%c0, %c0_0, %c0_1, %c0_2] : memref<1x4x8x64xf32, #tpu.memory_space<vmem>>, vector<1x4x8x64xf32>
    %1 = vector.shape_cast %0 : vector<1x4x8x64xf32> to vector<4x8x64xf32>
    %c0_3 = arith.constant 0 : index
    %c0_4 = arith.constant 0 : index
    %c0_5 = arith.constant 0 : index
    %2 = vector.load %arg2[%c0_3, %c0_4, %c0_5] : memref<4x64x64xf32, #tpu.memory_space<vmem>>, vector<4x64x64xf32>
    %c0_6 = arith.constant 0 : index
    %c0_7 = arith.constant 0 : index
    %c0_8 = arith.constant 0 : index
    %3 = vector.load %arg3[%c0_6, %c0_7, %c0_8] : memref<4x1x64xf32, #tpu.memory_space<vmem>>, vector<4x1x64xf32>
    %4 = vector.extract_strided_slice %1 {offsets = [0, 0, 0], sizes = [1, 8, 64], strides = [1, 1, 1]} : vector<4x8x64xf32> to vector<1x8x64xf32>
    %5 = vector.shape_cast %4 : vector<1x8x64xf32> to vector<8x64xf32>
    %6 = vector.extract_strided_slice %2 {offsets = [0, 0, 0], sizes = [1, 64, 64], strides = [1, 1, 1]} : vector<4x64x64xf32> to vector<1x64x64xf32>
    %7 = vector.shape_cast %6 : vector<1x64x64xf32> to vector<64x64xf32>
    %cst = arith.constant dense<0.000000e+00> : vector<8x64xf32>
    %8 = tpu.matmul %5, %7, %cst {dimension_numbers = #tpu.dot_dimension_numbers<[1], [0], [0], [1], [0, 0, 1, 1], [], []>} : vector<8x64xf32>, vector<64x64xf32>, vector<8x64xf32> -> vector<8x64xf32>
    %9 = vector.extract_strided_slice %3 {offsets = [0, 0, 0], sizes = [1, 1, 64], strides = [1, 1, 1]} : vector<4x1x64xf32> to vector<1x1x64xf32>
    %10 = vector.shape_cast %9 : vector<1x1x64xf32> to vector<1x64xf32>
    %11 = vector.broadcast %10 : vector<1x64xf32> to vector<8x64xf32>
    %12 = arith.addf %8, %11 : vector<8x64xf32>
    %cst_9 = arith.constant 0.000000e+00 : f32
    %13 = vector.broadcast %cst_9 : f32 to vector<8x64xf32>
    %14 = arith.maximumf %12, %13 : vector<8x64xf32>
    %15 = vector.extract_strided_slice %1 {offsets = [1, 0, 0], sizes = [1, 8, 64], strides = [1, 1, 1]} : vector<4x8x64xf32> to vector<1x8x64xf32>
    %16 = vector.shape_cast %15 : vector<1x8x64xf32> to vector<8x64xf32>
    %17 = vector.extract_strided_slice %2 {offsets = [1, 0, 0], sizes = [1, 64, 64], strides = [1, 1, 1]} : vector<4x64x64xf32> to vector<1x64x64xf32>
    %18 = vector.shape_cast %17 : vector<1x64x64xf32> to vector<64x64xf32>
    %cst_10 = arith.constant dense<0.000000e+00> : vector<8x64xf32>
    %19 = tpu.matmul %16, %18, %cst_10 {dimension_numbers = #tpu.dot_dimension_numbers<[1], [0], [0], [1], [0, 0, 1, 1], [], []>} : vector<8x64xf32>, vector<64x64xf32>, vector<8x64xf32> -> vector<8x64xf32>
    %20 = vector.extract_strided_slice %3 {offsets = [1, 0, 0], sizes = [1, 1, 64], strides = [1, 1, 1]} : vector<4x1x64xf32> to vector<1x1x64xf32>
    %21 = vector.shape_cast %20 : vector<1x1x64xf32> to vector<1x64xf32>
    %22 = vector.broadcast %21 : vector<1x64xf32> to vector<8x64xf32>
    %23 = arith.addf %19, %22 : vector<8x64xf32>
    %cst_11 = arith.constant 0.000000e+00 : f32
    %24 = vector.broadcast %cst_11 : f32 to vector<8x64xf32>
    %25 = arith.maximumf %23, %24 : vector<8x64xf32>
    %26 = arith.addf %14, %25 : vector<8x64xf32>
    %27 = vector.extract_strided_slice %1 {offsets = [2, 0, 0], sizes = [1, 8, 64], strides = [1, 1, 1]} : vector<4x8x64xf32> to vector<1x8x64xf32>
    %28 = vector.shape_cast %27 : vector<1x8x64xf32> to vector<8x64xf32>
    %29 = vector.extract_strided_slice %2 {offsets = [2, 0, 0], sizes = [1, 64, 64], strides = [1, 1, 1]} : vector<4x64x64xf32> to vector<1x64x64xf32>
    %30 = vector.shape_cast %29 : vector<1x64x64xf32> to vector<64x64xf32>
    %cst_12 = arith.constant dense<0.000000e+00> : vector<8x64xf32>
    %31 = tpu.matmul %28, %30, %cst_12 {dimension_numbers = #tpu.dot_dimension_numbers<[1], [0], [0], [1], [0, 0, 1, 1], [], []>} : vector<8x64xf32>, vector<64x64xf32>, vector<8x64xf32> -> vector<8x64xf32>
    %32 = vector.extract_strided_slice %3 {offsets = [2, 0, 0], sizes = [1, 1, 64], strides = [1, 1, 1]} : vector<4x1x64xf32> to vector<1x1x64xf32>
    %33 = vector.shape_cast %32 : vector<1x1x64xf32> to vector<1x64xf32>
    %34 = vector.broadcast %33 : vector<1x64xf32> to vector<8x64xf32>
    %35 = arith.addf %31, %34 : vector<8x64xf32>
    %cst_13 = arith.constant 0.000000e+00 : f32
    %36 = vector.broadcast %cst_13 : f32 to vector<8x64xf32>
    %37 = arith.maximumf %35, %36 : vector<8x64xf32>
    %38 = arith.addf %26, %37 : vector<8x64xf32>
    %39 = vector.extract_strided_slice %1 {offsets = [3, 0, 0], sizes = [1, 8, 64], strides = [1, 1, 1]} : vector<4x8x64xf32> to vector<1x8x64xf32>
    %40 = vector.shape_cast %39 : vector<1x8x64xf32> to vector<8x64xf32>
    %41 = vector.extract_strided_slice %2 {offsets = [3, 0, 0], sizes = [1, 64, 64], strides = [1, 1, 1]} : vector<4x64x64xf32> to vector<1x64x64xf32>
    %42 = vector.shape_cast %41 : vector<1x64x64xf32> to vector<64x64xf32>
    %cst_14 = arith.constant dense<0.000000e+00> : vector<8x64xf32>
    %43 = tpu.matmul %40, %42, %cst_14 {dimension_numbers = #tpu.dot_dimension_numbers<[1], [0], [0], [1], [0, 0, 1, 1], [], []>} : vector<8x64xf32>, vector<64x64xf32>, vector<8x64xf32> -> vector<8x64xf32>
    %44 = vector.extract_strided_slice %3 {offsets = [3, 0, 0], sizes = [1, 1, 64], strides = [1, 1, 1]} : vector<4x1x64xf32> to vector<1x1x64xf32>
    %45 = vector.shape_cast %44 : vector<1x1x64xf32> to vector<1x64xf32>
    %46 = vector.broadcast %45 : vector<1x64xf32> to vector<8x64xf32>
    %47 = arith.addf %43, %46 : vector<8x64xf32>
    %cst_15 = arith.constant 0.000000e+00 : f32
    %48 = vector.broadcast %cst_15 : f32 to vector<8x64xf32>
    %49 = arith.maximumf %47, %48 : vector<8x64xf32>
    %50 = arith.addf %38, %49 : vector<8x64xf32>
    %cst_16 = arith.constant 2.500000e-01 : f32
    %51 = vector.broadcast %cst_16 : f32 to vector<8x64xf32>
    %52 = arith.mulf %50, %51 : vector<8x64xf32>
    %53 = vector.shape_cast %52 : vector<8x64xf32> to vector<1x8x64xf32>
    %c0_17 = arith.constant 0 : index
    %c0_18 = arith.constant 0 : index
    %c0_19 = arith.constant 0 : index
    %54 = vector.load %arg4[%c0_17, %c0_18, %c0_19] : memref<1x8x64xf32, #tpu.memory_space<vmem>>, vector<1x8x64xf32>
    tpu.vector_store %arg4[%c0_17, %c0_18, %c0_19], %53 {strides = array<i32>} : memref<1x8x64xf32, #tpu.memory_space<vmem>>, vector<1x8x64xf32>,
    return
  }
  func.func @transform_0(%arg0: i32) -> (i32, i32, i32, i32) {
    %c0_i32 = arith.constant 0 : i32
    %c0_i32_0 = arith.constant 0 : i32
    %c0_i32_1 = arith.constant 0 : i32
    %c0_i32_2 = arith.constant 0 : i32
    return %arg0, %c0_i32, %c0_i32_0, %c0_i32_1 : i32, i32, i32, i32
  }
  func.func @transform_1(%arg0: i32) -> (i32, i32, i32) {
    %c0_i32 = arith.constant 0 : i32
    %c0_i32_0 = arith.constant 0 : i32
    %c0_i32_1 = arith.constant 0 : i32
    %c0_i32_2 = arith.constant 0 : i32
    return %c0_i32, %c0_i32_0, %c0_i32_1 : i32, i32, i32
  }
  func.func @transform_2(%arg0: i32) -> (i32, i32, i32) {
    %c0_i32 = arith.constant 0 : i32
    %c0_i32_0 = arith.constant 0 : i32
    %c0_i32_1 = arith.constant 0 : i32
    %c0_i32_2 = arith.constant 0 : i32
    return %c0_i32, %c0_i32_0, %c0_i32_1 : i32, i32, i32
  }
  func.func @transform_3(%arg0: i32) -> (i32, i32, i32) {
    %c0_i32 = arith.constant 0 : i32
    %c0_i32_0 = arith.constant 0 : i32
    %c0_i32_1 = arith.constant 0 : i32
    return %arg0, %c0_i32, %c0_i32_0 : i32, i32, i32
  }
}

module attributes {stable_mosaic.version = 11 : i64} {
  func.func @gru_att_frame_kernel(%arg0: i32, %arg1: memref<1x8x64xf32, #tpu.memory_space<vmem>>, %arg2: memref<2x64x96xf32, #tpu.memory_space<vmem>>, %arg3: memref<2x1x96xf32, #tpu.memory_space<vmem>>, %arg4: memref<2x32x96xf32, #tpu.memory_space<vmem>>, %arg5: memref<2x1x96xf32, #tpu.memory_space<vmem>>, %arg6: memref<64x10xf32, #tpu.memory_space<vmem>>, %arg7: memref<1x10xf32, #tpu.memory_space<vmem>>, %arg8: memref<64x10xf32, #tpu.memory_space<vmem>>, %arg9: memref<1x10xf32, #tpu.memory_space<vmem>>, %arg10: memref<68x8xf32, #tpu.memory_space<vmem>>, %arg11: memref<1x1x10xf32, #tpu.memory_space<vmem>>, %arg12: memref<1x1x10xf32, #tpu.memory_space<vmem>>, %arg13: memref<1x8x10xf32, #tpu.memory_space<vmem>>, %arg14: memref<1x8x10xf32, #tpu.memory_space<vmem>>, %arg15: memref<1x68x10xf32, #tpu.memory_space<vmem>>, %arg16: memref<1x68x10xf32, #tpu.memory_space<vmem>>, %arg17: memref<8x64xf32, #tpu.memory_space<vmem>>) attributes {dimension_semantics = [#tpu.dimension_semantics<parallel>], iteration_bounds = array<i64: 2>, scalar_prefetch = 0 : i64, scratch_operands = 1 : i64, tpu.core_type = #tpu.core_type<tc>, window_params = [{transform_indices = @transform_0, window_bounds = array<i64: 1, 8, 64>}, {pipeline_mode = #tpu.pipeline_mode<synchronous>, transform_indices = @transform_1, window_bounds = array<i64: 2, 64, 96>}, {pipeline_mode = #tpu.pipeline_mode<synchronous>, transform_indices = @transform_2, window_bounds = array<i64: 2, 1, 96>}, {pipeline_mode = #tpu.pipeline_mode<synchronous>, transform_indices = @transform_3, window_bounds = array<i64: 2, 32, 96>}, {pipeline_mode = #tpu.pipeline_mode<synchronous>, transform_indices = @transform_4, window_bounds = array<i64: 2, 1, 96>}, {pipeline_mode = #tpu.pipeline_mode<synchronous>, transform_indices = @transform_5, window_bounds = array<i64: 64, 10>}, {pipeline_mode = #tpu.pipeline_mode<synchronous>, transform_indices = @transform_6, window_bounds = array<i64: 1, 10>}, {pipeline_mode = #tpu.pipeline_mode<synchronous>, transform_indices = @transform_7, window_bounds = array<i64: 64, 10>}, {pipeline_mode = #tpu.pipeline_mode<synchronous>, transform_indices = @transform_8, window_bounds = array<i64: 1, 10>}, {pipeline_mode = #tpu.pipeline_mode<synchronous>, transform_indices = @transform_9, window_bounds = array<i64: 68, 8>}, {transform_indices = @transform_10, window_bounds = array<i64: 1, 1, 10>}, {transform_indices = @transform_11, window_bounds = array<i64: 1, 1, 10>}, {transform_indices = @transform_12, window_bounds = array<i64: 1, 8, 10>}, {transform_indices = @transform_13, window_bounds = array<i64: 1, 8, 10>}, {transform_indices = @transform_14, window_bounds = array<i64: 1, 68, 10>}, {transform_indices = @transform_15, window_bounds = array<i64: 1, 68, 10>}]} {
    %c0 = arith.constant 0 : index
    %c0_0 = arith.constant 0 : index
    %c0_1 = arith.constant 0 : index
    %0 = vector.load %arg1[%c0, %c0_0, %c0_1] : memref<1x8x64xf32, #tpu.memory_space<vmem>>, vector<1x8x64xf32>
    %1 = vector.shape_cast %0 : vector<1x8x64xf32> to vector<8x64xf32>
    %c0_2 = arith.constant 0 : index
    %c0_3 = arith.constant 0 : index
    %c0_4 = arith.constant 0 : index
    %2 = vector.load %arg2[%c0_2, %c0_3, %c0_4] : memref<2x64x96xf32, #tpu.memory_space<vmem>>, vector<1x64x96xf32>
    %3 = vector.shape_cast %2 : vector<1x64x96xf32> to vector<64x96xf32>
    %c0_5 = arith.constant 0 : index
    %c0_6 = arith.constant 0 : index
    %c0_7 = arith.constant 0 : index
    %4 = vector.load %arg4[%c0_5, %c0_6, %c0_7] : memref<2x32x96xf32, #tpu.memory_space<vmem>>, vector<1x32x96xf32>
    %5 = vector.shape_cast %4 : vector<1x32x96xf32> to vector<32x96xf32>
    %c0_8 = arith.constant 0 : index
    %c0_9 = arith.constant 0 : index
    %c0_10 = arith.constant 0 : index
    %6 = vector.load %arg3[%c0_8, %c0_9, %c0_10] : memref<2x1x96xf32, #tpu.memory_space<vmem>>, vector<1x1x96xf32>
    %7 = vector.shape_cast %6 : vector<1x1x96xf32> to vector<1x96xf32>
    %c0_11 = arith.constant 0 : index
    %c0_12 = arith.constant 0 : index
    %c0_13 = arith.constant 0 : index
    %8 = vector.load %arg5[%c0_11, %c0_12, %c0_13] : memref<2x1x96xf32, #tpu.memory_space<vmem>>, vector<1x1x96xf32>
    %9 = vector.shape_cast %8 : vector<1x1x96xf32> to vector<1x96xf32>
    %cst = arith.constant dense<0.000000e+00> : vector<8x96xf32>
    %10 = tpu.matmul %1, %3, %cst {dimension_numbers = #tpu.dot_dimension_numbers<[1], [0], [0], [1], [0, 0, 1, 1], [], []>} : vector<8x64xf32>, vector<64x96xf32>, vector<8x96xf32> -> vector<8x96xf32>
    %11 = vector.broadcast %7 : vector<1x96xf32> to vector<8x96xf32>
    %12 = arith.addf %10, %11 : vector<8x96xf32>
    %13 = vector.extract_strided_slice %12 {offsets = [0, 0], sizes = [8, 32], strides = [1, 1]} : vector<8x96xf32> to vector<8x32xf32>
    %14 = vector.extract_strided_slice %9 {offsets = [0, 0], sizes = [1, 32], strides = [1, 1]} : vector<1x96xf32> to vector<1x32xf32>
    %15 = vector.broadcast %14 : vector<1x32xf32> to vector<8x32xf32>
    %16 = arith.addf %13, %15 : vector<8x32xf32>
    %17 = vector.extract_strided_slice %12 {offsets = [0, 32], sizes = [8, 32], strides = [1, 1]} : vector<8x96xf32> to vector<8x32xf32>
    %18 = vector.extract_strided_slice %9 {offsets = [0, 32], sizes = [1, 32], strides = [1, 1]} : vector<1x96xf32> to vector<1x32xf32>
    %19 = vector.broadcast %18 : vector<1x32xf32> to vector<8x32xf32>
    %20 = arith.addf %17, %19 : vector<8x32xf32>
    %21 = vector.extract_strided_slice %12 {offsets = [0, 64], sizes = [8, 32], strides = [1, 1]} : vector<8x96xf32> to vector<8x32xf32>
    %22 = vector.extract_strided_slice %9 {offsets = [0, 64], sizes = [1, 32], strides = [1, 1]} : vector<1x96xf32> to vector<1x32xf32>
    %23 = vector.extract_strided_slice %5 {offsets = [0, 0], sizes = [32, 32], strides = [1, 1]} : vector<32x96xf32> to vector<32x32xf32>
    %24 = vector.extract_strided_slice %5 {offsets = [0, 32], sizes = [32, 32], strides = [1, 1]} : vector<32x96xf32> to vector<32x32xf32>
    %25 = vector.extract_strided_slice %5 {offsets = [0, 64], sizes = [32, 32], strides = [1, 1]} : vector<32x96xf32> to vector<32x32xf32>
    %cst_14 = arith.constant 0.000000e+00 : f32
    %26 = vector.broadcast %cst_14 : f32 to vector<1x32xf32>
    %27 = vector.extract_strided_slice %16 {offsets = [0, 0], sizes = [1, 32], strides = [1, 1]} : vector<8x32xf32> to vector<1x32xf32>
    %cst_15 = arith.constant dense<0.000000e+00> : vector<1x32xf32>
    %28 = tpu.matmul %26, %23, %cst_15 {dimension_numbers = #tpu.dot_dimension_numbers<[1], [0], [0], [1], [0, 0, 1, 1], [], []>} : vector<1x32xf32>, vector<32x32xf32>, vector<1x32xf32> -> vector<1x32xf32>
    %29 = arith.addf %27, %28 : vector<1x32xf32>
    %30 = arith.negf %29 : vector<1x32xf32>
    %31 = math.exp %30 : vector<1x32xf32>
    %cst_16 = arith.constant 1.000000e+00 : f32
    %32 = vector.broadcast %cst_16 : f32 to vector<1x32xf32>
    %33 = arith.addf %32, %31 : vector<1x32xf32>
    %34 = arith.divf %32, %33 : vector<1x32xf32>
    %35 = vector.extract_strided_slice %20 {offsets = [0, 0], sizes = [1, 32], strides = [1, 1]} : vector<8x32xf32> to vector<1x32xf32>
    %cst_17 = arith.constant dense<0.000000e+00> : vector<1x32xf32>
    %36 = tpu.matmul %26, %24, %cst_17 {dimension_numbers = #tpu.dot_dimension_numbers<[1], [0], [0], [1], [0, 0, 1, 1], [], []>} : vector<1x32xf32>, vector<32x32xf32>, vector<1x32xf32> -> vector<1x32xf32>
    %37 = arith.addf %35, %36 : vector<1x32xf32>
    %38 = arith.negf %37 : vector<1x32xf32>
    %39 = math.exp %38 : vector<1x32xf32>
    %cst_18 = arith.constant 1.000000e+00 : f32
    %40 = vector.broadcast %cst_18 : f32 to vector<1x32xf32>
    %41 = arith.addf %40, %39 : vector<1x32xf32>
    %42 = arith.divf %40, %41 : vector<1x32xf32>
    %43 = vector.extract_strided_slice %21 {offsets = [0, 0], sizes = [1, 32], strides = [1, 1]} : vector<8x32xf32> to vector<1x32xf32>
    %cst_19 = arith.constant dense<0.000000e+00> : vector<1x32xf32>
    %44 = tpu.matmul %26, %25, %cst_19 {dimension_numbers = #tpu.dot_dimension_numbers<[1], [0], [0], [1], [0, 0, 1, 1], [], []>} : vector<1x32xf32>, vector<32x32xf32>, vector<1x32xf32> -> vector<1x32xf32>
    %45 = arith.addf %44, %22 : vector<1x32xf32>
    %46 = arith.mulf %34, %45 : vector<1x32xf32>
    %47 = arith.addf %43, %46 : vector<1x32xf32>
    %48 = math.tanh %47 : vector<1x32xf32>
    %cst_20 = arith.constant 1.000000e+00 : f32
    %49 = vector.broadcast %cst_20 : f32 to vector<1x32xf32>
    %50 = arith.subf %49, %42 : vector<1x32xf32>
    %51 = arith.mulf %50, %48 : vector<1x32xf32>
    %52 = arith.mulf %42, %26 : vector<1x32xf32>
    %53 = arith.addf %51, %52 : vector<1x32xf32>
    %c0_21 = arith.constant 0 : index
    %c0_22 = arith.constant 0 : index
    %54 = vector.load %arg17[%c0_21, %c0_22] : memref<8x64xf32, #tpu.memory_space<vmem>>, vector<1x32xf32>
    tpu.vector_store %arg17[%c0_21, %c0_22], %53 {strides = array<i32>} : memref<8x64xf32, #tpu.memory_space<vmem>>, vector<1x32xf32>,
    %55 = vector.extract_strided_slice %16 {offsets = [1, 0], sizes = [1, 32], strides = [1, 1]} : vector<8x32xf32> to vector<1x32xf32>
    %cst_23 = arith.constant dense<0.000000e+00> : vector<1x32xf32>
    %56 = tpu.matmul %53, %23, %cst_23 {dimension_numbers = #tpu.dot_dimension_numbers<[1], [0], [0], [1], [0, 0, 1, 1], [], []>} : vector<1x32xf32>, vector<32x32xf32>, vector<1x32xf32> -> vector<1x32xf32>
    %57 = arith.addf %55, %56 : vector<1x32xf32>
    %58 = arith.negf %57 : vector<1x32xf32>
    %59 = math.exp %58 : vector<1x32xf32>
    %cst_24 = arith.constant 1.000000e+00 : f32
    %60 = vector.broadcast %cst_24 : f32 to vector<1x32xf32>
    %61 = arith.addf %60, %59 : vector<1x32xf32>
    %62 = arith.divf %60, %61 : vector<1x32xf32>
    %63 = vector.extract_strided_slice %20 {offsets = [1, 0], sizes = [1, 32], strides = [1, 1]} : vector<8x32xf32> to vector<1x32xf32>
    %cst_25 = arith.constant dense<0.000000e+00> : vector<1x32xf32>
    %64 = tpu.matmul %53, %24, %cst_25 {dimension_numbers = #tpu.dot_dimension_numbers<[1], [0], [0], [1], [0, 0, 1, 1], [], []>} : vector<1x32xf32>, vector<32x32xf32>, vector<1x32xf32> -> vector<1x32xf32>
    %65 = arith.addf %63, %64 : vector<1x32xf32>
    %66 = arith.negf %65 : vector<1x32xf32>
    %67 = math.exp %66 : vector<1x32xf32>
    %cst_26 = arith.constant 1.000000e+00 : f32
    %68 = vector.broadcast %cst_26 : f32 to vector<1x32xf32>
    %69 = arith.addf %68, %67 : vector<1x32xf32>
    %70 = arith.divf %68, %69 : vector<1x32xf32>
    %71 = vector.extract_strided_slice %21 {offsets = [1, 0], sizes = [1, 32], strides = [1, 1]} : vector<8x32xf32> to vector<1x32xf32>
    %cst_27 = arith.constant dense<0.000000e+00> : vector<1x32xf32>
    %72 = tpu.matmul %53, %25, %cst_27 {dimension_numbers = #tpu.dot_dimension_numbers<[1], [0], [0], [1], [0, 0, 1, 1], [], []>} : vector<1x32xf32>, vector<32x32xf32>, vector<1x32xf32> -> vector<1x32xf32>
    %73 = arith.addf %72, %22 : vector<1x32xf32>
    %74 = arith.mulf %62, %73 : vector<1x32xf32>
    %75 = arith.addf %71, %74 : vector<1x32xf32>
    %76 = math.tanh %75 : vector<1x32xf32>
    %cst_28 = arith.constant 1.000000e+00 : f32
    %77 = vector.broadcast %cst_28 : f32 to vector<1x32xf32>
    %78 = arith.subf %77, %70 : vector<1x32xf32>
    %79 = arith.mulf %78, %76 : vector<1x32xf32>
    %80 = arith.mulf %70, %53 : vector<1x32xf32>
    %81 = arith.addf %79, %80 : vector<1x32xf32>
    %c1 = arith.constant 1 : index
    %c0_29 = arith.constant 0 : index
    %82 = vector.load %arg17[%c1, %c0_29] : memref<8x64xf32, #tpu.memory_space<vmem>>, vector<1x32xf32>
    tpu.vector_store %arg17[%c1, %c0_29], %81 {strides = array<i32>} : memref<8x64xf32, #tpu.memory_space<vmem>>, vector<1x32xf32>,
    %83 = vector.extract_strided_slice %16 {offsets = [2, 0], sizes = [1, 32], strides = [1, 1]} : vector<8x32xf32> to vector<1x32xf32>
    %cst_30 = arith.constant dense<0.000000e+00> : vector<1x32xf32>
    %84 = tpu.matmul %81, %23, %cst_30 {dimension_numbers = #tpu.dot_dimension_numbers<[1], [0], [0], [1], [0, 0, 1, 1], [], []>} : vector<1x32xf32>, vector<32x32xf32>, vector<1x32xf32> -> vector<1x32xf32>
    %85 = arith.addf %83, %84 : vector<1x32xf32>
    %86 = arith.negf %85 : vector<1x32xf32>
    %87 = math.exp %86 : vector<1x32xf32>
    %cst_31 = arith.constant 1.000000e+00 : f32
    %88 = vector.broadcast %cst_31 : f32 to vector<1x32xf32>
    %89 = arith.addf %88, %87 : vector<1x32xf32>
    %90 = arith.divf %88, %89 : vector<1x32xf32>
    %91 = vector.extract_strided_slice %20 {offsets = [2, 0], sizes = [1, 32], strides = [1, 1]} : vector<8x32xf32> to vector<1x32xf32>
    %cst_32 = arith.constant dense<0.000000e+00> : vector<1x32xf32>
    %92 = tpu.matmul %81, %24, %cst_32 {dimension_numbers = #tpu.dot_dimension_numbers<[1], [0], [0], [1], [0, 0, 1, 1], [], []>} : vector<1x32xf32>, vector<32x32xf32>, vector<1x32xf32> -> vector<1x32xf32>
    %93 = arith.addf %91, %92 : vector<1x32xf32>
    %94 = arith.negf %93 : vector<1x32xf32>
    %95 = math.exp %94 : vector<1x32xf32>
    %cst_33 = arith.constant 1.000000e+00 : f32
    %96 = vector.broadcast %cst_33 : f32 to vector<1x32xf32>
    %97 = arith.addf %96, %95 : vector<1x32xf32>
    %98 = arith.divf %96, %97 : vector<1x32xf32>
    %99 = vector.extract_strided_slice %21 {offsets = [2, 0], sizes = [1, 32], strides = [1, 1]} : vector<8x32xf32> to vector<1x32xf32>
    %cst_34 = arith.constant dense<0.000000e+00> : vector<1x32xf32>
    %100 = tpu.matmul %81, %25, %cst_34 {dimension_numbers = #tpu.dot_dimension_numbers<[1], [0], [0], [1], [0, 0, 1, 1], [], []>} : vector<1x32xf32>, vector<32x32xf32>, vector<1x32xf32> -> vector<1x32xf32>
    %101 = arith.addf %100, %22 : vector<1x32xf32>
    %102 = arith.mulf %90, %101 : vector<1x32xf32>
    %103 = arith.addf %99, %102 : vector<1x32xf32>
    %104 = math.tanh %103 : vector<1x32xf32>
    %cst_35 = arith.constant 1.000000e+00 : f32
    %105 = vector.broadcast %cst_35 : f32 to vector<1x32xf32>
    %106 = arith.subf %105, %98 : vector<1x32xf32>
    %107 = arith.mulf %106, %104 : vector<1x32xf32>
    %108 = arith.mulf %98, %81 : vector<1x32xf32>
    %109 = arith.addf %107, %108 : vector<1x32xf32>
    %c2 = arith.constant 2 : index
    %c0_36 = arith.constant 0 : index
    %110 = vector.load %arg17[%c2, %c0_36] : memref<8x64xf32, #tpu.memory_space<vmem>>, vector<1x32xf32>
    tpu.vector_store %arg17[%c2, %c0_36], %109 {strides = array<i32>} : memref<8x64xf32, #tpu.memory_space<vmem>>, vector<1x32xf32>,
    %111 = vector.extract_strided_slice %16 {offsets = [3, 0], sizes = [1, 32], strides = [1, 1]} : vector<8x32xf32> to vector<1x32xf32>
    %cst_37 = arith.constant dense<0.000000e+00> : vector<1x32xf32>
    %112 = tpu.matmul %109, %23, %cst_37 {dimension_numbers = #tpu.dot_dimension_numbers<[1], [0], [0], [1], [0, 0, 1, 1], [], []>} : vector<1x32xf32>, vector<32x32xf32>, vector<1x32xf32> -> vector<1x32xf32>
    %113 = arith.addf %111, %112 : vector<1x32xf32>
    %114 = arith.negf %113 : vector<1x32xf32>
    %115 = math.exp %114 : vector<1x32xf32>
    %cst_38 = arith.constant 1.000000e+00 : f32
    %116 = vector.broadcast %cst_38 : f32 to vector<1x32xf32>
    %117 = arith.addf %116, %115 : vector<1x32xf32>
    %118 = arith.divf %116, %117 : vector<1x32xf32>
    %119 = vector.extract_strided_slice %20 {offsets = [3, 0], sizes = [1, 32], strides = [1, 1]} : vector<8x32xf32> to vector<1x32xf32>
    %cst_39 = arith.constant dense<0.000000e+00> : vector<1x32xf32>
    %120 = tpu.matmul %109, %24, %cst_39 {dimension_numbers = #tpu.dot_dimension_numbers<[1], [0], [0], [1], [0, 0, 1, 1], [], []>} : vector<1x32xf32>, vector<32x32xf32>, vector<1x32xf32> -> vector<1x32xf32>
    %121 = arith.addf %119, %120 : vector<1x32xf32>
    %122 = arith.negf %121 : vector<1x32xf32>
    %123 = math.exp %122 : vector<1x32xf32>
    %cst_40 = arith.constant 1.000000e+00 : f32
    %124 = vector.broadcast %cst_40 : f32 to vector<1x32xf32>
    %125 = arith.addf %124, %123 : vector<1x32xf32>
    %126 = arith.divf %124, %125 : vector<1x32xf32>
    %127 = vector.extract_strided_slice %21 {offsets = [3, 0], sizes = [1, 32], strides = [1, 1]} : vector<8x32xf32> to vector<1x32xf32>
    %cst_41 = arith.constant dense<0.000000e+00> : vector<1x32xf32>
    %128 = tpu.matmul %109, %25, %cst_41 {dimension_numbers = #tpu.dot_dimension_numbers<[1], [0], [0], [1], [0, 0, 1, 1], [], []>} : vector<1x32xf32>, vector<32x32xf32>, vector<1x32xf32> -> vector<1x32xf32>
    %129 = arith.addf %128, %22 : vector<1x32xf32>
    %130 = arith.mulf %118, %129 : vector<1x32xf32>
    %131 = arith.addf %127, %130 : vector<1x32xf32>
    %132 = math.tanh %131 : vector<1x32xf32>
    %cst_42 = arith.constant 1.000000e+00 : f32
    %133 = vector.broadcast %cst_42 : f32 to vector<1x32xf32>
    %134 = arith.subf %133, %126 : vector<1x32xf32>
    %135 = arith.mulf %134, %132 : vector<1x32xf32>
    %136 = arith.mulf %126, %109 : vector<1x32xf32>
    %137 = arith.addf %135, %136 : vector<1x32xf32>
    %c3 = arith.constant 3 : index
    %c0_43 = arith.constant 0 : index
    %138 = vector.load %arg17[%c3, %c0_43] : memref<8x64xf32, #tpu.memory_space<vmem>>, vector<1x32xf32>
    tpu.vector_store %arg17[%c3, %c0_43], %137 {strides = array<i32>} : memref<8x64xf32, #tpu.memory_space<vmem>>, vector<1x32xf32>,
    %139 = vector.extract_strided_slice %16 {offsets = [4, 0], sizes = [1, 32], strides = [1, 1]} : vector<8x32xf32> to vector<1x32xf32>
    %cst_44 = arith.constant dense<0.000000e+00> : vector<1x32xf32>
    %140 = tpu.matmul %137, %23, %cst_44 {dimension_numbers = #tpu.dot_dimension_numbers<[1], [0], [0], [1], [0, 0, 1, 1], [], []>} : vector<1x32xf32>, vector<32x32xf32>, vector<1x32xf32> -> vector<1x32xf32>
    %141 = arith.addf %139, %140 : vector<1x32xf32>
    %142 = arith.negf %141 : vector<1x32xf32>
    %143 = math.exp %142 : vector<1x32xf32>
    %cst_45 = arith.constant 1.000000e+00 : f32
    %144 = vector.broadcast %cst_45 : f32 to vector<1x32xf32>
    %145 = arith.addf %144, %143 : vector<1x32xf32>
    %146 = arith.divf %144, %145 : vector<1x32xf32>
    %147 = vector.extract_strided_slice %20 {offsets = [4, 0], sizes = [1, 32], strides = [1, 1]} : vector<8x32xf32> to vector<1x32xf32>
    %cst_46 = arith.constant dense<0.000000e+00> : vector<1x32xf32>
    %148 = tpu.matmul %137, %24, %cst_46 {dimension_numbers = #tpu.dot_dimension_numbers<[1], [0], [0], [1], [0, 0, 1, 1], [], []>} : vector<1x32xf32>, vector<32x32xf32>, vector<1x32xf32> -> vector<1x32xf32>
    %149 = arith.addf %147, %148 : vector<1x32xf32>
    %150 = arith.negf %149 : vector<1x32xf32>
    %151 = math.exp %150 : vector<1x32xf32>
    %cst_47 = arith.constant 1.000000e+00 : f32
    %152 = vector.broadcast %cst_47 : f32 to vector<1x32xf32>
    %153 = arith.addf %152, %151 : vector<1x32xf32>
    %154 = arith.divf %152, %153 : vector<1x32xf32>
    %155 = vector.extract_strided_slice %21 {offsets = [4, 0], sizes = [1, 32], strides = [1, 1]} : vector<8x32xf32> to vector<1x32xf32>
    %cst_48 = arith.constant dense<0.000000e+00> : vector<1x32xf32>
    %156 = tpu.matmul %137, %25, %cst_48 {dimension_numbers = #tpu.dot_dimension_numbers<[1], [0], [0], [1], [0, 0, 1, 1], [], []>} : vector<1x32xf32>, vector<32x32xf32>, vector<1x32xf32> -> vector<1x32xf32>
    %157 = arith.addf %156, %22 : vector<1x32xf32>
    %158 = arith.mulf %146, %157 : vector<1x32xf32>
    %159 = arith.addf %155, %158 : vector<1x32xf32>
    %160 = math.tanh %159 : vector<1x32xf32>
    %cst_49 = arith.constant 1.000000e+00 : f32
    %161 = vector.broadcast %cst_49 : f32 to vector<1x32xf32>
    %162 = arith.subf %161, %154 : vector<1x32xf32>
    %163 = arith.mulf %162, %160 : vector<1x32xf32>
    %164 = arith.mulf %154, %137 : vector<1x32xf32>
    %165 = arith.addf %163, %164 : vector<1x32xf32>
    %c4 = arith.constant 4 : index
    %c0_50 = arith.constant 0 : index
    %166 = vector.load %arg17[%c4, %c0_50] : memref<8x64xf32, #tpu.memory_space<vmem>>, vector<1x32xf32>
    tpu.vector_store %arg17[%c4, %c0_50], %165 {strides = array<i32>} : memref<8x64xf32, #tpu.memory_space<vmem>>, vector<1x32xf32>,
    %167 = vector.extract_strided_slice %16 {offsets = [5, 0], sizes = [1, 32], strides = [1, 1]} : vector<8x32xf32> to vector<1x32xf32>
    %cst_51 = arith.constant dense<0.000000e+00> : vector<1x32xf32>
    %168 = tpu.matmul %165, %23, %cst_51 {dimension_numbers = #tpu.dot_dimension_numbers<[1], [0], [0], [1], [0, 0, 1, 1], [], []>} : vector<1x32xf32>, vector<32x32xf32>, vector<1x32xf32> -> vector<1x32xf32>
    %169 = arith.addf %167, %168 : vector<1x32xf32>
    %170 = arith.negf %169 : vector<1x32xf32>
    %171 = math.exp %170 : vector<1x32xf32>
    %cst_52 = arith.constant 1.000000e+00 : f32
    %172 = vector.broadcast %cst_52 : f32 to vector<1x32xf32>
    %173 = arith.addf %172, %171 : vector<1x32xf32>
    %174 = arith.divf %172, %173 : vector<1x32xf32>
    %175 = vector.extract_strided_slice %20 {offsets = [5, 0], sizes = [1, 32], strides = [1, 1]} : vector<8x32xf32> to vector<1x32xf32>
    %cst_53 = arith.constant dense<0.000000e+00> : vector<1x32xf32>
    %176 = tpu.matmul %165, %24, %cst_53 {dimension_numbers = #tpu.dot_dimension_numbers<[1], [0], [0], [1], [0, 0, 1, 1], [], []>} : vector<1x32xf32>, vector<32x32xf32>, vector<1x32xf32> -> vector<1x32xf32>
    %177 = arith.addf %175, %176 : vector<1x32xf32>
    %178 = arith.negf %177 : vector<1x32xf32>
    %179 = math.exp %178 : vector<1x32xf32>
    %cst_54 = arith.constant 1.000000e+00 : f32
    %180 = vector.broadcast %cst_54 : f32 to vector<1x32xf32>
    %181 = arith.addf %180, %179 : vector<1x32xf32>
    %182 = arith.divf %180, %181 : vector<1x32xf32>
    %183 = vector.extract_strided_slice %21 {offsets = [5, 0], sizes = [1, 32], strides = [1, 1]} : vector<8x32xf32> to vector<1x32xf32>
    %cst_55 = arith.constant dense<0.000000e+00> : vector<1x32xf32>
    %184 = tpu.matmul %165, %25, %cst_55 {dimension_numbers = #tpu.dot_dimension_numbers<[1], [0], [0], [1], [0, 0, 1, 1], [], []>} : vector<1x32xf32>, vector<32x32xf32>, vector<1x32xf32> -> vector<1x32xf32>
    %185 = arith.addf %184, %22 : vector<1x32xf32>
    %186 = arith.mulf %174, %185 : vector<1x32xf32>
    %187 = arith.addf %183, %186 : vector<1x32xf32>
    %188 = math.tanh %187 : vector<1x32xf32>
    %cst_56 = arith.constant 1.000000e+00 : f32
    %189 = vector.broadcast %cst_56 : f32 to vector<1x32xf32>
    %190 = arith.subf %189, %182 : vector<1x32xf32>
    %191 = arith.mulf %190, %188 : vector<1x32xf32>
    %192 = arith.mulf %182, %165 : vector<1x32xf32>
    %193 = arith.addf %191, %192 : vector<1x32xf32>
    %c5 = arith.constant 5 : index
    %c0_57 = arith.constant 0 : index
    %194 = vector.load %arg17[%c5, %c0_57] : memref<8x64xf32, #tpu.memory_space<vmem>>, vector<1x32xf32>
    tpu.vector_store %arg17[%c5, %c0_57], %193 {strides = array<i32>} : memref<8x64xf32, #tpu.memory_space<vmem>>, vector<1x32xf32>,
    %195 = vector.extract_strided_slice %16 {offsets = [6, 0], sizes = [1, 32], strides = [1, 1]} : vector<8x32xf32> to vector<1x32xf32>
    %cst_58 = arith.constant dense<0.000000e+00> : vector<1x32xf32>
    %196 = tpu.matmul %193, %23, %cst_58 {dimension_numbers = #tpu.dot_dimension_numbers<[1], [0], [0], [1], [0, 0, 1, 1], [], []>} : vector<1x32xf32>, vector<32x32xf32>, vector<1x32xf32> -> vector<1x32xf32>
    %197 = arith.addf %195, %196 : vector<1x32xf32>
    %198 = arith.negf %197 : vector<1x32xf32>
    %199 = math.exp %198 : vector<1x32xf32>
    %cst_59 = arith.constant 1.000000e+00 : f32
    %200 = vector.broadcast %cst_59 : f32 to vector<1x32xf32>
    %201 = arith.addf %200, %199 : vector<1x32xf32>
    %202 = arith.divf %200, %201 : vector<1x32xf32>
    %203 = vector.extract_strided_slice %20 {offsets = [6, 0], sizes = [1, 32], strides = [1, 1]} : vector<8x32xf32> to vector<1x32xf32>
    %cst_60 = arith.constant dense<0.000000e+00> : vector<1x32xf32>
    %204 = tpu.matmul %193, %24, %cst_60 {dimension_numbers = #tpu.dot_dimension_numbers<[1], [0], [0], [1], [0, 0, 1, 1], [], []>} : vector<1x32xf32>, vector<32x32xf32>, vector<1x32xf32> -> vector<1x32xf32>
    %205 = arith.addf %203, %204 : vector<1x32xf32>
    %206 = arith.negf %205 : vector<1x32xf32>
    %207 = math.exp %206 : vector<1x32xf32>
    %cst_61 = arith.constant 1.000000e+00 : f32
    %208 = vector.broadcast %cst_61 : f32 to vector<1x32xf32>
    %209 = arith.addf %208, %207 : vector<1x32xf32>
    %210 = arith.divf %208, %209 : vector<1x32xf32>
    %211 = vector.extract_strided_slice %21 {offsets = [6, 0], sizes = [1, 32], strides = [1, 1]} : vector<8x32xf32> to vector<1x32xf32>
    %cst_62 = arith.constant dense<0.000000e+00> : vector<1x32xf32>
    %212 = tpu.matmul %193, %25, %cst_62 {dimension_numbers = #tpu.dot_dimension_numbers<[1], [0], [0], [1], [0, 0, 1, 1], [], []>} : vector<1x32xf32>, vector<32x32xf32>, vector<1x32xf32> -> vector<1x32xf32>
    %213 = arith.addf %212, %22 : vector<1x32xf32>
    %214 = arith.mulf %202, %213 : vector<1x32xf32>
    %215 = arith.addf %211, %214 : vector<1x32xf32>
    %216 = math.tanh %215 : vector<1x32xf32>
    %cst_63 = arith.constant 1.000000e+00 : f32
    %217 = vector.broadcast %cst_63 : f32 to vector<1x32xf32>
    %218 = arith.subf %217, %210 : vector<1x32xf32>
    %219 = arith.mulf %218, %216 : vector<1x32xf32>
    %220 = arith.mulf %210, %193 : vector<1x32xf32>
    %221 = arith.addf %219, %220 : vector<1x32xf32>
    %c6 = arith.constant 6 : index
    %c0_64 = arith.constant 0 : index
    %222 = vector.load %arg17[%c6, %c0_64] : memref<8x64xf32, #tpu.memory_space<vmem>>, vector<1x32xf32>
    tpu.vector_store %arg17[%c6, %c0_64], %221 {strides = array<i32>} : memref<8x64xf32, #tpu.memory_space<vmem>>, vector<1x32xf32>,
    %223 = vector.extract_strided_slice %16 {offsets = [7, 0], sizes = [1, 32], strides = [1, 1]} : vector<8x32xf32> to vector<1x32xf32>
    %cst_65 = arith.constant dense<0.000000e+00> : vector<1x32xf32>
    %224 = tpu.matmul %221, %23, %cst_65 {dimension_numbers = #tpu.dot_dimension_numbers<[1], [0], [0], [1], [0, 0, 1, 1], [], []>} : vector<1x32xf32>, vector<32x32xf32>, vector<1x32xf32> -> vector<1x32xf32>
    %225 = arith.addf %223, %224 : vector<1x32xf32>
    %226 = arith.negf %225 : vector<1x32xf32>
    %227 = math.exp %226 : vector<1x32xf32>
    %cst_66 = arith.constant 1.000000e+00 : f32
    %228 = vector.broadcast %cst_66 : f32 to vector<1x32xf32>
    %229 = arith.addf %228, %227 : vector<1x32xf32>
    %230 = arith.divf %228, %229 : vector<1x32xf32>
    %231 = vector.extract_strided_slice %20 {offsets = [7, 0], sizes = [1, 32], strides = [1, 1]} : vector<8x32xf32> to vector<1x32xf32>
    %cst_67 = arith.constant dense<0.000000e+00> : vector<1x32xf32>
    %232 = tpu.matmul %221, %24, %cst_67 {dimension_numbers = #tpu.dot_dimension_numbers<[1], [0], [0], [1], [0, 0, 1, 1], [], []>} : vector<1x32xf32>, vector<32x32xf32>, vector<1x32xf32> -> vector<1x32xf32>
    %233 = arith.addf %231, %232 : vector<1x32xf32>
    %234 = arith.negf %233 : vector<1x32xf32>
    %235 = math.exp %234 : vector<1x32xf32>
    %cst_68 = arith.constant 1.000000e+00 : f32
    %236 = vector.broadcast %cst_68 : f32 to vector<1x32xf32>
    %237 = arith.addf %236, %235 : vector<1x32xf32>
    %238 = arith.divf %236, %237 : vector<1x32xf32>
    %239 = vector.extract_strided_slice %21 {offsets = [7, 0], sizes = [1, 32], strides = [1, 1]} : vector<8x32xf32> to vector<1x32xf32>
    %cst_69 = arith.constant dense<0.000000e+00> : vector<1x32xf32>
    %240 = tpu.matmul %221, %25, %cst_69 {dimension_numbers = #tpu.dot_dimension_numbers<[1], [0], [0], [1], [0, 0, 1, 1], [], []>} : vector<1x32xf32>, vector<32x32xf32>, vector<1x32xf32> -> vector<1x32xf32>
    %241 = arith.addf %240, %22 : vector<1x32xf32>
    %242 = arith.mulf %230, %241 : vector<1x32xf32>
    %243 = arith.addf %239, %242 : vector<1x32xf32>
    %244 = math.tanh %243 : vector<1x32xf32>
    %cst_70 = arith.constant 1.000000e+00 : f32
    %245 = vector.broadcast %cst_70 : f32 to vector<1x32xf32>
    %246 = arith.subf %245, %238 : vector<1x32xf32>
    %247 = arith.mulf %246, %244 : vector<1x32xf32>
    %248 = arith.mulf %238, %221 : vector<1x32xf32>
    %249 = arith.addf %247, %248 : vector<1x32xf32>
    %c7 = arith.constant 7 : index
    %c0_71 = arith.constant 0 : index
    %250 = vector.load %arg17[%c7, %c0_71] : memref<8x64xf32, #tpu.memory_space<vmem>>, vector<1x32xf32>
    tpu.vector_store %arg17[%c7, %c0_71], %249 {strides = array<i32>} : memref<8x64xf32, #tpu.memory_space<vmem>>, vector<1x32xf32>,
    %c1_72 = arith.constant 1 : index
    %c0_73 = arith.constant 0 : index
    %c0_74 = arith.constant 0 : index
    %251 = vector.load %arg2[%c1_72, %c0_73, %c0_74] : memref<2x64x96xf32, #tpu.memory_space<vmem>>, vector<1x64x96xf32>
    %252 = vector.shape_cast %251 : vector<1x64x96xf32> to vector<64x96xf32>
    %c1_75 = arith.constant 1 : index
    %c0_76 = arith.constant 0 : index
    %c0_77 = arith.constant 0 : index
    %253 = vector.load %arg4[%c1_75, %c0_76, %c0_77] : memref<2x32x96xf32, #tpu.memory_space<vmem>>, vector<1x32x96xf32>
    %254 = vector.shape_cast %253 : vector<1x32x96xf32> to vector<32x96xf32>
    %c1_78 = arith.constant 1 : index
    %c0_79 = arith.constant 0 : index
    %c0_80 = arith.constant 0 : index
    %255 = vector.load %arg3[%c1_78, %c0_79, %c0_80] : memref<2x1x96xf32, #tpu.memory_space<vmem>>, vector<1x1x96xf32>
    %256 = vector.shape_cast %255 : vector<1x1x96xf32> to vector<1x96xf32>
    %c1_81 = arith.constant 1 : index
    %c0_82 = arith.constant 0 : index
    %c0_83 = arith.constant 0 : index
    %257 = vector.load %arg5[%c1_81, %c0_82, %c0_83] : memref<2x1x96xf32, #tpu.memory_space<vmem>>, vector<1x1x96xf32>
    %258 = vector.shape_cast %257 : vector<1x1x96xf32> to vector<1x96xf32>
    %cst_84 = arith.constant dense<0.000000e+00> : vector<8x96xf32>
    %259 = tpu.matmul %1, %252, %cst_84 {dimension_numbers = #tpu.dot_dimension_numbers<[1], [0], [0], [1], [0, 0, 1, 1], [], []>} : vector<8x64xf32>, vector<64x96xf32>, vector<8x96xf32> -> vector<8x96xf32>
    %260 = vector.broadcast %256 : vector<1x96xf32> to vector<8x96xf32>
    %261 = arith.addf %259, %260 : vector<8x96xf32>
    %262 = vector.extract_strided_slice %261 {offsets = [0, 0], sizes = [8, 32], strides = [1, 1]} : vector<8x96xf32> to vector<8x32xf32>
    %263 = vector.extract_strided_slice %258 {offsets = [0, 0], sizes = [1, 32], strides = [1, 1]} : vector<1x96xf32> to vector<1x32xf32>
    %264 = vector.broadcast %263 : vector<1x32xf32> to vector<8x32xf32>
    %265 = arith.addf %262, %264 : vector<8x32xf32>
    %266 = vector.extract_strided_slice %261 {offsets = [0, 32], sizes = [8, 32], strides = [1, 1]} : vector<8x96xf32> to vector<8x32xf32>
    %267 = vector.extract_strided_slice %258 {offsets = [0, 32], sizes = [1, 32], strides = [1, 1]} : vector<1x96xf32> to vector<1x32xf32>
    %268 = vector.broadcast %267 : vector<1x32xf32> to vector<8x32xf32>
    %269 = arith.addf %266, %268 : vector<8x32xf32>
    %270 = vector.extract_strided_slice %261 {offsets = [0, 64], sizes = [8, 32], strides = [1, 1]} : vector<8x96xf32> to vector<8x32xf32>
    %271 = vector.extract_strided_slice %258 {offsets = [0, 64], sizes = [1, 32], strides = [1, 1]} : vector<1x96xf32> to vector<1x32xf32>
    %272 = vector.extract_strided_slice %254 {offsets = [0, 0], sizes = [32, 32], strides = [1, 1]} : vector<32x96xf32> to vector<32x32xf32>
    %273 = vector.extract_strided_slice %254 {offsets = [0, 32], sizes = [32, 32], strides = [1, 1]} : vector<32x96xf32> to vector<32x32xf32>
    %274 = vector.extract_strided_slice %254 {offsets = [0, 64], sizes = [32, 32], strides = [1, 1]} : vector<32x96xf32> to vector<32x32xf32>
    %cst_85 = arith.constant 0.000000e+00 : f32
    %275 = vector.broadcast %cst_85 : f32 to vector<1x32xf32>
    %276 = vector.extract_strided_slice %265 {offsets = [7, 0], sizes = [1, 32], strides = [1, 1]} : vector<8x32xf32> to vector<1x32xf32>
    %cst_86 = arith.constant dense<0.000000e+00> : vector<1x32xf32>
    %277 = tpu.matmul %275, %272, %cst_86 {dimension_numbers = #tpu.dot_dimension_numbers<[1], [0], [0], [1], [0, 0, 1, 1], [], []>} : vector<1x32xf32>, vector<32x32xf32>, vector<1x32xf32> -> vector<1x32xf32>
    %278 = arith.addf %276, %277 : vector<1x32xf32>
    %279 = arith.negf %278 : vector<1x32xf32>
    %280 = math.exp %279 : vector<1x32xf32>
    %cst_87 = arith.constant 1.000000e+00 : f32
    %281 = vector.broadcast %cst_87 : f32 to vector<1x32xf32>
    %282 = arith.addf %281, %280 : vector<1x32xf32>
    %283 = arith.divf %281, %282 : vector<1x32xf32>
    %284 = vector.extract_strided_slice %269 {offsets = [7, 0], sizes = [1, 32], strides = [1, 1]} : vector<8x32xf32> to vector<1x32xf32>
    %cst_88 = arith.constant dense<0.000000e+00> : vector<1x32xf32>
    %285 = tpu.matmul %275, %273, %cst_88 {dimension_numbers = #tpu.dot_dimension_numbers<[1], [0], [0], [1], [0, 0, 1, 1], [], []>} : vector<1x32xf32>, vector<32x32xf32>, vector<1x32xf32> -> vector<1x32xf32>
    %286 = arith.addf %284, %285 : vector<1x32xf32>
    %287 = arith.negf %286 : vector<1x32xf32>
    %288 = math.exp %287 : vector<1x32xf32>
    %cst_89 = arith.constant 1.000000e+00 : f32
    %289 = vector.broadcast %cst_89 : f32 to vector<1x32xf32>
    %290 = arith.addf %289, %288 : vector<1x32xf32>
    %291 = arith.divf %289, %290 : vector<1x32xf32>
    %292 = vector.extract_strided_slice %270 {offsets = [7, 0], sizes = [1, 32], strides = [1, 1]} : vector<8x32xf32> to vector<1x32xf32>
    %cst_90 = arith.constant dense<0.000000e+00> : vector<1x32xf32>
    %293 = tpu.matmul %275, %274, %cst_90 {dimension_numbers = #tpu.dot_dimension_numbers<[1], [0], [0], [1], [0, 0, 1, 1], [], []>} : vector<1x32xf32>, vector<32x32xf32>, vector<1x32xf32> -> vector<1x32xf32>
    %294 = arith.addf %293, %271 : vector<1x32xf32>
    %295 = arith.mulf %283, %294 : vector<1x32xf32>
    %296 = arith.addf %292, %295 : vector<1x32xf32>
    %297 = math.tanh %296 : vector<1x32xf32>
    %cst_91 = arith.constant 1.000000e+00 : f32
    %298 = vector.broadcast %cst_91 : f32 to vector<1x32xf32>
    %299 = arith.subf %298, %291 : vector<1x32xf32>
    %300 = arith.mulf %299, %297 : vector<1x32xf32>
    %301 = arith.mulf %291, %275 : vector<1x32xf32>
    %302 = arith.addf %300, %301 : vector<1x32xf32>
    %c7_92 = arith.constant 7 : index
    %c32 = arith.constant 32 : index
    %303 = vector.load %arg17[%c7_92, %c32] : memref<8x64xf32, #tpu.memory_space<vmem>>, vector<1x32xf32>
    tpu.vector_store %arg17[%c7_92, %c32], %302 {strides = array<i32>} : memref<8x64xf32, #tpu.memory_space<vmem>>, vector<1x32xf32>,
    %304 = vector.extract_strided_slice %265 {offsets = [6, 0], sizes = [1, 32], strides = [1, 1]} : vector<8x32xf32> to vector<1x32xf32>
    %cst_93 = arith.constant dense<0.000000e+00> : vector<1x32xf32>
    %305 = tpu.matmul %302, %272, %cst_93 {dimension_numbers = #tpu.dot_dimension_numbers<[1], [0], [0], [1], [0, 0, 1, 1], [], []>} : vector<1x32xf32>, vector<32x32xf32>, vector<1x32xf32> -> vector<1x32xf32>
    %306 = arith.addf %304, %305 : vector<1x32xf32>
    %307 = arith.negf %306 : vector<1x32xf32>
    %308 = math.exp %307 : vector<1x32xf32>
    %cst_94 = arith.constant 1.000000e+00 : f32
    %309 = vector.broadcast %cst_94 : f32 to vector<1x32xf32>
    %310 = arith.addf %309, %308 : vector<1x32xf32>
    %311 = arith.divf %309, %310 : vector<1x32xf32>
    %312 = vector.extract_strided_slice %269 {offsets = [6, 0], sizes = [1, 32], strides = [1, 1]} : vector<8x32xf32> to vector<1x32xf32>
    %cst_95 = arith.constant dense<0.000000e+00> : vector<1x32xf32>
    %313 = tpu.matmul %302, %273, %cst_95 {dimension_numbers = #tpu.dot_dimension_numbers<[1], [0], [0], [1], [0, 0, 1, 1], [], []>} : vector<1x32xf32>, vector<32x32xf32>, vector<1x32xf32> -> vector<1x32xf32>
    %314 = arith.addf %312, %313 : vector<1x32xf32>
    %315 = arith.negf %314 : vector<1x32xf32>
    %316 = math.exp %315 : vector<1x32xf32>
    %cst_96 = arith.constant 1.000000e+00 : f32
    %317 = vector.broadcast %cst_96 : f32 to vector<1x32xf32>
    %318 = arith.addf %317, %316 : vector<1x32xf32>
    %319 = arith.divf %317, %318 : vector<1x32xf32>
    %320 = vector.extract_strided_slice %270 {offsets = [6, 0], sizes = [1, 32], strides = [1, 1]} : vector<8x32xf32> to vector<1x32xf32>
    %cst_97 = arith.constant dense<0.000000e+00> : vector<1x32xf32>
    %321 = tpu.matmul %302, %274, %cst_97 {dimension_numbers = #tpu.dot_dimension_numbers<[1], [0], [0], [1], [0, 0, 1, 1], [], []>} : vector<1x32xf32>, vector<32x32xf32>, vector<1x32xf32> -> vector<1x32xf32>
    %322 = arith.addf %321, %271 : vector<1x32xf32>
    %323 = arith.mulf %311, %322 : vector<1x32xf32>
    %324 = arith.addf %320, %323 : vector<1x32xf32>
    %325 = math.tanh %324 : vector<1x32xf32>
    %cst_98 = arith.constant 1.000000e+00 : f32
    %326 = vector.broadcast %cst_98 : f32 to vector<1x32xf32>
    %327 = arith.subf %326, %319 : vector<1x32xf32>
    %328 = arith.mulf %327, %325 : vector<1x32xf32>
    %329 = arith.mulf %319, %302 : vector<1x32xf32>
    %330 = arith.addf %328, %329 : vector<1x32xf32>
    %c6_99 = arith.constant 6 : index
    %c32_100 = arith.constant 32 : index
    %331 = vector.load %arg17[%c6_99, %c32_100] : memref<8x64xf32, #tpu.memory_space<vmem>>, vector<1x32xf32>
    tpu.vector_store %arg17[%c6_99, %c32_100], %330 {strides = array<i32>} : memref<8x64xf32, #tpu.memory_space<vmem>>, vector<1x32xf32>,
    %332 = vector.extract_strided_slice %265 {offsets = [5, 0], sizes = [1, 32], strides = [1, 1]} : vector<8x32xf32> to vector<1x32xf32>
    %cst_101 = arith.constant dense<0.000000e+00> : vector<1x32xf32>
    %333 = tpu.matmul %330, %272, %cst_101 {dimension_numbers = #tpu.dot_dimension_numbers<[1], [0], [0], [1], [0, 0, 1, 1], [], []>} : vector<1x32xf32>, vector<32x32xf32>, vector<1x32xf32> -> vector<1x32xf32>
    %334 = arith.addf %332, %333 : vector<1x32xf32>
    %335 = arith.negf %334 : vector<1x32xf32>
    %336 = math.exp %335 : vector<1x32xf32>
    %cst_102 = arith.constant 1.000000e+00 : f32
    %337 = vector.broadcast %cst_102 : f32 to vector<1x32xf32>
    %338 = arith.addf %337, %336 : vector<1x32xf32>
    %339 = arith.divf %337, %338 : vector<1x32xf32>
    %340 = vector.extract_strided_slice %269 {offsets = [5, 0], sizes = [1, 32], strides = [1, 1]} : vector<8x32xf32> to vector<1x32xf32>
    %cst_103 = arith.constant dense<0.000000e+00> : vector<1x32xf32>
    %341 = tpu.matmul %330, %273, %cst_103 {dimension_numbers = #tpu.dot_dimension_numbers<[1], [0], [0], [1], [0, 0, 1, 1], [], []>} : vector<1x32xf32>, vector<32x32xf32>, vector<1x32xf32> -> vector<1x32xf32>
    %342 = arith.addf %340, %341 : vector<1x32xf32>
    %343 = arith.negf %342 : vector<1x32xf32>
    %344 = math.exp %343 : vector<1x32xf32>
    %cst_104 = arith.constant 1.000000e+00 : f32
    %345 = vector.broadcast %cst_104 : f32 to vector<1x32xf32>
    %346 = arith.addf %345, %344 : vector<1x32xf32>
    %347 = arith.divf %345, %346 : vector<1x32xf32>
    %348 = vector.extract_strided_slice %270 {offsets = [5, 0], sizes = [1, 32], strides = [1, 1]} : vector<8x32xf32> to vector<1x32xf32>
    %cst_105 = arith.constant dense<0.000000e+00> : vector<1x32xf32>
    %349 = tpu.matmul %330, %274, %cst_105 {dimension_numbers = #tpu.dot_dimension_numbers<[1], [0], [0], [1], [0, 0, 1, 1], [], []>} : vector<1x32xf32>, vector<32x32xf32>, vector<1x32xf32> -> vector<1x32xf32>
    %350 = arith.addf %349, %271 : vector<1x32xf32>
    %351 = arith.mulf %339, %350 : vector<1x32xf32>
    %352 = arith.addf %348, %351 : vector<1x32xf32>
    %353 = math.tanh %352 : vector<1x32xf32>
    %cst_106 = arith.constant 1.000000e+00 : f32
    %354 = vector.broadcast %cst_106 : f32 to vector<1x32xf32>
    %355 = arith.subf %354, %347 : vector<1x32xf32>
    %356 = arith.mulf %355, %353 : vector<1x32xf32>
    %357 = arith.mulf %347, %330 : vector<1x32xf32>
    %358 = arith.addf %356, %357 : vector<1x32xf32>
    %c5_107 = arith.constant 5 : index
    %c32_108 = arith.constant 32 : index
    %359 = vector.load %arg17[%c5_107, %c32_108] : memref<8x64xf32, #tpu.memory_space<vmem>>, vector<1x32xf32>
    tpu.vector_store %arg17[%c5_107, %c32_108], %358 {strides = array<i32>} : memref<8x64xf32, #tpu.memory_space<vmem>>, vector<1x32xf32>,
    %360 = vector.extract_strided_slice %265 {offsets = [4, 0], sizes = [1, 32], strides = [1, 1]} : vector<8x32xf32> to vector<1x32xf32>
    %cst_109 = arith.constant dense<0.000000e+00> : vector<1x32xf32>
    %361 = tpu.matmul %358, %272, %cst_109 {dimension_numbers = #tpu.dot_dimension_numbers<[1], [0], [0], [1], [0, 0, 1, 1], [], []>} : vector<1x32xf32>, vector<32x32xf32>, vector<1x32xf32> -> vector<1x32xf32>
    %362 = arith.addf %360, %361 : vector<1x32xf32>
    %363 = arith.negf %362 : vector<1x32xf32>
    %364 = math.exp %363 : vector<1x32xf32>
    %cst_110 = arith.constant 1.000000e+00 : f32
    %365 = vector.broadcast %cst_110 : f32 to vector<1x32xf32>
    %366 = arith.addf %365, %364 : vector<1x32xf32>
    %367 = arith.divf %365, %366 : vector<1x32xf32>
    %368 = vector.extract_strided_slice %269 {offsets = [4, 0], sizes = [1, 32], strides = [1, 1]} : vector<8x32xf32> to vector<1x32xf32>
    %cst_111 = arith.constant dense<0.000000e+00> : vector<1x32xf32>
    %369 = tpu.matmul %358, %273, %cst_111 {dimension_numbers = #tpu.dot_dimension_numbers<[1], [0], [0], [1], [0, 0, 1, 1], [], []>} : vector<1x32xf32>, vector<32x32xf32>, vector<1x32xf32> -> vector<1x32xf32>
    %370 = arith.addf %368, %369 : vector<1x32xf32>
    %371 = arith.negf %370 : vector<1x32xf32>
    %372 = math.exp %371 : vector<1x32xf32>
    %cst_112 = arith.constant 1.000000e+00 : f32
    %373 = vector.broadcast %cst_112 : f32 to vector<1x32xf32>
    %374 = arith.addf %373, %372 : vector<1x32xf32>
    %375 = arith.divf %373, %374 : vector<1x32xf32>
    %376 = vector.extract_strided_slice %270 {offsets = [4, 0], sizes = [1, 32], strides = [1, 1]} : vector<8x32xf32> to vector<1x32xf32>
    %cst_113 = arith.constant dense<0.000000e+00> : vector<1x32xf32>
    %377 = tpu.matmul %358, %274, %cst_113 {dimension_numbers = #tpu.dot_dimension_numbers<[1], [0], [0], [1], [0, 0, 1, 1], [], []>} : vector<1x32xf32>, vector<32x32xf32>, vector<1x32xf32> -> vector<1x32xf32>
    %378 = arith.addf %377, %271 : vector<1x32xf32>
    %379 = arith.mulf %367, %378 : vector<1x32xf32>
    %380 = arith.addf %376, %379 : vector<1x32xf32>
    %381 = math.tanh %380 : vector<1x32xf32>
    %cst_114 = arith.constant 1.000000e+00 : f32
    %382 = vector.broadcast %cst_114 : f32 to vector<1x32xf32>
    %383 = arith.subf %382, %375 : vector<1x32xf32>
    %384 = arith.mulf %383, %381 : vector<1x32xf32>
    %385 = arith.mulf %375, %358 : vector<1x32xf32>
    %386 = arith.addf %384, %385 : vector<1x32xf32>
    %c4_115 = arith.constant 4 : index
    %c32_116 = arith.constant 32 : index
    %387 = vector.load %arg17[%c4_115, %c32_116] : memref<8x64xf32, #tpu.memory_space<vmem>>, vector<1x32xf32>
    tpu.vector_store %arg17[%c4_115, %c32_116], %386 {strides = array<i32>} : memref<8x64xf32, #tpu.memory_space<vmem>>, vector<1x32xf32>,
    %388 = vector.extract_strided_slice %265 {offsets = [3, 0], sizes = [1, 32], strides = [1, 1]} : vector<8x32xf32> to vector<1x32xf32>
    %cst_117 = arith.constant dense<0.000000e+00> : vector<1x32xf32>
    %389 = tpu.matmul %386, %272, %cst_117 {dimension_numbers = #tpu.dot_dimension_numbers<[1], [0], [0], [1], [0, 0, 1, 1], [], []>} : vector<1x32xf32>, vector<32x32xf32>, vector<1x32xf32> -> vector<1x32xf32>
    %390 = arith.addf %388, %389 : vector<1x32xf32>
    %391 = arith.negf %390 : vector<1x32xf32>
    %392 = math.exp %391 : vector<1x32xf32>
    %cst_118 = arith.constant 1.000000e+00 : f32
    %393 = vector.broadcast %cst_118 : f32 to vector<1x32xf32>
    %394 = arith.addf %393, %392 : vector<1x32xf32>
    %395 = arith.divf %393, %394 : vector<1x32xf32>
    %396 = vector.extract_strided_slice %269 {offsets = [3, 0], sizes = [1, 32], strides = [1, 1]} : vector<8x32xf32> to vector<1x32xf32>
    %cst_119 = arith.constant dense<0.000000e+00> : vector<1x32xf32>
    %397 = tpu.matmul %386, %273, %cst_119 {dimension_numbers = #tpu.dot_dimension_numbers<[1], [0], [0], [1], [0, 0, 1, 1], [], []>} : vector<1x32xf32>, vector<32x32xf32>, vector<1x32xf32> -> vector<1x32xf32>
    %398 = arith.addf %396, %397 : vector<1x32xf32>
    %399 = arith.negf %398 : vector<1x32xf32>
    %400 = math.exp %399 : vector<1x32xf32>
    %cst_120 = arith.constant 1.000000e+00 : f32
    %401 = vector.broadcast %cst_120 : f32 to vector<1x32xf32>
    %402 = arith.addf %401, %400 : vector<1x32xf32>
    %403 = arith.divf %401, %402 : vector<1x32xf32>
    %404 = vector.extract_strided_slice %270 {offsets = [3, 0], sizes = [1, 32], strides = [1, 1]} : vector<8x32xf32> to vector<1x32xf32>
    %cst_121 = arith.constant dense<0.000000e+00> : vector<1x32xf32>
    %405 = tpu.matmul %386, %274, %cst_121 {dimension_numbers = #tpu.dot_dimension_numbers<[1], [0], [0], [1], [0, 0, 1, 1], [], []>} : vector<1x32xf32>, vector<32x32xf32>, vector<1x32xf32> -> vector<1x32xf32>
    %406 = arith.addf %405, %271 : vector<1x32xf32>
    %407 = arith.mulf %395, %406 : vector<1x32xf32>
    %408 = arith.addf %404, %407 : vector<1x32xf32>
    %409 = math.tanh %408 : vector<1x32xf32>
    %cst_122 = arith.constant 1.000000e+00 : f32
    %410 = vector.broadcast %cst_122 : f32 to vector<1x32xf32>
    %411 = arith.subf %410, %403 : vector<1x32xf32>
    %412 = arith.mulf %411, %409 : vector<1x32xf32>
    %413 = arith.mulf %403, %386 : vector<1x32xf32>
    %414 = arith.addf %412, %413 : vector<1x32xf32>
    %c3_123 = arith.constant 3 : index
    %c32_124 = arith.constant 32 : index
    %415 = vector.load %arg17[%c3_123, %c32_124] : memref<8x64xf32, #tpu.memory_space<vmem>>, vector<1x32xf32>
    tpu.vector_store %arg17[%c3_123, %c32_124], %414 {strides = array<i32>} : memref<8x64xf32, #tpu.memory_space<vmem>>, vector<1x32xf32>,
    %416 = vector.extract_strided_slice %265 {offsets = [2, 0], sizes = [1, 32], strides = [1, 1]} : vector<8x32xf32> to vector<1x32xf32>
    %cst_125 = arith.constant dense<0.000000e+00> : vector<1x32xf32>
    %417 = tpu.matmul %414, %272, %cst_125 {dimension_numbers = #tpu.dot_dimension_numbers<[1], [0], [0], [1], [0, 0, 1, 1], [], []>} : vector<1x32xf32>, vector<32x32xf32>, vector<1x32xf32> -> vector<1x32xf32>
    %418 = arith.addf %416, %417 : vector<1x32xf32>
    %419 = arith.negf %418 : vector<1x32xf32>
    %420 = math.exp %419 : vector<1x32xf32>
    %cst_126 = arith.constant 1.000000e+00 : f32
    %421 = vector.broadcast %cst_126 : f32 to vector<1x32xf32>
    %422 = arith.addf %421, %420 : vector<1x32xf32>
    %423 = arith.divf %421, %422 : vector<1x32xf32>
    %424 = vector.extract_strided_slice %269 {offsets = [2, 0], sizes = [1, 32], strides = [1, 1]} : vector<8x32xf32> to vector<1x32xf32>
    %cst_127 = arith.constant dense<0.000000e+00> : vector<1x32xf32>
    %425 = tpu.matmul %414, %273, %cst_127 {dimension_numbers = #tpu.dot_dimension_numbers<[1], [0], [0], [1], [0, 0, 1, 1], [], []>} : vector<1x32xf32>, vector<32x32xf32>, vector<1x32xf32> -> vector<1x32xf32>
    %426 = arith.addf %424, %425 : vector<1x32xf32>
    %427 = arith.negf %426 : vector<1x32xf32>
    %428 = math.exp %427 : vector<1x32xf32>
    %cst_128 = arith.constant 1.000000e+00 : f32
    %429 = vector.broadcast %cst_128 : f32 to vector<1x32xf32>
    %430 = arith.addf %429, %428 : vector<1x32xf32>
    %431 = arith.divf %429, %430 : vector<1x32xf32>
    %432 = vector.extract_strided_slice %270 {offsets = [2, 0], sizes = [1, 32], strides = [1, 1]} : vector<8x32xf32> to vector<1x32xf32>
    %cst_129 = arith.constant dense<0.000000e+00> : vector<1x32xf32>
    %433 = tpu.matmul %414, %274, %cst_129 {dimension_numbers = #tpu.dot_dimension_numbers<[1], [0], [0], [1], [0, 0, 1, 1], [], []>} : vector<1x32xf32>, vector<32x32xf32>, vector<1x32xf32> -> vector<1x32xf32>
    %434 = arith.addf %433, %271 : vector<1x32xf32>
    %435 = arith.mulf %423, %434 : vector<1x32xf32>
    %436 = arith.addf %432, %435 : vector<1x32xf32>
    %437 = math.tanh %436 : vector<1x32xf32>
    %cst_130 = arith.constant 1.000000e+00 : f32
    %438 = vector.broadcast %cst_130 : f32 to vector<1x32xf32>
    %439 = arith.subf %438, %431 : vector<1x32xf32>
    %440 = arith.mulf %439, %437 : vector<1x32xf32>
    %441 = arith.mulf %431, %414 : vector<1x32xf32>
    %442 = arith.addf %440, %441 : vector<1x32xf32>
    %c2_131 = arith.constant 2 : index
    %c32_132 = arith.constant 32 : index
    %443 = vector.load %arg17[%c2_131, %c32_132] : memref<8x64xf32, #tpu.memory_space<vmem>>, vector<1x32xf32>
    tpu.vector_store %arg17[%c2_131, %c32_132], %442 {strides = array<i32>} : memref<8x64xf32, #tpu.memory_space<vmem>>, vector<1x32xf32>,
    %444 = vector.extract_strided_slice %265 {offsets = [1, 0], sizes = [1, 32], strides = [1, 1]} : vector<8x32xf32> to vector<1x32xf32>
    %cst_133 = arith.constant dense<0.000000e+00> : vector<1x32xf32>
    %445 = tpu.matmul %442, %272, %cst_133 {dimension_numbers = #tpu.dot_dimension_numbers<[1], [0], [0], [1], [0, 0, 1, 1], [], []>} : vector<1x32xf32>, vector<32x32xf32>, vector<1x32xf32> -> vector<1x32xf32>
    %446 = arith.addf %444, %445 : vector<1x32xf32>
    %447 = arith.negf %446 : vector<1x32xf32>
    %448 = math.exp %447 : vector<1x32xf32>
    %cst_134 = arith.constant 1.000000e+00 : f32
    %449 = vector.broadcast %cst_134 : f32 to vector<1x32xf32>
    %450 = arith.addf %449, %448 : vector<1x32xf32>
    %451 = arith.divf %449, %450 : vector<1x32xf32>
    %452 = vector.extract_strided_slice %269 {offsets = [1, 0], sizes = [1, 32], strides = [1, 1]} : vector<8x32xf32> to vector<1x32xf32>
    %cst_135 = arith.constant dense<0.000000e+00> : vector<1x32xf32>
    %453 = tpu.matmul %442, %273, %cst_135 {dimension_numbers = #tpu.dot_dimension_numbers<[1], [0], [0], [1], [0, 0, 1, 1], [], []>} : vector<1x32xf32>, vector<32x32xf32>, vector<1x32xf32> -> vector<1x32xf32>
    %454 = arith.addf %452, %453 : vector<1x32xf32>
    %455 = arith.negf %454 : vector<1x32xf32>
    %456 = math.exp %455 : vector<1x32xf32>
    %cst_136 = arith.constant 1.000000e+00 : f32
    %457 = vector.broadcast %cst_136 : f32 to vector<1x32xf32>
    %458 = arith.addf %457, %456 : vector<1x32xf32>
    %459 = arith.divf %457, %458 : vector<1x32xf32>
    %460 = vector.extract_strided_slice %270 {offsets = [1, 0], sizes = [1, 32], strides = [1, 1]} : vector<8x32xf32> to vector<1x32xf32>
    %cst_137 = arith.constant dense<0.000000e+00> : vector<1x32xf32>
    %461 = tpu.matmul %442, %274, %cst_137 {dimension_numbers = #tpu.dot_dimension_numbers<[1], [0], [0], [1], [0, 0, 1, 1], [], []>} : vector<1x32xf32>, vector<32x32xf32>, vector<1x32xf32> -> vector<1x32xf32>
    %462 = arith.addf %461, %271 : vector<1x32xf32>
    %463 = arith.mulf %451, %462 : vector<1x32xf32>
    %464 = arith.addf %460, %463 : vector<1x32xf32>
    %465 = math.tanh %464 : vector<1x32xf32>
    %cst_138 = arith.constant 1.000000e+00 : f32
    %466 = vector.broadcast %cst_138 : f32 to vector<1x32xf32>
    %467 = arith.subf %466, %459 : vector<1x32xf32>
    %468 = arith.mulf %467, %465 : vector<1x32xf32>
    %469 = arith.mulf %459, %442 : vector<1x32xf32>
    %470 = arith.addf %468, %469 : vector<1x32xf32>
    %c1_139 = arith.constant 1 : index
    %c32_140 = arith.constant 32 : index
    %471 = vector.load %arg17[%c1_139, %c32_140] : memref<8x64xf32, #tpu.memory_space<vmem>>, vector<1x32xf32>
    tpu.vector_store %arg17[%c1_139, %c32_140], %470 {strides = array<i32>} : memref<8x64xf32, #tpu.memory_space<vmem>>, vector<1x32xf32>,
    %472 = vector.extract_strided_slice %265 {offsets = [0, 0], sizes = [1, 32], strides = [1, 1]} : vector<8x32xf32> to vector<1x32xf32>
    %cst_141 = arith.constant dense<0.000000e+00> : vector<1x32xf32>
    %473 = tpu.matmul %470, %272, %cst_141 {dimension_numbers = #tpu.dot_dimension_numbers<[1], [0], [0], [1], [0, 0, 1, 1], [], []>} : vector<1x32xf32>, vector<32x32xf32>, vector<1x32xf32> -> vector<1x32xf32>
    %474 = arith.addf %472, %473 : vector<1x32xf32>
    %475 = arith.negf %474 : vector<1x32xf32>
    %476 = math.exp %475 : vector<1x32xf32>
    %cst_142 = arith.constant 1.000000e+00 : f32
    %477 = vector.broadcast %cst_142 : f32 to vector<1x32xf32>
    %478 = arith.addf %477, %476 : vector<1x32xf32>
    %479 = arith.divf %477, %478 : vector<1x32xf32>
    %480 = vector.extract_strided_slice %269 {offsets = [0, 0], sizes = [1, 32], strides = [1, 1]} : vector<8x32xf32> to vector<1x32xf32>
    %cst_143 = arith.constant dense<0.000000e+00> : vector<1x32xf32>
    %481 = tpu.matmul %470, %273, %cst_143 {dimension_numbers = #tpu.dot_dimension_numbers<[1], [0], [0], [1], [0, 0, 1, 1], [], []>} : vector<1x32xf32>, vector<32x32xf32>, vector<1x32xf32> -> vector<1x32xf32>
    %482 = arith.addf %480, %481 : vector<1x32xf32>
    %483 = arith.negf %482 : vector<1x32xf32>
    %484 = math.exp %483 : vector<1x32xf32>
    %cst_144 = arith.constant 1.000000e+00 : f32
    %485 = vector.broadcast %cst_144 : f32 to vector<1x32xf32>
    %486 = arith.addf %485, %484 : vector<1x32xf32>
    %487 = arith.divf %485, %486 : vector<1x32xf32>
    %488 = vector.extract_strided_slice %270 {offsets = [0, 0], sizes = [1, 32], strides = [1, 1]} : vector<8x32xf32> to vector<1x32xf32>
    %cst_145 = arith.constant dense<0.000000e+00> : vector<1x32xf32>
    %489 = tpu.matmul %470, %274, %cst_145 {dimension_numbers = #tpu.dot_dimension_numbers<[1], [0], [0], [1], [0, 0, 1, 1], [], []>} : vector<1x32xf32>, vector<32x32xf32>, vector<1x32xf32> -> vector<1x32xf32>
    %490 = arith.addf %489, %271 : vector<1x32xf32>
    %491 = arith.mulf %479, %490 : vector<1x32xf32>
    %492 = arith.addf %488, %491 : vector<1x32xf32>
    %493 = math.tanh %492 : vector<1x32xf32>
    %cst_146 = arith.constant 1.000000e+00 : f32
    %494 = vector.broadcast %cst_146 : f32 to vector<1x32xf32>
    %495 = arith.subf %494, %487 : vector<1x32xf32>
    %496 = arith.mulf %495, %493 : vector<1x32xf32>
    %497 = arith.mulf %487, %470 : vector<1x32xf32>
    %498 = arith.addf %496, %497 : vector<1x32xf32>
    %c0_147 = arith.constant 0 : index
    %c32_148 = arith.constant 32 : index
    %499 = vector.load %arg17[%c0_147, %c32_148] : memref<8x64xf32, #tpu.memory_space<vmem>>, vector<1x32xf32>
    tpu.vector_store %arg17[%c0_147, %c32_148], %498 {strides = array<i32>} : memref<8x64xf32, #tpu.memory_space<vmem>>, vector<1x32xf32>,
    %c0_149 = arith.constant 0 : index
    %c0_150 = arith.constant 0 : index
    %500 = vector.load %arg17[%c0_149, %c0_150] : memref<8x64xf32, #tpu.memory_space<vmem>>, vector<8x64xf32>
    %c0_151 = arith.constant 0 : index
    %c0_152 = arith.constant 0 : index
    %501 = vector.load %arg6[%c0_151, %c0_152] : memref<64x10xf32, #tpu.memory_space<vmem>>, vector<64x10xf32>
    %cst_153 = arith.constant dense<0.000000e+00> : vector<8x10xf32>
    %502 = tpu.matmul %500, %501, %cst_153 {dimension_numbers = #tpu.dot_dimension_numbers<[1], [0], [0], [1], [0, 0, 1, 1], [], []>} : vector<8x64xf32>, vector<64x10xf32>, vector<8x10xf32> -> vector<8x10xf32>
    %c0_154 = arith.constant 0 : index
    %c0_155 = arith.constant 0 : index
    %503 = vector.load %arg7[%c0_154, %c0_155] : memref<1x10xf32, #tpu.memory_space<vmem>>, vector<1x10xf32>
    %504 = vector.broadcast %503 : vector<1x10xf32> to vector<8x10xf32>
    %505 = arith.addf %502, %504 : vector<8x10xf32>
    %506 = math.tanh %505 : vector<8x10xf32>
    %cst_156 = arith.constant dense<0xFF800000> : vector<10xf32>
    %507 = vector.multi_reduction <maximumf>, %506, %cst_156 [0] : vector<8x10xf32> to vector<10xf32>
    %508 = vector.shape_cast %507 : vector<10xf32> to vector<1x10xf32>
    %509 = vector.broadcast %508 : vector<1x10xf32> to vector<8x10xf32>
    %510 = arith.subf %506, %509 : vector<8x10xf32>
    %511 = math.exp %510 : vector<8x10xf32>
    %cst_157 = arith.constant dense<0.000000e+00> : vector<10xf32>
    %512 = vector.multi_reduction <add>, %511, %cst_157 [0] : vector<8x10xf32> to vector<10xf32>
    %513 = vector.shape_cast %512 : vector<10xf32> to vector<1x10xf32>
    %514 = vector.broadcast %513 : vector<1x10xf32> to vector<8x10xf32>
    %515 = arith.divf %511, %514 : vector<8x10xf32>
    %c0_158 = arith.constant 0 : index
    %c0_159 = arith.constant 0 : index
    %516 = vector.load %arg8[%c0_158, %c0_159] : memref<64x10xf32, #tpu.memory_space<vmem>>, vector<64x10xf32>
    %cst_160 = arith.constant dense<0.000000e+00> : vector<8x10xf32>
    %517 = tpu.matmul %500, %516, %cst_160 {dimension_numbers = #tpu.dot_dimension_numbers<[1], [0], [0], [1], [0, 0, 1, 1], [], []>} : vector<8x64xf32>, vector<64x10xf32>, vector<8x10xf32> -> vector<8x10xf32>
    %c0_161 = arith.constant 0 : index
    %c0_162 = arith.constant 0 : index
    %518 = vector.load %arg9[%c0_161, %c0_162] : memref<1x10xf32, #tpu.memory_space<vmem>>, vector<1x10xf32>
    %519 = vector.broadcast %518 : vector<1x10xf32> to vector<8x10xf32>
    %520 = arith.addf %517, %519 : vector<8x10xf32>
    %521 = arith.negf %520 : vector<8x10xf32>
    %522 = math.exp %521 : vector<8x10xf32>
    %cst_163 = arith.constant 1.000000e+00 : f32
    %523 = vector.broadcast %cst_163 : f32 to vector<8x10xf32>
    %524 = arith.addf %523, %522 : vector<8x10xf32>
    %525 = arith.divf %523, %524 : vector<8x10xf32>
    %526 = arith.mulf %515, %525 : vector<8x10xf32>
    %cst_164 = arith.constant dense<0.000000e+00> : vector<10xf32>
    %527 = vector.multi_reduction <add>, %526, %cst_164 [0] : vector<8x10xf32> to vector<10xf32>
    %528 = vector.shape_cast %527 : vector<10xf32> to vector<1x10xf32>
    %529 = vector.shape_cast %528 : vector<1x10xf32> to vector<1x1x10xf32>
    %c0_165 = arith.constant 0 : index
    %c0_166 = arith.constant 0 : index
    %c0_167 = arith.constant 0 : index
    %530 = vector.load %arg11[%c0_165, %c0_166, %c0_167] : memref<1x1x10xf32, #tpu.memory_space<vmem>>, vector<1x1x10xf32>
    tpu.vector_store %arg11[%c0_165, %c0_166, %c0_167], %529 {strides = array<i32>} : memref<1x1x10xf32, #tpu.memory_space<vmem>>, vector<1x1x10xf32>,
    %531 = arith.mulf %515, %520 : vector<8x10xf32>
    %cst_168 = arith.constant dense<0.000000e+00> : vector<10xf32>
    %532 = vector.multi_reduction <add>, %531, %cst_168 [0] : vector<8x10xf32> to vector<10xf32>
    %533 = vector.shape_cast %532 : vector<10xf32> to vector<1x10xf32>
    %534 = vector.shape_cast %533 : vector<1x10xf32> to vector<1x1x10xf32>
    %c0_169 = arith.constant 0 : index
    %c0_170 = arith.constant 0 : index
    %c0_171 = arith.constant 0 : index
    %535 = vector.load %arg12[%c0_169, %c0_170, %c0_171] : memref<1x1x10xf32, #tpu.memory_space<vmem>>, vector<1x1x10xf32>
    tpu.vector_store %arg12[%c0_169, %c0_170, %c0_171], %534 {strides = array<i32>} : memref<1x1x10xf32, #tpu.memory_space<vmem>>, vector<1x1x10xf32>,
    %536 = vector.shape_cast %525 : vector<8x10xf32> to vector<1x8x10xf32>
    %c0_172 = arith.constant 0 : index
    %c0_173 = arith.constant 0 : index
    %c0_174 = arith.constant 0 : index
    %537 = vector.load %arg13[%c0_172, %c0_173, %c0_174] : memref<1x8x10xf32, #tpu.memory_space<vmem>>, vector<1x8x10xf32>
    tpu.vector_store %arg13[%c0_172, %c0_173, %c0_174], %536 {strides = array<i32>} : memref<1x8x10xf32, #tpu.memory_space<vmem>>, vector<1x8x10xf32>,
    %538 = vector.shape_cast %520 : vector<8x10xf32> to vector<1x8x10xf32>
    %c0_175 = arith.constant 0 : index
    %c0_176 = arith.constant 0 : index
    %c0_177 = arith.constant 0 : index
    %539 = vector.load %arg14[%c0_175, %c0_176, %c0_177] : memref<1x8x10xf32, #tpu.memory_space<vmem>>, vector<1x8x10xf32>
    tpu.vector_store %arg14[%c0_175, %c0_176, %c0_177], %538 {strides = array<i32>} : memref<1x8x10xf32, #tpu.memory_space<vmem>>, vector<1x8x10xf32>,
    %c0_178 = arith.constant 0 : index
    %c0_179 = arith.constant 0 : index
    %540 = vector.load %arg10[%c0_178, %c0_179] : memref<68x8xf32, #tpu.memory_space<vmem>>, vector<68x8xf32>
    %cst_180 = arith.constant dense<0.000000e+00> : vector<68x10xf32>
    %541 = tpu.matmul %540, %525, %cst_180 {dimension_numbers = #tpu.dot_dimension_numbers<[1], [0], [0], [1], [0, 0, 1, 1], [], []>} : vector<68x8xf32>, vector<8x10xf32>, vector<68x10xf32> -> vector<68x10xf32>
    %542 = vector.shape_cast %541 : vector<68x10xf32> to vector<1x68x10xf32>
    %c0_181 = arith.constant 0 : index
    %c0_182 = arith.constant 0 : index
    %c0_183 = arith.constant 0 : index
    %543 = vector.load %arg15[%c0_181, %c0_182, %c0_183] : memref<1x68x10xf32, #tpu.memory_space<vmem>>, vector<1x68x10xf32>
    tpu.vector_store %arg15[%c0_181, %c0_182, %c0_183], %542 {strides = array<i32>} : memref<1x68x10xf32, #tpu.memory_space<vmem>>, vector<1x68x10xf32>,
    %cst_184 = arith.constant dense<0.000000e+00> : vector<68x10xf32>
    %544 = tpu.matmul %540, %520, %cst_184 {dimension_numbers = #tpu.dot_dimension_numbers<[1], [0], [0], [1], [0, 0, 1, 1], [], []>} : vector<68x8xf32>, vector<8x10xf32>, vector<68x10xf32> -> vector<68x10xf32>
    %545 = vector.shape_cast %544 : vector<68x10xf32> to vector<1x68x10xf32>
    %c0_185 = arith.constant 0 : index
    %c0_186 = arith.constant 0 : index
    %c0_187 = arith.constant 0 : index
    %546 = vector.load %arg16[%c0_185, %c0_186, %c0_187] : memref<1x68x10xf32, #tpu.memory_space<vmem>>, vector<1x68x10xf32>
    tpu.vector_store %arg16[%c0_185, %c0_186, %c0_187], %545 {strides = array<i32>} : memref<1x68x10xf32, #tpu.memory_space<vmem>>, vector<1x68x10xf32>,
    return
  }
  func.func @transform_0(%arg0: i32) -> (i32, i32, i32) {
    %c0_i32 = arith.constant 0 : i32
    %c0_i32_0 = arith.constant 0 : i32
    %c0_i32_1 = arith.constant 0 : i32
    return %arg0, %c0_i32, %c0_i32_0 : i32, i32, i32
  }
  func.func @transform_1(%arg0: i32) -> (i32, i32, i32) {
    %c0_i32 = arith.constant 0 : i32
    %c0_i32_0 = arith.constant 0 : i32
    %c0_i32_1 = arith.constant 0 : i32
    %c0_i32_2 = arith.constant 0 : i32
    return %c0_i32, %c0_i32_0, %c0_i32_1 : i32, i32, i32
  }
  func.func @transform_2(%arg0: i32) -> (i32, i32, i32) {
    %c0_i32 = arith.constant 0 : i32
    %c0_i32_0 = arith.constant 0 : i32
    %c0_i32_1 = arith.constant 0 : i32
    %c0_i32_2 = arith.constant 0 : i32
    return %c0_i32, %c0_i32_0, %c0_i32_1 : i32, i32, i32
  }
  func.func @transform_3(%arg0: i32) -> (i32, i32, i32) {
    %c0_i32 = arith.constant 0 : i32
    %c0_i32_0 = arith.constant 0 : i32
    %c0_i32_1 = arith.constant 0 : i32
    %c0_i32_2 = arith.constant 0 : i32
    return %c0_i32, %c0_i32_0, %c0_i32_1 : i32, i32, i32
  }
  func.func @transform_4(%arg0: i32) -> (i32, i32, i32) {
    %c0_i32 = arith.constant 0 : i32
    %c0_i32_0 = arith.constant 0 : i32
    %c0_i32_1 = arith.constant 0 : i32
    %c0_i32_2 = arith.constant 0 : i32
    return %c0_i32, %c0_i32_0, %c0_i32_1 : i32, i32, i32
  }
  func.func @transform_5(%arg0: i32) -> (i32, i32) {
    %c0_i32 = arith.constant 0 : i32
    %c0_i32_0 = arith.constant 0 : i32
    %c0_i32_1 = arith.constant 0 : i32
    return %c0_i32, %c0_i32_0 : i32, i32
  }
  func.func @transform_6(%arg0: i32) -> (i32, i32) {
    %c0_i32 = arith.constant 0 : i32
    %c0_i32_0 = arith.constant 0 : i32
    %c0_i32_1 = arith.constant 0 : i32
    return %c0_i32, %c0_i32_0 : i32, i32
  }
  func.func @transform_7(%arg0: i32) -> (i32, i32) {
    %c0_i32 = arith.constant 0 : i32
    %c0_i32_0 = arith.constant 0 : i32
    %c0_i32_1 = arith.constant 0 : i32
    return %c0_i32, %c0_i32_0 : i32, i32
  }
  func.func @transform_8(%arg0: i32) -> (i32, i32) {
    %c0_i32 = arith.constant 0 : i32
    %c0_i32_0 = arith.constant 0 : i32
    %c0_i32_1 = arith.constant 0 : i32
    return %c0_i32, %c0_i32_0 : i32, i32
  }
  func.func @transform_9(%arg0: i32) -> (i32, i32) {
    %c0_i32 = arith.constant 0 : i32
    %c0_i32_0 = arith.constant 0 : i32
    %c0_i32_1 = arith.constant 0 : i32
    return %c0_i32, %c0_i32_0 : i32, i32
  }
  func.func @transform_10(%arg0: i32) -> (i32, i32, i32) {
    %c0_i32 = arith.constant 0 : i32
    %c0_i32_0 = arith.constant 0 : i32
    %c0_i32_1 = arith.constant 0 : i32
    return %arg0, %c0_i32, %c0_i32_0 : i32, i32, i32
  }
  func.func @transform_11(%arg0: i32) -> (i32, i32, i32) {
    %c0_i32 = arith.constant 0 : i32
    %c0_i32_0 = arith.constant 0 : i32
    %c0_i32_1 = arith.constant 0 : i32
    return %arg0, %c0_i32, %c0_i32_0 : i32, i32, i32
  }
  func.func @transform_12(%arg0: i32) -> (i32, i32, i32) {
    %c0_i32 = arith.constant 0 : i32
    %c0_i32_0 = arith.constant 0 : i32
    %c0_i32_1 = arith.constant 0 : i32
    return %arg0, %c0_i32, %c0_i32_0 : i32, i32, i32
  }
  func.func @transform_13(%arg0: i32) -> (i32, i32, i32) {
    %c0_i32 = arith.constant 0 : i32
    %c0_i32_0 = arith.constant 0 : i32
    %c0_i32_1 = arith.constant 0 : i32
    return %arg0, %c0_i32, %c0_i32_0 : i32, i32, i32
  }
  func.func @transform_14(%arg0: i32) -> (i32, i32, i32) {
    %c0_i32 = arith.constant 0 : i32
    %c0_i32_0 = arith.constant 0 : i32
    %c0_i32_1 = arith.constant 0 : i32
    return %arg0, %c0_i32, %c0_i32_0 : i32, i32, i32
  }
  func.func @transform_15(%arg0: i32) -> (i32, i32, i32) {
    %c0_i32 = arith.constant 0 : i32
    %c0_i32_0 = arith.constant 0 : i32
    %c0_i32_1 = arith.constant 0 : i32
    return %arg0, %c0_i32, %c0_i32_0 : i32, i32, i32
  }
}

</mosaic_0001>

<bundles_post_ra>
// kernel: tile.14
= control target key start
LH: loop header
LB: loop body
LE: loop exit
PB: predicated region body
PF: predicated region fallthrough
CT: control target
= control target key end

     0   :  { %s141_s10 = smov 40   ;;  %vm66_vm0 = vcmask 64512   ;;  %s142_s11 = smov 48   ;;  %vm72_vm1 = vcmask 523712   ;;  %vm78_vm2 = vcmask 458112   ;;  %vm84_vm3 = vcmask 392512   ;;  %s167_s0 = inlined_call_operand.vmem [shape: bf16[4,8,8], index: 0, kind: input, shape index: {}]   ;;  %s168_s1 = inlined_call_operand.vmem [shape: bf16[4,64], index: 1, kind: output, shape index: {}]  }
   0x1   :  { %v131_v0 = vld [vmem:[%s167_s0 + $0x8] sm:$0xff]   ;;  %v128_v1 = vld [vmem:[%s167_s0] sm:$0xff]   ;;  %s140_s0 = smov 56   ;;  %s143_s12 = smov 32   ;;  %vm90_vm4 = vcmask 326912   ;;  %vm96_vm5 = vcmask 261312  }
   0x2   :  { %v125_v2 = vunpack.c.l.bf16 %v131_v0  ;;  %v126_v3 = vunpack.c.h.bf16 %v131_v0  ;;  %v129_v4 = vunpack.c.l.bf16 %v128_v1  ;;  %v130_v5 = vunpack.c.h.bf16 %v128_v1  ;;  %s144_s13 = smov 24   ;;  %s145_s14 = smov 16  }
   0x3   :  { %s146_s15 = smov 8   ;;  %vm102_vm6 = vcmask 195712   ;;  %vm108_vm7 = vcmask 130112   ;;  %v147_v22 = vmov 0.0  }
   0x4   :  { %20 = vst [vmem:[#allocation1 + $0x18] sm:$0xff] %v126_v3  ;;  %36 = vst [vmem:[#allocation1 + $0x10] sm:$0xff] %v125_v2 }
   0x5   :  { %51 = vst [vmem:[#allocation1 + $0x8] sm:$0xff] %v130_v5  ;;  %64 = vst [vmem:[#allocation1] sm:$0xff] %v129_v4 }
   0xc   :  { %v69_v6 = vld [vmem:[#allocation1 + $0x7] ss:$8 sm:$0xf]   ;;  %v81_v7 = vld [vmem:[#allocation1 + $0x5] ss:$8 sm:$0xf]  }
   0xd   :  { %70 = vrot.lane.b32.xlu0 %v69_v6, %s140_s0  ;;  %82 = vrot.lane.b32.xlu1 %v81_v7, %s141_s10  ;;  %v75_v8 = vld [vmem:[#allocation1 + $0x6] ss:$8 sm:$0xf]   ;;  %v87_v9 = vld [vmem:[#allocation1 + $0x4] ss:$8 sm:$0xf]  }
   0xe   :  { %v65_v10 = vld [vmem:[#allocation1] ss:$8 sm:$0xf]   ;;  %v93_v11 = vld [vmem:[#allocation1 + $0x3] ss:$8 sm:$0xf]  }
   0xf   :  { %67 = vst.msk [vmem:[#allocation0] sm:$0xf] %vm66_vm0, %v65_v10   ;;  %v99_v12 = vld [vmem:[#allocation1 + $0x2] ss:$8 sm:$0xf]  }
  0x10   :  { %v105_v13 = vld [vmem:[#allocation1 + $0x1] ss:$8 sm:$0xf]  }
  0x11   :  { %76 = vrot.lane.b32.xlu0 %v75_v8, %s142_s11  ;;  %88 = vrot.lane.b32.xlu1 %v87_v9, %s143_s12 }
  0x15   :  { %94 = vrot.lane.b32.xlu0 %v93_v11, %s144_s13  ;;  %100 = vrot.lane.b32.xlu1 %v99_v12, %s145_s14 }
  0x19   :  { %106 = vrot.lane.b32.xlu0 %v105_v13, %s146_s15 }
  0x7f   :  { %v71_v14 = vpop.permute.xlu0 %70   ;;  %v83_v15 = vpop.permute.xlu1 %82  }
  0x80   :  { %73 = vst.msk [vmem:[#allocation0] sm:$0xf] %vm72_vm1, %v71_v14  }
  0x83   :  { %v77_v16 = vpop.permute.xlu0 %76   ;;  %v89_v17 = vpop.permute.xlu1 %88  }
  0x84   :  { %79 = vst.msk [vmem:[#allocation0] sm:$0xf] %vm78_vm2, %v77_v16  }
  0x85   :  { %85 = vst.msk [vmem:[#allocation0] sm:$0xf] %vm84_vm3, %v83_v15  }
  0x86   :  { %91 = vst.msk [vmem:[#allocation0] sm:$0xf] %vm90_vm4, %v89_v17  }
  0x87   :  { %v95_v18 = vpop.permute.xlu0 %94   ;;  %v101_v19 = vpop.permute.xlu1 %100  }
  0x88   :  { %97 = vst.msk [vmem:[#allocation0] sm:$0xf] %vm96_vm5, %v95_v18  }
  0x89   :  { %103 = vst.msk [vmem:[#allocation0] sm:$0xf] %vm102_vm6, %v101_v19  }
  0x8b   :  { %v107_v20 = vpop.permute.xlu0 %106  }
  0x8c   :  { %109 = vst.msk [vmem:[#allocation0] sm:$0xf] %vm108_vm7, %v107_v20  }
  0x93   :  { %v114_v21 = vld [vmem:[#allocation0] sm:$0xf] }
  0x94   :  { %v115_v23 = vpack.c.bf16 %v147_v22, %v114_v21 }
  0x96   :  { %117 = vst [vmem:[%s168_s1] sm:$0x3] %v115_v23 }

// kernel: sed_forward.2
= control target key start
LH: loop header
LB: loop body
LE: loop exit
PB: predicated region body
PF: predicated region fallthrough
CT: control target
= control target key end

     0   :  { %s809_s12 = smov 0   ;;  %s979_s0 = inlined_call_operand.vmem [shape: f32[2,4,8,64], index: 0, kind: input, shape index: {}]   ;;  %s980_s1 = inlined_call_operand.vmem [shape: f32[4,64,64], index: 1, kind: input, shape index: {}]   ;;  %s981_s2 = inlined_call_operand.vmem [shape: f32[4,1,64], index: 2, kind: input, shape index: {}]   ;;  %s982_s3 = inlined_call_operand.vmem [shape: f32[2,8,64], index: 3, kind: output, shape index: {}]  }
   0x1 LB: > { %s588_s13 = sadd.s32 4294967295, %s784_s12   ;;  %p592_p0 = scmp.ge.s32.totalorder %s784_s12, 1  ;;  %s784_s12 = sphi %s809_s12, %s13_s12  }
   0x2   : > { %p137_p1 = scmp.lt.s32.totalorder %s784_s12, 3 }
   0x4   : > { %p138_p2 = pnand %p592_p0, %p137_p1 }
   0x5   : > { %v173_v0 = vld [vmem:[%s980_s1] sm:$0xff] (!%p138_p2)  ;;  %v174_v1 = vld [vmem:[%s980_s1 + $0x8] sm:$0xff] (!%p138_p2)  ;;  %v786_v3 = vmov (!%p138_p2), 0.0|0.0   ;;  %v175_v6 = vld [vmem:[%s980_s1 + $0x10] sm:$0xff] (!%p138_p2)  ;;  %p839_p3 = scmp.lt.s32.totalorder (!%p138_p2), %s588_s13, 1  ;;  %vm787_vm0 = vmmov (!%p138_p2), 0  }
   0x6   : > { %141 = sbr.rel (%p138_p2) target bundleno = 262 (0x106), region = 32  ;;  %v181_v2 = vld [vmem:[%s980_s1 + $0x40] sm:$0xff] (!%p138_p2)  ;;  %719 = vmatprep.subr.bf16.mxu0 (!%p138_p2), %v786_v3  ;;  %v720_v4 = vpack.c.bf16 (!%p138_p2), %v174_v1, %v173_v0  ;;  %731 = vmatprep.subr.bf16.mxu1 (!%p138_p2), %v786_v3  ;;  %v182_v5 = vld [vmem:[%s980_s1 + $0x48] sm:$0xff] (!%p138_p2)  ;;  %v176_v7 = vld [vmem:[%s980_s1 + $0x18] sm:$0xff] (!%p138_p2)  ;;  %v788_v11 = vmov (!%p138_p2), 0.0   ;;  %vm215_vm1 = vcmask (!%p138_p2), 523264  }
   0x7   : > { %v732_v8 = vpack.c.bf16 (!%p138_p2), %v182_v5, %v181_v2  ;;  %v183_v9 = vld [vmem:[%s980_s1 + $0x50] sm:$0xff] (!%p138_p2)  ;;  %v184_v10 = vld [vmem:[%s980_s1 + $0x58] sm:$0xff] (!%p138_p2)  ;;  %659 = vmatprep.mubr.msk.f32.mxu0 (!%p138_p2), %vm787_vm0, %v788_v11  ;;  %678 = vmatprep.mubr.msk.f32.mxu1 (!%p138_p2), %vm787_vm0, %v788_v11  ;;  %v723_v12 = vpack.c.bf16 (!%p138_p2), %v176_v7, %v175_v6  ;;  %v177_v14 = vld [vmem:[%s980_s1 + $0x20] sm:$0xff] (!%p138_p2) }
   0x8   : > { %721 = vmatpush3.bf16.msra.mxu0 (!%p138_p2), %v720_v4  ;;  %v735_v13 = vpack.c.bf16 (!%p138_p2), %v184_v10, %v183_v9  ;;  %v178_v15 = vld [vmem:[%s980_s1 + $0x28] sm:$0xff] (!%p138_p2)  ;;  %v185_v16 = vld [vmem:[%s980_s1 + $0x60] sm:$0xff] (!%p138_p2)  ;;  %v179_v20 = vld [vmem:[%s980_s1 + $0x30] sm:$0xff] (!%p138_p2) }
   0x9   : > { %733 = vmatpush3.bf16.msra.mxu1 (!%p138_p2), %v732_v8  ;;  %722 = vmatprep.subr.bf16.mxu0 (!%p138_p2), %v786_v3  ;;  %v186_v17 = vld [vmem:[%s980_s1 + $0x68] sm:$0xff] (!%p138_p2)  ;;  %v726_v18 = vpack.c.bf16 (!%p138_p2), %v178_v15, %v177_v14  ;;  %v180_v21 = vld [vmem:[%s980_s1 + $0x38] sm:$0xff] (!%p138_p2)  ;;  %v187_v22 = vld [vmem:[%s980_s1 + $0x70] sm:$0xff] (!%p138_p2) }
   0xa   : > { %734 = vmatprep.subr.bf16.mxu1 (!%p138_p2), %v786_v3  ;;  %v738_v19 = vpack.c.bf16 (!%p138_p2), %v186_v17, %v185_v16  ;;  %v188_v23 = vld [vmem:[%s980_s1 + $0x78] sm:$0xff] (!%p138_p2)  ;;  %v729_v24 = vpack.c.bf16 (!%p138_p2), %v180_v21, %v179_v20  ;;  %v189_v26 = vld [vmem:[%s980_s1 + $0x80] sm:$0xff] (!%p138_p2)  ;;  %v190_v27 = vld [vmem:[%s980_s1 + $0x88] sm:$0xff] (!%p138_p2) }
   0xb   : > { %v741_v25 = vpack.c.bf16 (!%p138_p2), %v188_v23, %v187_v22  ;;  %v197_v28 = vld [vmem:[%s980_s1 + $0xc0] sm:$0xff] (!%p138_p2)  ;;  %v198_v29 = vld [vmem:[%s980_s1 + $0xc8] sm:$0xff] (!%p138_p2)  ;;  %v744_v31 = vpack.c.bf16 (!%p138_p2), %v190_v27, %v189_v26  ;;  %v191_v34 = vld [vmem:[%s980_s1 + $0x90] sm:$0xff] (!%p138_p2) }
   0xc   : > { %724 = vmatpush3.bf16.msra.mxu0 (!%p138_p2), %v723_v12  ;;  %v756_v33 = vpack.c.bf16 (!%p138_p2), %v198_v29, %v197_v28  ;;  %v192_v35 = vld [vmem:[%s980_s1 + $0x98] sm:$0xff] (!%p138_p2)  ;;  %v199_v36 = vld [vmem:[%s980_s1 + $0xd0] sm:$0xff] (!%p138_p2)  ;;  %v193_v40 = vld [vmem:[%s980_s1 + $0xa0] sm:$0xff] (!%p138_p2) }
   0xd   : > { %s985_s13 = smov (!%p839_p3, %s588_s13), 1  ;;  %736 = vmatpush3.bf16.msra.mxu1 %v735_v13  ;;  %725 = vmatprep.subr.bf16.mxu0 %v786_v3  ;;  %v200_v37 = vld [vmem:[%s980_s1 + $0xd8] sm:$0xff]  ;;  %v747_v38 = vpack.c.bf16 %v192_v35, %v191_v34  ;;  %v194_v41 = vld [vmem:[%s980_s1 + $0xa8] sm:$0xff]  ;;  %v201_v42 = vld [vmem:[%s980_s1 + $0xe0] sm:$0xff] }
   0xe   : > { %737 = vmatprep.subr.bf16.mxu1 %v786_v3  ;;  %s606_s22 = sshll.u32 %s985_s13, 5  ;;  %v759_v39 = vpack.c.bf16 %v200_v37, %v199_v36  ;;  %v202_v43 = vld [vmem:[%s980_s1 + $0xe8] sm:$0xff]  ;;  %v750_v44 = vpack.c.bf16 %v194_v41, %v193_v40  ;;  %v195_v46 = vld [vmem:[%s980_s1 + $0xb0] sm:$0xff]  ;;  %v196_v47 = vld [vmem:[%s980_s1 + $0xb8] sm:$0xff]  ;;  %s595_s16 = sshll.u32 %s985_s13, 3 }
   0xf   : > { %s890_s25 = scalar_lea.vmem %s979_s0, %s606_s22  ;;  %v762_v45 = vpack.c.bf16 %v202_v43, %v201_v42  ;;  %v203_v48 = vld [vmem:[%s980_s1 + $0xf0] sm:$0xff]  ;;  %v204_v49 = vld [vmem:[%s980_s1 + $0xf8] sm:$0xff]  ;;  %v753_v50 = vpack.c.bf16 %v196_v47, %v195_v46  ;;  %v596_v54 = vld [vmem:[%s981_s2] ss:$0 sm:$0xff]  ;;  %s168_s19 = scalar_lea.vmem %s982_s3, %s595_s16 }
  0x10   : > { %727 = vmatpush3.bf16.msra.mxu0 %v726_v18  ;;  %v169_v30 = vld [vmem:[%s890_s25] sm:$0xff]  ;;  %v170_v32 = vld [vmem:[%s890_s25 + $0x8] sm:$0xff]  ;;  %v765_v51 = vpack.c.bf16 %v204_v49, %v203_v48  ;;  %v171_v52 = vld [vmem:[%s890_s25 + $0x10] sm:$0xff] }
  0x11   : > { %739 = vmatpush3.bf16.msra.mxu1 %v738_v19  ;;  %728 = vmatprep.subr.bf16.mxu0 %v786_v3  ;;  %v172_v53 = vld [vmem:[%s890_s25 + $0x18] sm:$0xff]  ;;  %v598_v55 = vld [vmem:[%s981_s2 + $0x1] ss:$0 sm:$0xff]  ;;  %v600_v1 = vld [vmem:[%s981_s2 + $0x2] ss:$0 sm:$0xff] }
  0x12   : > { %740 = vmatprep.subr.bf16.mxu1 %v786_v3  ;;  %v602_v2 = vld [vmem:[%s981_s2 + $0x3] ss:$0 sm:$0xff] }
  0x14   : > { %730 = vmatpush3.bf16.msra.mxu0 %v729_v24 }
  0x15   : > { %742 = vmatpush3.bf16.msra.mxu1 %v741_v25  ;;  %743 = vmatprep.subr.bf16.mxu0 %v786_v3 }
  0x16   : > { %755 = vmatprep.subr.bf16.mxu1 %v786_v3 }
  0x17   : > { %660 = vmatmul.mubr.msk.f32.vlgmr.msra.gmra.mrb[0].mxu0 %vm215_vm1, %v169_v30 }
  0x18   : > { %679 = vmatmul.mubr.msk.f32.vlgmr.msra.gmra.mrb[0].mxu1 %vm215_vm1, %v170_v32  ;;  %745 = vmatpush3.bf16.msra.mxu0 %v744_v31 }
  0x19   : > { %757 = vmatpush3.bf16.msra.mxu1 %v756_v33  ;;  %746 = vmatprep.subr.bf16.mxu0 %v786_v3 }
  0x1a   : > { %758 = vmatprep.subr.bf16.mxu1 %v786_v3  ;;  %697 = vmatprep.mubr.msk.f32.mxu0 %vm787_vm0, %v788_v11 }
  0x1b   : > { %716 = vmatprep.mubr.msk.f32.mxu1 %vm787_vm0, %v788_v11 }
  0x1c   : > { %748 = vmatpush3.bf16.msra.mxu0 %v747_v38 }
  0x1d   : > { %760 = vmatpush3.bf16.msra.mxu1 %v759_v39  ;;  %749 = vmatprep.subr.bf16.mxu0 %v786_v3 }
  0x1e   : > { %761 = vmatprep.subr.bf16.mxu1 %v786_v3 }
  0x20   : > { %751 = vmatpush3.bf16.msra.mxu0 %v750_v44 }
  0x21   : > { %763 = vmatpush3.bf16.msra.mxu1 %v762_v45  ;;  %752 = vmatprep.subr.bf16.mxu0 %v786_v3 }
  0x22   : > { %764 = vmatprep.subr.bf16.mxu1 %v786_v3 }
  0x24   : > { %754 = vmatpush3.bf16.msra.mxu0 %v753_v50 }
  0x25   : > { %766 = vmatpush3.bf16.msra.mxu1 %v765_v51 }
  0x27   : > { %698 = vmatmul.mubr.msk.f32.vlgmr.msra.gmra.mrb[2].mxu0 %vm215_vm1, %v171_v52 }
  0x28   : > { %717 = vmatmul.mubr.msk.f32.vlgmr.msra.gmra.mrb[2].mxu1 %vm215_vm1, %v172_v53 }
  0xea   : > { %v285_v56 = vpop.f32.mrb[0].mxu0 }
  0xeb   : > { %v286_v57 = vadd.f32 %v596_v54, %v285_v56  ;;  %v661_v58 = vpop.f32.mrb[1].mxu0  ;;  %v365_v59 = vpop.f32.mrb[0].mxu1 }
  0xec   : > { %v366_v60 = vadd.f32 %v598_v55, %v365_v59  ;;  %v680_v61 = vpop.f32.mrb[1].mxu1 }
  0xed   : > { %v289_v62 = vmax.f32 %v286_v57, 0.0 }
  0xee   : > { %v369_v63 = vmax.f32 %v366_v60, 0.0 }
  0xf0   : > { %v370_v0 = vadd.f32 %v369_v63, %v289_v62 }
  0xfa   : > { %v446_v3 = vpop.f32.mrb[2].mxu0 }
  0xfb   : > { %v447_v4 = vadd.f32 %v600_v1, %v446_v3  ;;  %v699_v5 = vpop.f32.mrb[3].mxu0  ;;  %v527_v6 = vpop.f32.mrb[2].mxu1 }
  0xfc   : > { %v528_v7 = vadd.f32 %v602_v2, %v527_v6  ;;  %v718_v8 = vpop.f32.mrb[3].mxu1 }
  0xfd   : > { %v450_v9 = vmax.f32 %v447_v4, 0.0 }
  0xfe   : > { %v531_v10 = vmax.f32 %v528_v7, 0.0 }
  0xff   : > { %v451_v11 = vadd.f32 %v450_v9, %v370_v0 }
 0x101   : > { %v532_v12 = vadd.f32 %v531_v10, %v451_v11 }
 0x103   : > { %v533_v13 = vmul.f32 0.25, %v532_v12 }
 0x105   : > { %534 = vst.msk [vmem:[%s168_s19] sm:$0xff] %vm215_vm1, %v533_v13 }
 0x106 PF: > { %s13_s12 = sadd.s32 1, %s784_s12  }
 0x107   : > { %p10_p4 = scmp.ge.s32.totalorder %s13_s12, 4  }
 0x109   :  { %12 = sbr.rel (!%p10_p4) target bundleno = 1 (0x1), region = 62 }

// kernel: sed_forward.3
= control target key start
LH: loop header
LB: loop body
LE: loop exit
PB: predicated region body
PF: predicated region fallthrough
CT: control target
= control target key end

     0   :  { %s8801_s0 = inlined_call_operand.vmem [shape: f32[2,8,64], index: 0, kind: input, shape index: {}]   ;;  %s8802_s1 = inlined_call_operand.vmem [shape: f32[2,64,96], index: 1, kind: input, shape index: {}]   ;;  %s8803_s2 = inlined_call_operand.vmem [shape: f32[2,1,96], index: 2, kind: input, shape index: {}]   ;;  %s8804_s3 = inlined_call_operand.vmem [shape: f32[2,32,96], index: 3, kind: input, shape index: {}]   ;;  %s8805_s4 = inlined_call_operand.vmem [shape: f32[2,1,96], index: 4, kind: input, shape index: {}]   ;;  %s8806_s5 = inlined_call_operand.vmem [shape: f32[64,10], index: 5, kind: input, shape index: {}]   ;;  %s8807_s6 = inlined_call_operand.vmem [shape: f32[1,10], index: 6, kind: input, shape index: {}]   ;;  %s8808_s7 = inlined_call_operand.vmem [shape: f32[64,10], index: 7, kind: input, shape index: {}]   ;;  %s8809_s8 = inlined_call_operand.vmem [shape: f32[1,10], index: 8, kind: input, shape index: {}]   ;;  %s8810_s9 = inlined_call_operand.vmem [shape: f32[68,8], index: 9, kind: input, shape index: {}]   ;;  %s8811_s10 = inlined_call_operand.hbm [shape: f32[2,1,10], index: 10, kind: output, shape index: {0}]   ;;  %s8812_s11 = inlined_call_operand.hbm [shape: f32[2,1,10], index: 11, kind: output, shape index: {1}]   ;;  %s8813_s12 = inlined_call_operand.hbm [shape: f32[2,8,10], index: 12, kind: output, shape index: {2}]   ;;  %s8814_s13 = inlined_call_operand.hbm [shape: f32[2,8,10], index: 13, kind: output, shape index: {3}]   ;;  %s8815_s14 = inlined_call_operand.vmem [shape: f32[2,68,10], index: 14, kind: output, shape index: {4}]   ;;  %s8816_s15 = inlined_call_operand.vmem [shape: f32[2,68,10], index: 15, kind: output, shape index: {5}]  }
   0x1   :  { %8831 = sst [smem:[#allocation18_spill]] %s8801_s0 }
   0x2   :  { %8832 = sst [smem:[#allocation19_spill]] %s8802_s1 }
   0x3   :  { %8833 = sst [smem:[#allocation20_spill]] %s8803_s2 }
   0x4   :  { %8834 = sst [smem:[#allocation21_spill]] %s8804_s3 }
   0x5   :  { %8835 = sst [smem:[#allocation22_spill]] %s8805_s4 }
   0x6   :  { %8836 = sst [smem:[#allocation23_spill]] %s8806_s5 }
   0x7   :  { %8837 = sst [smem:[#allocation24_spill]] %s8807_s6 }
   0x8   :  { %21 = vsyncpa [#allocation4], 0 }
   0x9   :  { %23 = vsyncpa [#allocation4 + $0x1], 0 }
   0xa   :  { %24 = vsyncpa [#allocation6], 0 }
   0xb   :  { %26 = vsyncpa [#allocation6 + $0x1], 0 }
   0xc   :  { %27 = vsyncpa [#allocation9], 0 }
   0xd   :  { %29 = vsyncpa [#allocation9 + $0x1], 0  ;;  %s7680_s18 = smov 0   ;;  %s7682_s19 = smov 0  }
   0xe   :  { %s7684_s20 = smov 0   ;;  %s7686_s21 = smov 0  }
   0xf LB: > { %8838 = sst [smem:[#allocation13_spill]] %s7576_s18  ;;  %s7701_s22 = sadd.s32 4294967295, %s7588_s21   ;;  %s7588_s21 = sphi %s7686_s21, %s8860_s21   ;;  %s7584_s20 = sphi %s7684_s20, %s8862_s20   ;;  %s7580_s19 = sphi %s7682_s19, %s8864_s19   ;;  %s7576_s18 = sphi %s7680_s18, %s8863_s18  }
  0x10   : > { %8839 = sst [smem:[#allocation14_spill]] %s7584_s20  ;;  %s8817_s23 = sadd.s32 4294967294, %s7588_s21  }
  0x11   : > { %s7705_s24 = sadd.s32 1, %s7588_s21   ;;  %s257_s25 = sadd.s32 1, %s7584_s20 }
  0x12   : > { %8840 = sst [smem:[#allocation15_spill]] %s7705_s24  ;;  %s254_s26 = ssub.s32 %s7588_s21, %s7705_s24 }
  0x13   : > { %p267_p0 = scmp.ne.s32.totalorder %s7584_s20, %s7580_s19  ;;  %p255_p1 = scmp.eq.s32.totalorder %s254_s26, 0 }
  0x14   : > { %p268_p2 = scmp.eq.s32.totalorder %s7701_s22, 1  ;;  %p273_p3 = scmp.ne.s32.totalorder %s7580_s19, %s7576_s18 }
  0x15   : > { %p274_p4 = scmp.eq.s32.totalorder %s8817_s23, 1  ;;  %p5737_p7 = scmp.ge.s32.totalorder %s7588_s21, 1 }
  0x16   : > { %s7718_s27 = scalar_select %p255_p1, %s7584_s20, %s257_s25  }
  0x17   : > { %p7720_p5 = por %p268_p2, %p267_p0  ;;  %p7724_p6 = por %p274_p4, %p273_p3 }
  0x18   : > { %8841 = sst [smem:[#allocation16_spill]] %s7718_s27  ;;  %p456_p8 = scmp.lt.s32.totalorder %s7588_s21, 3 }
  0x19   : > { %s8843_s29 = scalar_select %p7724_p6, 1, 0 }
  0x1a   : > { %p457_p9 = pnand %p5737_p7, %p456_p8 }
  0x1b   : > { %8844 = sst [smem:[#allocation17_spill]] %s8843_s29  ;;  %v7590_v6 = vmov (!%p457_p9), 0.0|0.0   ;;  %s8846_s1 = sld [smem:[#allocation19_spill]] (!%p457_p9)  ;;  %vm7593_vm0 = vmmov (!%p457_p9), 0   ;;  %v7594_v17 = vmov (!%p457_p9), 0.0   ;;  %vm561_vm1 = vcmask (!%p457_p9), 523264  }
  0x1c   : > { %460 = sbr.rel (%p457_p9) target bundleno = 9648 (0x25b0), region = 60  ;;  %s8845_s3 = sld [smem:[#allocation21_spill]] (!%p457_p9)  ;;  %6826 = vmatprep.subr.bf16.mxu0 (!%p457_p9), %v7590_v6  ;;  %6838 = vmatprep.subr.bf16.mxu1 (!%p457_p9), %v7590_v6  ;;  %vm924_vm2 = vcmask (!%p457_p9), 253952   ;;  %vm642_vm3 = vcmask (!%p457_p9), 261120   ;;  %vm1447_vm4 = vcmask (!%p457_p9), 256002   ;;  %vm4446_vm5 = vcmask (!%p457_p9), 518402  }
  0x1d   : > { %p526_p10 = scmp.lt.s32.totalorder (!%p457_p9), %s7701_s22, 1  ;;  %s8821_s30 = smov (!%p457_p9), 96   ;;  %6180 = vmatprep.mubr.msk.f32.mxu0 (!%p457_p9), %vm7593_vm0, %v7594_v17  ;;  %6191 = vmatprep.mubr.msk.f32.mxu1 (!%p457_p9), %vm7593_vm0, %v7594_v17  ;;  %vm1973_vm6 = vcmask (!%p457_p9), 258052   ;;  %vm3926_vm7 = vcmask (!%p457_p9), 520452   ;;  %vm1184_vm8 = vcmask (!%p457_p9), 254977   ;;  %vm4706_vm9 = vcmask (!%p457_p9), 517377  }
  0x1e   : > { %s8826_s16 = smov (!%p457_p9), 64   ;;  %s8847_s4 = sld [smem:[#allocation22_spill]] (!%p457_p9)  ;;  %vm1710_vm10 = vcmask (!%p457_p9), 257027   ;;  %vm4186_vm11 = vcmask (!%p457_p9), 519427   ;;  %vm2236_vm12 = vcmask (!%p457_p9), 259077   ;;  %vm3666_vm13 = vcmask (!%p457_p9), 521477  }
  0x1f   : > { %s8848_s0 = sld [smem:[#allocation18_spill]] (!%p457_p9)  ;;  %s8849_s2 = sld [smem:[#allocation20_spill]] (!%p457_p9)  ;;  %vm2762_vm14 = vcmask (!%p457_p9), 261127   ;;  %vm3146_vm15 = vcmask (!%p457_p9), 523527  }
  0x20   : > { %s8823_s23 = smov (!%p457_p9), 32   ;;  %s8850_s26 = smov (!%p457_p9), 96  }
  0x21   : > { %v541_v7 = vld [vmem:[%s8846_s1] sm:$0xff] (!%p457_p9)  ;;  %v542_v8 = vld [vmem:[%s8846_s1 + $0x8] sm:$0xff] (!%p457_p9)  ;;  %v543_v10 = vld [vmem:[%s8846_s1 + $0x10] sm:$0xff] (!%p457_p9)  ;;  %s8851_s27 = smov (!%p457_p9), 64   ;;  %s8853_s5 = sld [smem:[#allocation23_spill]] (!%p457_p9) }
  0x22   : > { %v549_v0 = vld [vmem:[%s8845_s3] sm:$0xff] (!%p457_p9)  ;;  %v550_v1 = vld [vmem:[%s8845_s3 + $0x8] sm:$0xff] (!%p457_p9)  ;;  %v551_v2 = vld [vmem:[%s8845_s3 + $0x10] sm:$0xff] (!%p457_p9)  ;;  %v6827_v9 = vpack.c.bf16 (!%p457_p9), %v542_v8, %v541_v7  ;;  %s8854_s6 = sld [smem:[#allocation24_spill]] (!%p457_p9) }
  0x23   : > { %v7233_v3 = vpack.i.bf16 %v550_v1, %v549_v0  ;;  %v7739_v4 = vpack.c.bf16 %v550_v1, %v549_v0  ;;  %v552_v5 = vld [vmem:[%s8845_s3 + $0x18] sm:$0xff]  ;;  %v545_v15 = vld [vmem:[%s8846_s1 + $0x20] sm:$0xff]  ;;  %v546_v16 = vld [vmem:[%s8846_s1 + $0x28] sm:$0xff]  ;;  %s7776_s20 = scalar_select %p526_p10, %s7701_s22, 1 }
  0x24   : > { %v544_v11 = vld [vmem:[%s8846_s1 + $0x18] sm:$0xff]  ;;  %v7238_v12 = vpack.i.bf16 %v552_v5, %v551_v2  ;;  %v7761_v13 = vpack.c.bf16 %v552_v5, %v551_v2  ;;  %6828 = vmatpush3.bf16.msra.mxu0 %v6827_v9  ;;  %v6833_v18 = vpack.c.bf16 %v546_v16, %v545_v15  ;;  %v5745_v19 = vld [vmem:[%s8847_s4] ss:$0 sm:$0xff]  ;;  %v547_v20 = vld [vmem:[%s8846_s1 + $0x30] sm:$0xff] }
  0x25   : > { %7234 = vrot.lane.b32.xlu1 %v7233_v3, %s8821_s30  ;;  %7224 = vrot.lane.b32.xlu0 %v7233_v3, %s8826_s16  ;;  %v6830_v14 = vpack.c.bf16 %v544_v11, %v543_v10  ;;  %v548_v21 = vld [vmem:[%s8846_s1 + $0x38] sm:$0xff]  ;;  %v5743_v44 = vld [vmem:[%s8849_s2] ss:$0 sm:$0xff] }
  0x26   : > { %6840 = vmatpush3.bf16.msra.mxu1 %v7739_v4  ;;  %6829 = vmatprep.subr.bf16.mxu0 %v7590_v6  ;;  %v6836_v22 = vpack.c.bf16 %v548_v21, %v547_v20 }
  0x27   : > { %6841 = vmatprep.subr.bf16.mxu1 %v7590_v6 }
  0x28   : > { %6831 = vmatpush3.bf16.msra.mxu0 %v6830_v14 }
  0x29   : > { %7239 = vrot.lane.b32.xlu1 %v7238_v12, %s8821_s30  ;;  %7229 = vrot.lane.b32.xlu0 %v7238_v12, %s8826_s16  ;;  %s5740_s30 = sshll.u32 %s7776_s20, 3 }
  0x2a   : > { %6843 = vmatpush3.bf16.msra.mxu1 %v7761_v13  ;;  %6832 = vmatprep.subr.bf16.mxu0 %v7590_v6  ;;  %s7804_s25 = scalar_lea.vmem %s8848_s0, %s5740_s30  ;;  %s7596_s0 = smov [#allocation5]  }
  0x2b   : > { %6844 = vmatprep.subr.bf16.mxu1 %v7590_v6  ;;  %v540_v23 = vld [vmem:[%s7804_s25] sm:$0xff]  ;;  %s7438_s29 = sshll.u32 %s7596_s0, 4  ;;  %s7439_s29 = int_to_ptr.vmem [resolvable:$false] %s7438_s29 }
  0x2c   : > { %6834 = vmatpush3.bf16.msra.mxu0 %v6833_v18 }
  0x2d   : > { %6192 = vmatmul.mubr.f32.vlgmr.msra.gmra.mrb[0].mxu1 %v7594_v17  ;;  %832 = vrot.lane.b32.xlu0 %v5745_v19, %s8826_s16 }
  0x2e   : > { %6202 = vmatprep.mubr.msk.f32.mxu1 %vm7593_vm0, %v7594_v17  ;;  %6835 = vmatprep.subr.bf16.mxu0 %v7590_v6 }
  0x30   : > { %6837 = vmatpush3.bf16.msra.mxu0 %v6836_v22 }
  0x31   : > { %6850 = vmatprep.subr.bf16.mxu0 %v7590_v6 }
  0x33   : > { %6181 = vmatmul.mubr.msk.f32.vlgmr.msra.gmra.mrb[0].mxu0 %vm561_vm1, %v540_v23 }
  0x34   : > { %6213 = vmatprep.mubr.msk.f32.mxu0 %vm7593_vm0, %v7594_v17 }
  0x97   : > { %v7235_v24 = vpop.permute.xlu1 %7234  ;;  %v7225_v25 = vpop.permute.xlu0 %7224 }
  0x98   : > { %v7237_v26 = vunpack.i.h.bf16 %v7235_v24  ;;  %v7236_v27 = vunpack.i.l.bf16 %v7235_v24  ;;  %v7227_v28 = vunpack.i.h.bf16 %v7225_v25  ;;  %v7226_v29 = vunpack.i.l.bf16 %v7225_v25 }
  0x9a   : > { %v7811_v30 = vpack.c.bf16 %v7237_v26, %v7236_v27  ;;  %v7813_v31 = vpack.c.bf16 %v7227_v28, %v7226_v29 }
  0x9b   : > { %v7240_v32 = vpop.permute.xlu1 %7239  ;;  %v7230_v33 = vpop.permute.xlu0 %7229 }
  0x9c   : > { %v7242_v34 = vunpack.i.h.bf16 %v7240_v32  ;;  %v7241_v35 = vunpack.i.l.bf16 %v7240_v32  ;;  %v7232_v36 = vunpack.i.h.bf16 %v7230_v33  ;;  %v7231_v37 = vunpack.i.l.bf16 %v7230_v33  ;;  %6846 = vmatpush3.bf16.msra.mxu1 %v7811_v30  ;;  %6852 = vmatpush3.bf16.msra.mxu0 %v7813_v31 }
  0x9d   : > { %6847 = vmatprep.subr.bf16.mxu1 %v7590_v6  ;;  %6853 = vmatprep.subr.bf16.mxu0 %v7590_v6 }
  0x9e   : > { %v7819_v38 = vpack.c.bf16 %v7242_v34, %v7241_v35  ;;  %v7821_v39 = vpack.c.bf16 %v7232_v36, %v7231_v37 }
  0x9f   : > { %v7850_v51 = vpop.permute.xlu0 %832 }
  0xa0   : > { %6849 = vmatpush3.bf16.msra.mxu1 %v7819_v38  ;;  %6855 = vmatpush3.bf16.msra.mxu0 %v7821_v39 }
  0xa1   : > { %6862 = vmatprep.subr.bf16.mxu0 %v7590_v6  ;;  %6856 = vmatprep.subr.bf16.mxu1 %v7590_v6 }
  0xa3   : > { %6203 = vmatmul.mubr.f32.vlgmr.msra.gmra.mrb[2].mxu1 %v7594_v17  ;;  %6214 = vmatmul.mubr.f32.vlgmr.msra.gmra.mrb[2].mxu0 %v7594_v17 }
  0xa4   : > { %6864 = vmatpush3.bf16.msra.mxu0 %v7811_v30  ;;  %6858 = vmatpush3.bf16.msra.mxu1 %v7739_v4 }
  0xa5   : > { %6865 = vmatprep.subr.bf16.mxu0 %v7590_v6  ;;  %6859 = vmatprep.subr.bf16.mxu1 %v7590_v6 }
  0xa6   : > { %6224 = vmatprep.mubr.msk.f32.mxu1 %vm7593_vm0, %v7594_v17  ;;  %6235 = vmatprep.mubr.msk.f32.mxu0 %vm7593_vm0, %v7594_v17 }
  0xa8   : > { %6867 = vmatpush3.bf16.msra.mxu0 %v7819_v38  ;;  %6861 = vmatpush3.bf16.msra.mxu1 %v7761_v13 }
  0xa9   : > { %6868 = vmatprep.subr.bf16.mxu1 %v7590_v6  ;;  %6874 = vmatprep.subr.bf16.mxu0 %v7590_v6 }
 0x100   : > { %v712_v40 = vpop.f32.mrb[0].mxu1 }
 0x101   : > { %v6193_v41 = vpop.f32.mrb[1].mxu1 }
 0x106   : > { %v631_v42 = vpop.f32.mrb[0].mxu0 }
 0x107   : > { %v6182_v43 = vpop.f32.mrb[1].mxu0  ;;  %v7844_v45 = vadd.f32 %v5743_v44, %v631_v42 }
 0x109   : > { %v7847_v46 = vadd.f32 %v5745_v19, %v7844_v45 }
 0x10b   : > { %v716_v47 = vadd.f32 %v712_v40, %v7847_v46 }
 0x10d   : > { %v5746_v48 = vmul.f32 -1.442695, %v716_v47 }
 0x10f   : > { %7263 = vpow2.f32 %v5746_v48 }
 0x119   : > { %v7264_v49 = vpop.eup %7263 }
 0x11a   : > { %v720_v50 = vadd.f32 1.0, %v7264_v49 }
 0x11c   : > { %7265 = vrcp.f32 %v720_v50 }
 0x126   : > { %v7266_v52 = vpop.eup %7265 }
 0x176   : > { %v805_v53 = vpop.f32.mrb[2].mxu1  ;;  %v901_v54 = vpop.f32.mrb[2].mxu0 }
 0x177   : > { %v902_v55 = vadd.f32 %v901_v54, %v7850_v51  ;;  %810 = vrot.lane.b32.xlu0 %v805_v53, %s8823_s23  ;;  %v6215_v56 = vpop.f32.mrb[3].mxu0  ;;  %v6204_v57 = vpop.f32.mrb[3].mxu1 }
 0x179   : > { %v905_v58 = vmul.f32 %v7266_v52, %v902_v55 }
 0x17b   : > { %907 = vrot.lane.b32.xlu1 %v905_v58, %s8826_s16 }
 0x1e9   : > { %v811_v62 = vpop.permute.xlu0 %810 }
 0x1ea   : > { %v813_v63 = vadd.f32 %v811_v62, %v7847_v46 }
 0x1ec   : > { %v5747_v0 = vmul.f32 -1.442695, %v813_v63 }
 0x1ed   : > { %v908_v59 = vpop.permute.xlu1 %907 }
 0x1ee   : > { %v910_v60 = vadd.f32 %v908_v59, %v7844_v45 }
 0x1f0   : > { %7267 = vtanh.f32 %v910_v60 }
 0x1f1   : > { %7269 = vpow2.f32 %v5747_v0 }
 0x1fa   : > { %v7268_v61 = vpop.eup %7267 }
 0x1fb   : > { %914 = vrot.lane.b32.xlu1 %v7268_v61, %s8850_s26  ;;  %v7270_v1 = vpop.eup %7269 }
 0x1fc   : > { %v817_v2 = vadd.f32 1.0, %v7270_v1 }
 0x1fe   : > { %7271 = vrcp.f32 %v817_v2 }
 0x208   : > { %v7272_v3 = vpop.eup %7271 }
 0x209   : > { %v912_v5 = vsub.f32 1.0, %v7272_v3  ;;  %v918_v8 = vmul.f32 0.0, %v7272_v3 }
 0x26d   : > { %v915_v7 = vpop.permute.xlu1 %914 }
 0x26e   : > { %v917_v9 = vmul.f32 %v915_v7, %v912_v5 }
 0x270   : > { %v919_v10 = vadd.f32 %v918_v8, %v917_v9 }
 0x272   : > { %921 = vrot.lane.b32.xlu0 %v919_v10, %s8850_s26  ;;  %v1176_v43 = vrot.slane %v919_v10, 7 }
 0x2e4   : > { %v922_v11 = vpop.permute.xlu0 %921 }
 0x2e5   : > { %925 = vst.msk [vmem:[#allocation2] sm:$0x1] %vm924_vm2, %v922_v11  ;;  %6225 = vmatmul.mubr.msk.f32.vlgmr.msra.gmra.mrb[4].mxu1 %vm642_vm3, %v922_v11  ;;  %6236 = vmatmul.mubr.msk.f32.vlgmr.msra.gmra.mrb[4].mxu0 %vm642_vm3, %v922_v11  ;;  %vm4958_vm2 = vcmask 516352  }
 0x2e6   : > { %6870 = vmatpush3.bf16.msra.mxu1 %v7813_v31  ;;  %6246 = vmatprep.mubr.msk.f32.mxu1 %vm7593_vm0, %v7594_v17 }
 0x2e7   : > { %6871 = vmatprep.subr.bf16.mxu1 %v7590_v6  ;;  %6876 = vmatpush3.bf16.msra.mxu0 %v7739_v4 }
 0x2e8   : > { %6877 = vmatprep.subr.bf16.mxu0 %v7590_v6  ;;  %6257 = vmatprep.mubr.msk.f32.mxu0 %vm7593_vm0, %v7594_v17 }
 0x2ea   : > { %6873 = vmatpush3.bf16.msra.mxu1 %v7821_v39 }
 0x2eb   : > { %6880 = vmatprep.subr.bf16.mxu1 %v7590_v6  ;;  %6879 = vmatpush3.bf16.msra.mxu0 %v7761_v13 }
 0x2ec   : > { %6886 = vmatprep.subr.bf16.mxu0 %v7590_v6 }
 0x2ed   : > { %6247 = vmatmul.mubr.msk.f32.vlgmr.msra.gmra.mrb[6].mxu1 %vm642_vm3, %v922_v11 }
 0x2ee   : > { %6882 = vmatpush3.bf16.msra.mxu1 %v7811_v30  ;;  %6268 = vmatprep.mubr.msk.f32.mxu1 %vm7593_vm0, %v7594_v17 }
 0x2ef   : > { %6883 = vmatprep.subr.bf16.mxu1 %v7590_v6 }
 0x2f2   : > { %6885 = vmatpush3.bf16.msra.mxu1 %v7819_v38 }
 0x2f3   : > { %6892 = vmatprep.subr.bf16.mxu1 %v7590_v6 }
 0x3b8   : > { %v994_v12 = vpop.f32.mrb[4].mxu1  ;;  %v1074_v14 = vpop.f32.mrb[4].mxu0 }
 0x3b9   : > { %v999_v15 = vrot.slane %v994_v12, 7  ;;  %v1079_v16 = vrot.slane %v1074_v14, 7  ;;  %v6226_v18 = vpop.f32.mrb[5].mxu1  ;;  %v6237_v19 = vpop.f32.mrb[5].mxu0 }
 0x3bb   : > { %v1001_v20 = vadd.f32 %v999_v15, %v7847_v46  ;;  %1080 = vrot.lane.b32.xlu0 %v1079_v16, %s8823_s23 }
 0x3bd   : > { %v5749_v21 = vmul.f32 -1.442695, %v1001_v20 }
 0x3bf   : > { %7273 = vpow2.f32 %v5749_v21 }
 0x3c0   : > { %v1156_v22 = vpop.f32.mrb[6].mxu1 }
 0x3c1   : > { %v6248_v23 = vpop.f32.mrb[7].mxu1  ;;  %v1157_v26 = vadd.f32 %v1156_v22, %v7850_v51 }
 0x3c3   : > { %v1161_v27 = vrot.slane %v1157_v26, 7 }
 0x3c9   : > { %v7274_v24 = vpop.eup %7273 }
 0x3ca   : > { %v1005_v25 = vadd.f32 1.0, %v7274_v24 }
 0x3cc   : > { %7275 = vrcp.f32 %v1005_v25 }
 0x3d6   : > { %v7276_v28 = vpop.eup %7275 }
 0x3d7   : > { %v1163_v29 = vmul.f32 %v7276_v28, %v1161_v27 }
 0x3d9   : > { %1165 = vrot.lane.b32.xlu1 %v1163_v29, %s8826_s16 }
 0x42d   : > { %v1081_v35 = vpop.permute.xlu0 %1080 }
 0x42e   : > { %v1083_v36 = vadd.f32 %v1081_v35, %v7847_v46 }
 0x430   : > { %v5751_v37 = vmul.f32 -1.442695, %v1083_v36 }
 0x44b   : > { %v1166_v32 = vpop.permute.xlu1 %1165 }
 0x44c   : > { %v1168_v33 = vadd.f32 %v1166_v32, %v7844_v45 }
 0x44e   : > { %7277 = vtanh.f32 %v1168_v33 }
 0x44f   : > { %7279 = vpow2.f32 %v5751_v37 }
 0x458   : > { %v7278_v34 = vpop.eup %7277 }
 0x459   : > { %1172 = vrot.lane.b32.xlu1 %v7278_v34, %s8850_s26  ;;  %v7280_v40 = vpop.eup %7279 }
 0x45a   : > { %v1087_v41 = vadd.f32 1.0, %v7280_v40 }
 0x45c   : > { %7281 = vrcp.f32 %v1087_v41 }
 0x466   : > { %v7282_v42 = vpop.eup %7281 }
 0x467   : > { %v1170_v44 = vsub.f32 1.0, %v7282_v42  ;;  %v1178_v49 = vmul.f32 %v7282_v42, %v1176_v43 }
 0x4cb   : > { %v1173_v47 = vpop.permute.xlu1 %1172 }
 0x4cc   : > { %v1175_v48 = vmul.f32 %v1173_v47, %v1170_v44 }
 0x4ce   : > { %v7887_v50 = vadd.f32 %v1178_v49, %v1175_v48 }
 0x4d0   : > { %v1186_v52 = vrot.slane %v7887_v50, 1  ;;  %v1439_v20 = vrot.slane %v7887_v50, 7 }
 0x4d2   : > { %1187 = vrot.lane.b32.xlu0 %v1186_v52, %s8850_s26 }
 0x544   : > { %v1188_v53 = vpop.permute.xlu0 %1187 }
 0x545   : > { %6258 = vmatmul.mubr.msk.f32.vlgmr.msra.gmra.mrb[6].mxu0 %vm642_vm3, %v1188_v53  ;;  %6269 = vmatmul.mubr.msk.f32.vlgmr.msra.gmra.mrb[8].mxu1 %vm642_vm3, %v1188_v53 }
 0x546   : > { %6888 = vmatpush3.bf16.msra.mxu0 %v7813_v31  ;;  %6279 = vmatprep.mubr.msk.f32.mxu0 %vm7593_vm0, %v7594_v17 }
 0x547   : > { %6889 = vmatprep.subr.bf16.mxu0 %v7590_v6  ;;  %6894 = vmatpush3.bf16.msra.mxu1 %v7739_v4 }
 0x548   : > { %6895 = vmatprep.subr.bf16.mxu1 %v7590_v6  ;;  %6290 = vmatprep.mubr.msk.f32.mxu1 %vm7593_vm0, %v7594_v17 }
 0x54a   : > { %6891 = vmatpush3.bf16.msra.mxu0 %v7821_v39 }
 0x54b   : > { %6898 = vmatprep.subr.bf16.mxu0 %v7590_v6  ;;  %6897 = vmatpush3.bf16.msra.mxu1 %v7761_v13 }
 0x54c   : > { %6904 = vmatprep.subr.bf16.mxu1 %v7590_v6 }
 0x54d   : > { %6280 = vmatmul.mubr.msk.f32.vlgmr.msra.gmra.mrb[8].mxu0 %vm642_vm3, %v1188_v53 }
 0x54e   : > { %6900 = vmatpush3.bf16.msra.mxu0 %v7811_v30  ;;  %6301 = vmatprep.mubr.msk.f32.mxu0 %vm7593_vm0, %v7594_v17 }
 0x54f   : > { %6901 = vmatprep.subr.bf16.mxu0 %v7590_v6 }
 0x552   : > { %6903 = vmatpush3.bf16.msra.mxu0 %v7819_v38 }
 0x553   : > { %6910 = vmatprep.subr.bf16.mxu0 %v7590_v6 }
 0x618   : > { %v1257_v54 = vpop.f32.mrb[6].mxu0  ;;  %v1337_v55 = vpop.f32.mrb[8].mxu1 }
 0x619   : > { %v1262_v56 = vrot.slane %v1257_v54, 6  ;;  %v1342_v57 = vrot.slane %v1337_v55, 6  ;;  %v6259_v58 = vpop.f32.mrb[7].mxu0  ;;  %v6270_v59 = vpop.f32.mrb[9].mxu1 }
 0x61b   : > { %v1264_v60 = vadd.f32 %v1262_v56, %v7847_v46  ;;  %1343 = vrot.lane.b32.xlu0 %v1342_v57, %s8823_s23 }
 0x61d   : > { %v5754_v61 = vmul.f32 -1.442695, %v1264_v60 }
 0x61f   : > { %7283 = vpow2.f32 %v5754_v61 }
 0x620   : > { %v1419_v62 = vpop.f32.mrb[8].mxu0 }
 0x621   : > { %v6281_v63 = vpop.f32.mrb[9].mxu0  ;;  %v1420_v2 = vadd.f32 %v1419_v62, %v7850_v51 }
 0x623   : > { %v1424_v3 = vrot.slane %v1420_v2, 6 }
 0x629   : > { %v7284_v0 = vpop.eup %7283 }
 0x62a   : > { %v1268_v1 = vadd.f32 1.0, %v7284_v0 }
 0x62c   : > { %7285 = vrcp.f32 %v1268_v1 }
 0x636   : > { %v7286_v5 = vpop.eup %7285 }
 0x637   : > { %v1426_v7 = vmul.f32 %v7286_v5, %v1424_v3 }
 0x639   : > { %1428 = vrot.lane.b32.xlu1 %v1426_v7, %s8826_s16 }
 0x68d   : > { %v1344_v11 = vpop.permute.xlu0 %1343 }
 0x68e   : > { %v1346_v12 = vadd.f32 %v1344_v11, %v7847_v46 }
 0x690   : > { %v5756_v14 = vmul.f32 -1.442695, %v1346_v12 }
 0x6ab   : > { %v1429_v8 = vpop.permute.xlu1 %1428 }
 0x6ac   : > { %v1431_v9 = vadd.f32 %v1429_v8, %v7844_v45 }
 0x6ae   : > { %7287 = vtanh.f32 %v1431_v9 }
 0x6af   : > { %7289 = vpow2.f32 %v5756_v14 }
 0x6b8   : > { %v7288_v10 = vpop.eup %7287 }
 0x6b9   : > { %1435 = vrot.lane.b32.xlu1 %v7288_v10, %s8850_s26  ;;  %v7290_v15 = vpop.eup %7289 }
 0x6ba   : > { %v1350_v16 = vadd.f32 1.0, %v7290_v15 }
 0x6bc   : > { %7291 = vrcp.f32 %v1350_v16 }
 0x6c6   : > { %v7292_v18 = vpop.eup %7291 }
 0x6c7   : > { %v1433_v19 = vsub.f32 1.0, %v7292_v18  ;;  %v1441_v22 = vmul.f32 %v7292_v18, %v1439_v20 }
 0x72b   : > { %v1436_v21 = vpop.permute.xlu1 %1435 }
 0x72c   : > { %v1438_v23 = vmul.f32 %v1436_v21, %v1433_v19 }
 0x72e   : > { %v7920_v24 = vadd.f32 %v1441_v22, %v1438_v23 }
 0x730   : > { %v1449_v25 = vrot.slane %v7920_v24, 2  ;;  %v1702_v60 = vrot.slane %v7920_v24, 7 }
 0x732   : > { %1450 = vrot.lane.b32.xlu0 %v1449_v25, %s8850_s26 }
 0x7a4   : > { %v1451_v26 = vpop.permute.xlu0 %1450 }
 0x7a5   : > { %6291 = vmatmul.mubr.msk.f32.vlgmr.msra.gmra.mrb[10].mxu1 %vm642_vm3, %v1451_v26  ;;  %6302 = vmatmul.mubr.msk.f32.vlgmr.msra.gmra.mrb[10].mxu0 %vm642_vm3, %v1451_v26 }
 0x7a6   : > { %6906 = vmatpush3.bf16.msra.mxu1 %v7813_v31  ;;  %6312 = vmatprep.mubr.msk.f32.mxu1 %vm7593_vm0, %v7594_v17 }
 0x7a7   : > { %6907 = vmatprep.subr.bf16.mxu1 %v7590_v6  ;;  %6912 = vmatpush3.bf16.msra.mxu0 %v7739_v4 }
 0x7a8   : > { %6913 = vmatprep.subr.bf16.mxu0 %v7590_v6  ;;  %6323 = vmatprep.mubr.msk.f32.mxu0 %vm7593_vm0, %v7594_v17 }
 0x7aa   : > { %6909 = vmatpush3.bf16.msra.mxu1 %v7821_v39 }
 0x7ab   : > { %6916 = vmatprep.subr.bf16.mxu1 %v7590_v6  ;;  %6915 = vmatpush3.bf16.msra.mxu0 %v7761_v13 }
 0x7ac   : > { %6922 = vmatprep.subr.bf16.mxu0 %v7590_v6 }
 0x7ad   : > { %6313 = vmatmul.mubr.msk.f32.vlgmr.msra.gmra.mrb[12].mxu1 %vm642_vm3, %v1451_v26 }
 0x7ae   : > { %6918 = vmatpush3.bf16.msra.mxu1 %v7811_v30  ;;  %6334 = vmatprep.mubr.msk.f32.mxu1 %vm7593_vm0, %v7594_v17 }
 0x7af   : > { %6919 = vmatprep.subr.bf16.mxu1 %v7590_v6 }
 0x7b2   : > { %6921 = vmatpush3.bf16.msra.mxu1 %v7819_v38 }
 0x7b3   : > { %6928 = vmatprep.subr.bf16.mxu1 %v7590_v6 }
 0x878   : > { %v1520_v27 = vpop.f32.mrb[10].mxu1  ;;  %v1600_v28 = vpop.f32.mrb[10].mxu0 }
 0x879   : > { %v1525_v29 = vrot.slane %v1520_v27, 5  ;;  %v1605_v32 = vrot.slane %v1600_v28, 5  ;;  %v6292_v33 = vpop.f32.mrb[11].mxu1  ;;  %v6303_v34 = vpop.f32.mrb[11].mxu0 }
 0x87b   : > { %v1527_v35 = vadd.f32 %v1525_v29, %v7847_v46  ;;  %1606 = vrot.lane.b32.xlu0 %v1605_v32, %s8823_s23 }
 0x87d   : > { %v5759_v36 = vmul.f32 -1.442695, %v1527_v35 }
 0x87f   : > { %7293 = vpow2.f32 %v5759_v36 }
 0x880   : > { %v1682_v37 = vpop.f32.mrb[12].mxu1 }
 0x881   : > { %v6314_v40 = vpop.f32.mrb[13].mxu1  ;;  %v1683_v43 = vadd.f32 %v1682_v37, %v7850_v51 }
 0x883   : > { %v1687_v44 = vrot.slane %v1683_v43, 5 }
 0x889   : > { %v7294_v41 = vpop.eup %7293 }
 0x88a   : > { %v1531_v42 = vadd.f32 1.0, %v7294_v41 }
 0x88c   : > { %7295 = vrcp.f32 %v1531_v42 }
 0x896   : > { %v7296_v47 = vpop.eup %7295 }
 0x897   : > { %v1689_v48 = vmul.f32 %v7296_v47, %v1687_v44 }
 0x899   : > { %1691 = vrot.lane.b32.xlu1 %v1689_v48, %s8826_s16 }
 0x8ed   : > { %v1607_v54 = vpop.permute.xlu0 %1606 }
 0x8ee   : > { %v1609_v55 = vadd.f32 %v1607_v54, %v7847_v46 }
 0x8f0   : > { %v5761_v56 = vmul.f32 -1.442695, %v1609_v55 }
 0x90b   : > { %v1692_v49 = vpop.permute.xlu1 %1691 }
 0x90c   : > { %v1694_v52 = vadd.f32 %v1692_v49, %v7844_v45 }
 0x90e   : > { %7297 = vtanh.f32 %v1694_v52 }
 0x90f   : > { %7299 = vpow2.f32 %v5761_v56 }
 0x918   : > { %v7298_v53 = vpop.eup %7297 }
 0x919   : > { %1698 = vrot.lane.b32.xlu1 %v7298_v53, %s8850_s26  ;;  %v7300_v57 = vpop.eup %7299 }
 0x91a   : > { %v1613_v58 = vadd.f32 1.0, %v7300_v57 }
 0x91c   : > { %7301 = vrcp.f32 %v1613_v58 }
 0x926   : > { %v7302_v59 = vpop.eup %7301 }
 0x927   : > { %v1696_v61 = vsub.f32 1.0, %v7302_v59  ;;  %v1704_v0 = vmul.f32 %v7302_v59, %v1702_v60 }
 0x98b   : > { %v1699_v62 = vpop.permute.xlu1 %1698 }
 0x98c   : > { %v1701_v63 = vmul.f32 %v1699_v62, %v1696_v61 }
 0x98e   : > { %v7953_v1 = vadd.f32 %v1704_v0, %v1701_v63 }
 0x990   : > { %v1712_v2 = vrot.slane %v7953_v1, 3  ;;  %v1965_v37 = vrot.slane %v7953_v1, 7 }
 0x992   : > { %1713 = vrot.lane.b32.xlu0 %v1712_v2, %s8850_s26 }
 0xa04   : > { %v1714_v3 = vpop.permute.xlu0 %1713 }
 0xa05   : > { %6324 = vmatmul.mubr.msk.f32.vlgmr.msra.gmra.mrb[12].mxu0 %vm642_vm3, %v1714_v3  ;;  %6335 = vmatmul.mubr.msk.f32.vlgmr.msra.gmra.mrb[14].mxu1 %vm642_vm3, %v1714_v3 }
 0xa06   : > { %6924 = vmatpush3.bf16.msra.mxu0 %v7813_v31  ;;  %6345 = vmatprep.mubr.msk.f32.mxu0 %vm7593_vm0, %v7594_v17 }
 0xa07   : > { %6925 = vmatprep.subr.bf16.mxu0 %v7590_v6  ;;  %6930 = vmatpush3.bf16.msra.mxu1 %v7739_v4 }
 0xa08   : > { %6931 = vmatprep.subr.bf16.mxu1 %v7590_v6  ;;  %6356 = vmatprep.mubr.msk.f32.mxu1 %vm7593_vm0, %v7594_v17 }
 0xa0a   : > { %6927 = vmatpush3.bf16.msra.mxu0 %v7821_v39 }
 0xa0b   : > { %6934 = vmatprep.subr.bf16.mxu0 %v7590_v6  ;;  %6933 = vmatpush3.bf16.msra.mxu1 %v7761_v13 }
 0xa0c   : > { %6940 = vmatprep.subr.bf16.mxu1 %v7590_v6 }
 0xa0d   : > { %6346 = vmatmul.mubr.msk.f32.vlgmr.msra.gmra.mrb[14].mxu0 %vm642_vm3, %v1714_v3 }
 0xa0e   : > { %6936 = vmatpush3.bf16.msra.mxu0 %v7811_v30  ;;  %6367 = vmatprep.mubr.msk.f32.mxu0 %vm7593_vm0, %v7594_v17 }
 0xa0f   : > { %6937 = vmatprep.subr.bf16.mxu0 %v7590_v6 }
 0xa12   : > { %6939 = vmatpush3.bf16.msra.mxu0 %v7819_v38 }
 0xa13   : > { %6946 = vmatprep.subr.bf16.mxu0 %v7590_v6 }
 0xad8   : > { %v1783_v5 = vpop.f32.mrb[12].mxu0  ;;  %v1863_v7 = vpop.f32.mrb[14].mxu1 }
 0xad9   : > { %v1788_v8 = vrot.slane %v1783_v5, 4  ;;  %v1868_v9 = vrot.slane %v1863_v7, 4  ;;  %v6325_v10 = vpop.f32.mrb[13].mxu0  ;;  %v6336_v11 = vpop.f32.mrb[15].mxu1 }
 0xadb   : > { %v1790_v12 = vadd.f32 %v1788_v8, %v7847_v46  ;;  %1869 = vrot.lane.b32.xlu0 %v1868_v9, %s8823_s23 }
 0xadd   : > { %v5764_v14 = vmul.f32 -1.442695, %v1790_v12 }
 0xadf   : > { %7303 = vpow2.f32 %v5764_v14 }
 0xae0   : > { %v1945_v15 = vpop.f32.mrb[14].mxu0 }
 0xae1   : > { %v6347_v16 = vpop.f32.mrb[15].mxu0  ;;  %v1946_v20 = vadd.f32 %v1945_v15, %v7850_v51 }
 0xae3   : > { %v1950_v21 = vrot.slane %v1946_v20, 4 }
 0xae9   : > { %v7304_v18 = vpop.eup %7303 }
 0xaea   : > { %v1794_v19 = vadd.f32 1.0, %v7304_v18 }
 0xaec   : > { %7305 = vrcp.f32 %v1794_v19 }
 0xaf6   : > { %v7306_v22 = vpop.eup %7305 }
 0xaf7   : > { %v1952_v23 = vmul.f32 %v7306_v22, %v1950_v21 }
 0xaf9   : > { %1954 = vrot.lane.b32.xlu1 %v1952_v23, %s8826_s16 }
 0xb4d   : > { %v1870_v28 = vpop.permute.xlu0 %1869 }
 0xb4e   : > { %v1872_v29 = vadd.f32 %v1870_v28, %v7847_v46 }
 0xb50   : > { %v5766_v32 = vmul.f32 -1.442695, %v1872_v29 }
 0xb6b   : > { %v1955_v25 = vpop.permute.xlu1 %1954 }
 0xb6c   : > { %v1957_v26 = vadd.f32 %v1955_v25, %v7844_v45 }
 0xb6e   : > { %7307 = vtanh.f32 %v1957_v26 }
 0xb6f   : > { %7309 = vpow2.f32 %v5766_v32 }
 0xb78   : > { %v7308_v27 = vpop.eup %7307 }
 0xb79   : > { %1961 = vrot.lane.b32.xlu1 %v7308_v27, %s8850_s26  ;;  %v7310_v33 = vpop.eup %7309 }
 0xb7a   : > { %v1876_v34 = vadd.f32 1.0, %v7310_v33 }
 0xb7c   : > { %7311 = vrcp.f32 %v1876_v34 }
 0xb86   : > { %v7312_v35 = vpop.eup %7311 }
 0xb87   : > { %v1959_v36 = vsub.f32 1.0, %v7312_v35  ;;  %v1967_v41 = vmul.f32 %v7312_v35, %v1965_v37 }
 0xbeb   : > { %v1962_v40 = vpop.permute.xlu1 %1961 }
 0xbec   : > { %v1964_v42 = vmul.f32 %v1962_v40, %v1959_v36 }
 0xbee   : > { %v7986_v43 = vadd.f32 %v1967_v41, %v1964_v42 }
 0xbf0   : > { %v1975_v44 = vrot.slane %v7986_v43, 4  ;;  %v2228_v15 = vrot.slane %v7986_v43, 7 }
 0xbf2   : > { %1976 = vrot.lane.b32.xlu0 %v1975_v44, %s8850_s26  ;;  %v5791_v44 = vld [vmem:[%s8845_s3 + $0x20] sm:$0xff] }
 0xc64   : > { %v1977_v47 = vpop.permute.xlu0 %1976 }
 0xc65   : > { %6357 = vmatmul.mubr.msk.f32.vlgmr.msra.gmra.mrb[16].mxu1 %vm642_vm3, %v1977_v47  ;;  %6368 = vmatmul.mubr.msk.f32.vlgmr.msra.gmra.mrb[16].mxu0 %vm642_vm3, %v1977_v47 }
 0xc66   : > { %6942 = vmatpush3.bf16.msra.mxu1 %v7813_v31  ;;  %6378 = vmatprep.mubr.msk.f32.mxu1 %vm7593_vm0, %v7594_v17 }
 0xc67   : > { %6943 = vmatprep.subr.bf16.mxu1 %v7590_v6  ;;  %6948 = vmatpush3.bf16.msra.mxu0 %v7739_v4 }
 0xc68   : > { %6949 = vmatprep.subr.bf16.mxu0 %v7590_v6  ;;  %6389 = vmatprep.mubr.msk.f32.mxu0 %vm7593_vm0, %v7594_v17 }
 0xc6a   : > { %6945 = vmatpush3.bf16.msra.mxu1 %v7821_v39 }
 0xc6b   : > { %6952 = vmatprep.subr.bf16.mxu1 %v7590_v6  ;;  %6951 = vmatpush3.bf16.msra.mxu0 %v7761_v13 }
 0xc6c   : > { %6958 = vmatprep.subr.bf16.mxu0 %v7590_v6 }
 0xc6d   : > { %6379 = vmatmul.mubr.msk.f32.vlgmr.msra.gmra.mrb[18].mxu1 %vm642_vm3, %v1977_v47  ;;  %v5792_v47 = vld [vmem:[%s8845_s3 + $0x28] sm:$0xff] }
 0xc6e   : > { %6954 = vmatpush3.bf16.msra.mxu1 %v7811_v30  ;;  %6400 = vmatprep.mubr.msk.f32.mxu1 %vm7593_vm0, %v7594_v17 }
 0xc6f   : > { %6955 = vmatprep.subr.bf16.mxu1 %v7590_v6 }
 0xc72   : > { %6957 = vmatpush3.bf16.msra.mxu1 %v7819_v38 }
 0xc73   : > { %6964 = vmatprep.subr.bf16.mxu1 %v7590_v6 }
 0xd38   : > { %v2046_v48 = vpop.f32.mrb[16].mxu1  ;;  %v2126_v49 = vpop.f32.mrb[16].mxu0 }
 0xd39   : > { %v2051_v52 = vrot.slane %v2046_v48, 3  ;;  %v2131_v53 = vrot.slane %v2126_v49, 3  ;;  %v6358_v54 = vpop.f32.mrb[17].mxu1  ;;  %v6369_v55 = vpop.f32.mrb[17].mxu0  ;;  %v8055_v48 = vpack.c.bf16 %v5792_v47, %v5791_v44  ;;  %v5793_v49 = vld [vmem:[%s8845_s3 + $0x30] sm:$0xff] }
 0xd3a   : > { %v7243_v55 = vpack.i.bf16 %v5792_v47, %v5791_v44 }
 0xd3b   : > { %v2053_v56 = vadd.f32 %v2051_v52, %v7847_v46  ;;  %2132 = vrot.lane.b32.xlu0 %v2131_v53, %s8823_s23  ;;  %v5794_v52 = vld [vmem:[%s8845_s3 + $0x38] sm:$0xff]  ;;  %s8852_s3 = smov 32  }
 0xd3c   : > { %v8063_v53 = vpack.c.bf16 %v5794_v52, %v5793_v49 }
 0xd3d   : > { %v5769_v57 = vmul.f32 -1.442695, %v2053_v56 }
 0xd3f   : > { %7313 = vpow2.f32 %v5769_v57 }
 0xd40   : > { %v2208_v58 = vpop.f32.mrb[18].mxu1 }
 0xd41   : > { %v6380_v59 = vpop.f32.mrb[19].mxu1  ;;  %v2209_v62 = vadd.f32 %v2208_v58, %v7850_v51 }
 0xd43   : > { %v2213_v63 = vrot.slane %v2209_v62, 3 }
 0xd49   : > { %v7314_v60 = vpop.eup %7313 }
 0xd4a   : > { %v2057_v61 = vadd.f32 1.0, %v7314_v60 }
 0xd4c   : > { %7315 = vrcp.f32 %v2057_v61 }
 0xd56   : > { %v7316_v0 = vpop.eup %7315 }
 0xd57   : > { %v2215_v2 = vmul.f32 %v7316_v0, %v2213_v63 }
 0xd59   : > { %2217 = vrot.lane.b32.xlu1 %v2215_v2, %s8826_s16 }
 0xdad   : > { %v2133_v8 = vpop.permute.xlu0 %2132 }
 0xdae   : > { %v2135_v9 = vadd.f32 %v2133_v8, %v7847_v46  ;;  %v7248_v8 = vpack.i.bf16 %v5794_v52, %v5793_v49 }
 0xdb0   : > { %v5771_v10 = vmul.f32 -1.442695, %v2135_v9  ;;  %v8079_v9 = vld [vmem:[%s8847_s4 + $0x1] ss:$0 sm:$0xff] }
 0xdcb   : > { %v2218_v3 = vpop.permute.xlu1 %2217 }
 0xdcc   : > { %v2220_v5 = vadd.f32 %v2218_v3, %v7844_v45 }
 0xdce   : > { %7317 = vtanh.f32 %v2220_v5 }
 0xdcf   : > { %7319 = vpow2.f32 %v5771_v10  ;;  %v5783_v10 = vld [vmem:[%s8846_s1 + $0x40] sm:$0xff] }
 0xdd8   : > { %v7318_v7 = vpop.eup %7317 }
 0xdd9   : > { %2224 = vrot.lane.b32.xlu1 %v7318_v7, %s8850_s26  ;;  %v7320_v11 = vpop.eup %7319 }
 0xdda   : > { %v2139_v12 = vadd.f32 1.0, %v7320_v11  ;;  %v5784_v11 = vld [vmem:[%s8846_s1 + $0x48] sm:$0xff] }
 0xddc   : > { %7321 = vrcp.f32 %v2139_v12  ;;  %v6983_v12 = vpack.c.bf16 %v5784_v11, %v5783_v10 }
 0xde6   : > { %v7322_v14 = vpop.eup %7321 }
 0xde7   : > { %v2222_v16 = vsub.f32 1.0, %v7322_v14  ;;  %v2230_v20 = vmul.f32 %v7322_v14, %v2228_v15  ;;  %v5785_v14 = vld [vmem:[%s8846_s1 + $0x50] sm:$0xff]  ;;  %v5786_v15 = vld [vmem:[%s8846_s1 + $0x58] sm:$0xff] }
 0xe4b   : > { %v2225_v18 = vpop.permute.xlu1 %2224 }
 0xe4c   : > { %v2227_v19 = vmul.f32 %v2225_v18, %v2222_v16 }
 0xe4e   : > { %v8019_v21 = vadd.f32 %v2230_v20, %v2227_v19  ;;  %v6986_v19 = vpack.c.bf16 %v5786_v15, %v5785_v14  ;;  %v5787_v20 = vld [vmem:[%s8846_s1 + $0x60] sm:$0xff] }
 0xe50   : > { %v2238_v22 = vrot.slane %v8019_v21, 5  ;;  %v2491_v63 = vrot.slane %v8019_v21, 7 }
 0xe52   : > { %2239 = vrot.lane.b32.xlu0 %v2238_v22, %s8850_s26  ;;  %v5788_v22 = vld [vmem:[%s8846_s1 + $0x68] sm:$0xff] }
 0xec4   : > { %v2240_v23 = vpop.permute.xlu0 %2239 }
 0xec5   : > { %6390 = vmatmul.mubr.msk.f32.vlgmr.msra.gmra.mrb[18].mxu0 %vm642_vm3, %v2240_v23  ;;  %6401 = vmatmul.mubr.msk.f32.vlgmr.msra.gmra.mrb[20].mxu1 %vm642_vm3, %v2240_v23 }
 0xec6   : > { %6960 = vmatpush3.bf16.msra.mxu0 %v7813_v31  ;;  %6411 = vmatprep.mubr.msk.f32.mxu0 %vm7593_vm0, %v7594_v17 }
 0xec7   : > { %6961 = vmatprep.subr.bf16.mxu0 %v7590_v6  ;;  %6966 = vmatpush3.bf16.msra.mxu1 %v7739_v4 }
 0xec8   : > { %6967 = vmatprep.subr.bf16.mxu1 %v7590_v6  ;;  %6422 = vmatprep.mubr.msk.f32.mxu1 %vm7593_vm0, %v7594_v17 }
 0xeca   : > { %6963 = vmatpush3.bf16.msra.mxu0 %v7821_v39 }
 0xecb   : > { %6970 = vmatprep.subr.bf16.mxu0 %v7590_v6  ;;  %6969 = vmatpush3.bf16.msra.mxu1 %v7761_v13 }
 0xecc   : > { %6976 = vmatprep.subr.bf16.mxu1 %v7590_v6 }
 0xecd   : > { %6412 = vmatmul.mubr.msk.f32.vlgmr.msra.gmra.mrb[20].mxu0 %vm642_vm3, %v2240_v23  ;;  %v6989_v23 = vpack.c.bf16 %v5788_v22, %v5787_v20 }
 0xece   : > { %6972 = vmatpush3.bf16.msra.mxu0 %v7811_v30  ;;  %6433 = vmatprep.mubr.msk.f32.mxu0 %vm7593_vm0, %v7594_v17 }
 0xecf   : > { %6973 = vmatprep.subr.bf16.mxu0 %v7590_v6 }
 0xed2   : > { %6975 = vmatpush3.bf16.msra.mxu0 %v7819_v38 }
 0xed3   : > { %6982 = vmatprep.subr.bf16.mxu0 %v7590_v6 }
 0xf98   : > { %v2309_v4 = vpop.f32.mrb[18].mxu0  ;;  %v2389_v25 = vpop.f32.mrb[20].mxu1 }
 0xf99   : > { %v2314_v26 = vrot.slane %v2309_v4, 2  ;;  %v2394_v27 = vrot.slane %v2389_v25, 2  ;;  %v6391_v13 = vpop.f32.mrb[19].mxu0  ;;  %v6402_v28 = vpop.f32.mrb[21].mxu1  ;;  %v5789_v25 = vld [vmem:[%s8846_s1 + $0x70] sm:$0xff] }
 0xf9b   : > { %v2316_v29 = vadd.f32 %v2314_v26, %v7847_v46  ;;  %2395 = vrot.lane.b32.xlu0 %v2394_v27, %s8823_s23  ;;  %v5790_v26 = vld [vmem:[%s8846_s1 + $0x78] sm:$0xff] }
 0xf9c   : > { %v6992_v13 = vpack.c.bf16 %v5790_v26, %v5789_v25 }
 0xf9d   : > { %v5774_v30 = vmul.f32 -1.442695, %v2316_v29 }
 0xf9f   : > { %7323 = vpow2.f32 %v5774_v30 }
 0xfa0   : > { %v2471_v32 = vpop.f32.mrb[20].mxu0 }
 0xfa1   : > { %v6413_v33 = vpop.f32.mrb[21].mxu0  ;;  %v2472_v38 = vadd.f32 %v2471_v32, %v7850_v51 }
 0xfa3   : > { %v2476_v36 = vrot.slane %v2472_v38, 2 }
 0xfa9   : > { %v7324_v34 = vpop.eup %7323 }
 0xfaa   : > { %v2320_v35 = vadd.f32 1.0, %v7324_v34 }
 0xfac   : > { %7325 = vrcp.f32 %v2320_v35 }
 0xfb6   : > { %v7326_v37 = vpop.eup %7325 }
 0xfb7   : > { %v2478_v40 = vmul.f32 %v7326_v37, %v2476_v36  ;;  %v7433_v37 = vld [vmem:[%s7804_s25] sm:$0xff]  ;;  %s5862_s25 = sshll.u32 %s7701_s22, 4 }
 0xfb8   : > { %s8623_s18 = scalar_lea.hbm %s8812_s11, %s5862_s25 }
 0xfb9   : > { %2480 = vrot.lane.b32.xlu1 %v2478_v40, %s8826_s16 }
0x100d   : > { %v2396_v56 = vpop.permute.xlu0 %2395 }
0x100e   : > { %v2398_v57 = vadd.f32 %v2396_v56, %v7847_v46 }
0x1010   : > { %v5776_v58 = vmul.f32 -1.442695, %v2398_v57 }
0x102b   : > { %v2481_v41 = vpop.permute.xlu1 %2480 }
0x102c   : > { %v2483_v42 = vadd.f32 %v2481_v41, %v7844_v45 }
0x102e   : > { %7327 = vtanh.f32 %v2483_v42 }
0x102f   : > { %7329 = vpow2.f32 %v5776_v58  ;;  %v5797_v58 = vld [vmem:[%s8849_s2 + $0x1] ss:$0 sm:$0xff]  ;;  %s8630_s2 = scalar_lea.hbm %s8811_s10, %s5862_s25 }
0x1038   : > { %v7328_v54 = vpop.eup %7327 }
0x1039   : > { %2487 = vrot.lane.b32.xlu1 %v7328_v54, %s8850_s26  ;;  %v7330_v59 = vpop.eup %7329 }
0x103a   : > { %v2402_v60 = vadd.f32 1.0, %v7330_v59 }
0x103c   : > { %7331 = vrcp.f32 %v2402_v60 }
0x103d   : > { %7244 = vrot.lane.b32.xlu1 %v7243_v55, %s8851_s27 }
0x1041   : > { %7254 = vrot.lane.b32.xlu1 %v7243_v55, %s8850_s26 }
0x1045   : > { %3055 = vrot.lane.b32.xlu1 %v8079_v9, %s8851_s27 }
0x1046   : > { %v7332_v61 = vpop.eup %7331 }
0x1047   : > { %v2485_v62 = vsub.f32 1.0, %v7332_v61  ;;  %v2493_v2 = vmul.f32 %v7332_v61, %v2491_v63 }
0x10ab   : > { %v2488_v0 = vpop.permute.xlu1 %2487 }
0x10ac   : > { %v2490_v3 = vmul.f32 %v2488_v0, %v2485_v62 }
0x10ae   : > { %v8070_v5 = vadd.f32 %v2493_v2, %v2490_v3 }
0x10af   : > { %v7245_v18 = vpop.permute.xlu1 %7244 }
0x10b0   : > { %v2501_v7 = vrot.slane %v8070_v5, 6  ;;  %v7247_v28 = vunpack.i.h.bf16 %v7245_v18  ;;  %v7246_v29 = vunpack.i.l.bf16 %v7245_v18 }
0x10b2   : > { %2502 = vrot.lane.b32.xlu0 %v2501_v7, %s8850_s26  ;;  %v8128_v35 = vpack.c.bf16 %v7247_v28, %v7246_v29 }
0x10b3   : > { %v7255_v4 = vpop.permute.xlu1 %7254 }
0x10b4   : > { %v7256_v27 = vunpack.i.l.bf16 %v7255_v4 }
0x10b6   : > { %7249 = vrot.lane.b32.xlu0 %v7248_v8, %s8851_s27 }
0x10ba   : > { %7259 = vrot.lane.b32.xlu0 %v7248_v8, %s8850_s26 }
0x1124   : > { %v2503_v16 = vpop.permute.xlu0 %2502 }
0x1125   : > { %6423 = vmatmul.mubr.msk.f32.vlgmr.msra.gmra.mrb[22].mxu1 %vm642_vm3, %v2503_v16  ;;  %6434 = vmatmul.mubr.msk.f32.vlgmr.msra.gmra.mrb[22].mxu0 %vm642_vm3, %v2503_v16 }
0x1126   : > { %6978 = vmatpush3.bf16.msra.mxu1 %v7813_v31  ;;  %6984 = vmatpush3.bf16.msra.mxu0 %v6983_v12 }
0x1127   : > { %6979 = vmatprep.subr.bf16.mxu1 %v7590_v6  ;;  %6985 = vmatprep.subr.bf16.mxu0 %v7590_v6 }
0x1128   : > { %6444 = vmatprep.mubr.msk.f32.mxu1 %vm7593_vm0, %v7594_v17  ;;  %6463 = vmatprep.mubr.msk.f32.mxu0 %vm7593_vm0, %v7594_v17  ;;  %v7250_v31 = vpop.permute.xlu0 %7249 }
0x1129   : > { %v7252_v38 = vunpack.i.h.bf16 %v7250_v31  ;;  %v7251_v36 = vunpack.i.l.bf16 %v7250_v31 }
0x112a   : > { %6981 = vmatpush3.bf16.msra.mxu1 %v7821_v39  ;;  %6987 = vmatpush3.bf16.msra.mxu0 %v6986_v19  ;;  %v7257_v39 = vunpack.i.h.bf16 %v7255_v4 }
0x112b   : > { %6988 = vmatprep.subr.bf16.mxu0 %v7590_v6  ;;  %6994 = vmatprep.subr.bf16.mxu1 %v7590_v6  ;;  %v8140_v41 = vpack.c.bf16 %v7252_v38, %v7251_v36 }
0x112c   : > { %v7260_v30 = vpop.permute.xlu0 %7259  ;;  %v8125_v32 = vpack.c.bf16 %v7257_v39, %v7256_v27 }
0x112d   : > { %6445 = vmatmul.mubr.msk.f32.vlgmr.msra.gmra.mrb[24].mxu1 %vm642_vm3, %v2503_v16  ;;  %v7262_v33 = vunpack.i.h.bf16 %v7260_v30  ;;  %v7261_v34 = vunpack.i.l.bf16 %v7260_v30 }
0x112e   : > { %6990 = vmatpush3.bf16.msra.mxu0 %v6989_v23  ;;  %6996 = vmatpush3.bf16.msra.mxu1 %v8055_v48  ;;  %v8182_v23 = vpop.permute.xlu1 %3055 }
0x112f   : > { %6991 = vmatprep.subr.bf16.mxu0 %v7590_v6  ;;  %6997 = vmatprep.subr.bf16.mxu1 %v7590_v6  ;;  %v8135_v40 = vpack.c.bf16 %v7262_v33, %v7261_v34 }
0x1130   : > { %6474 = vmatprep.mubr.msk.f32.mxu1 %vm7593_vm0, %v7594_v17 }
0x1132   : > { %6993 = vmatpush3.bf16.msra.mxu0 %v6992_v13  ;;  %6999 = vmatpush3.bf16.msra.mxu1 %v8063_v53 }
0x1133   : > { %7000 = vmatprep.subr.bf16.mxu1 %v7590_v6  ;;  %7006 = vmatprep.subr.bf16.mxu0 %v7590_v6 }
0x1135   : > { %6464 = vmatmul.mubr.msk.f32.vlgmr.msra.gmra.mrb[24].mxu0 %vm561_vm1, %v7433_v37  ;;  %6475 = vmatmul.mubr.f32.vlgmr.msra.gmra.mrb[26].mxu1 %v7594_v17 }
0x1136   : > { %7002 = vmatpush3.bf16.msra.mxu1 %v8125_v32  ;;  %6485 = vmatprep.mubr.msk.f32.mxu1 %vm7593_vm0, %v7594_v17 }
0x1137   : > { %7003 = vmatprep.subr.bf16.mxu1 %v7590_v6  ;;  %7008 = vmatpush3.bf16.msra.mxu0 %v8128_v35 }
0x1138   : > { %7009 = vmatprep.subr.bf16.mxu0 %v7590_v6  ;;  %6496 = vmatprep.mubr.msk.f32.mxu0 %vm7593_vm0, %v7594_v17 }
0x113a   : > { %7005 = vmatpush3.bf16.msra.mxu1 %v8135_v40 }
0x113b   : > { %7011 = vmatpush3.bf16.msra.mxu0 %v8140_v41  ;;  %7012 = vmatprep.subr.bf16.mxu1 %v7590_v6 }
0x113c   : > { %7018 = vmatprep.subr.bf16.mxu0 %v7590_v6 }
0x113d   : > { %6486 = vmatmul.mubr.f32.vlgmr.msra.gmra.mrb[28].mxu1 %v7594_v17 }
0x113e   : > { %6497 = vmatmul.mubr.f32.vlgmr.msra.gmra.mrb[26].mxu0 %v7594_v17  ;;  %7014 = vmatpush3.bf16.msra.mxu1 %v8055_v48 }
0x113f   : > { %7020 = vmatpush3.bf16.msra.mxu0 %v8125_v32  ;;  %7015 = vmatprep.subr.bf16.mxu1 %v7590_v6 }
0x1140   : > { %7021 = vmatprep.subr.bf16.mxu0 %v7590_v6  ;;  %6507 = vmatprep.mubr.msk.f32.mxu1 %vm7593_vm0, %v7594_v17 }
0x1141   : > { %6518 = vmatprep.mubr.msk.f32.mxu0 %vm7593_vm0, %v7594_v17 }
0x1142   : > { %7017 = vmatpush3.bf16.msra.mxu1 %v8063_v53 }
0x1143   : > { %7023 = vmatpush3.bf16.msra.mxu0 %v8135_v40  ;;  %7024 = vmatprep.subr.bf16.mxu1 %v7590_v6 }
0x1144   : > { %7030 = vmatprep.subr.bf16.mxu0 %v7590_v6 }
0x11f8   : > { %v2572_v42 = vpop.f32.mrb[22].mxu1  ;;  %v8165_v44 = vpop.f32.mrb[22].mxu0 }
0x11f9   : > { %v2577_v47 = vrot.slane %v2572_v42, 1  ;;  %v6424_v49 = vpop.f32.mrb[23].mxu1  ;;  %v6435_v52 = vpop.f32.mrb[23].mxu0 }
0x11fb   : > { %v2579_v54 = vadd.f32 %v2577_v47, %v7847_v46 }
0x11fd   : > { %v5779_v55 = vmul.f32 -1.442695, %v2579_v54 }
0x11ff   : > { %7333 = vpow2.f32 %v5779_v55 }
0x1200   : > { %v2734_v56 = vpop.f32.mrb[24].mxu1 }
0x1201   : > { %v6446_v57 = vpop.f32.mrb[25].mxu1  ;;  %v2735_v12 = vadd.f32 %v2734_v56, %v7850_v51 }
0x1203   : > { %v2739_v19 = vrot.slane %v2735_v12, 1 }
0x1208   : > { %v2854_v59 = vpop.f32.mrb[24].mxu0  ;;  %v2931_v60 = vpop.f32.mrb[26].mxu1 }
0x1209   : > { %v7334_v61 = vpop.eup %7333  ;;  %v8171_v62 = vadd.f32 %v5797_v58, %v2854_v59  ;;  %v6465_v63 = vpop.f32.mrb[25].mxu0  ;;  %v2936_v0 = vrot.slane %v2931_v60, 1 }
0x120a   : > { %v6476_v2 = vpop.f32.mrb[27].mxu1  ;;  %v2583_v3 = vadd.f32 1.0, %v7334_v61 }
0x120b   : > { %v8175_v7 = vadd.f32 %v8079_v9, %v8171_v62 }
0x120c   : > { %7335 = vrcp.f32 %v2583_v3 }
0x120d   : > { %v2938_v8 = vadd.f32 %v2936_v0, %v8175_v7 }
0x120f   : > { %v5800_v10 = vmul.f32 -1.442695, %v2938_v8 }
0x1210   : > { %v3027_v11 = vpop.f32.mrb[28].mxu1 }
0x1211   : > { %7337 = vpow2.f32 %v5800_v10  ;;  %v3032_v14 = vrot.slane %v3027_v11, 1  ;;  %v3124_v15 = vpop.f32.mrb[26].mxu0  ;;  %v6487_v16 = vpop.f32.mrb[29].mxu1 }
0x1212   : > { %v6498_v18 = vpop.f32.mrb[27].mxu0  ;;  %v3125_v4 = vadd.f32 %v3124_v15, %v8182_v23 }
0x1213   : > { %3033 = vrot.lane.b32.xlu1 %v3032_v14, %s8852_s3 }
0x1214   : > { %v3129_v25 = vrot.slane %v3125_v4, 1 }
0x1216   : > { %v7336_v20 = vpop.eup %7335 }
0x1217   : > { %v8180_v22 = vmul.f32 %v7336_v20, %v2739_v19 }
0x121b   : > { %v7338_v9 = vpop.eup %7337 }
0x121c   : > { %v2942_v31 = vadd.f32 1.0, %v7338_v9 }
0x121e   : > { %7339 = vrcp.f32 %v2942_v31 }
0x1228   : > { %v7340_v51 = vpop.eup %7339 }
0x1229   : > { %v3131_v26 = vmul.f32 %v7340_v51, %v3129_v25 }
0x122b   : > { %3133 = vrot.lane.b32.xlu0 %v3131_v26, %s8851_s27 }
0x1285   : > { %v3034_v28 = vpop.permute.xlu1 %3033 }
0x1286   : > { %v3036_v29 = vadd.f32 %v3034_v28, %v8175_v7 }
0x1288   : > { %v5801_v30 = vmul.f32 -1.442695, %v3036_v29 }
0x129d   : > { %v3134_v39 = vpop.permute.xlu0 %3133 }
0x129e   : > { %v3136_v27 = vadd.f32 %v3134_v39, %v8171_v62 }
0x12a0   : > { %7341 = vtanh.f32 %v3136_v27 }
0x12a1   : > { %7343 = vpow2.f32 %v5801_v30 }
0x12aa   : > { %v7342_v13 = vpop.eup %7341 }
0x12ab   : > { %3140 = vrot.lane.b32.xlu0 %v7342_v13, %s8850_s26  ;;  %v7344_v33 = vpop.eup %7343 }
0x12ac   : > { %v3040_v34 = vadd.f32 1.0, %v7344_v33 }
0x12ae   : > { %7345 = vrcp.f32 %v3040_v34 }
0x12b8   : > { %v7346_v38 = vpop.eup %7345 }
0x12b9   : > { %v3138_v36 = vsub.f32 1.0, %v7346_v38  ;;  %v3144_v42 = vmul.f32 0.0, %v7346_v38 }
0x131d   : > { %v3141_v37 = vpop.permute.xlu0 %3140 }
0x131e   : > { %v3143_v47 = vmul.f32 %v3141_v37, %v3138_v36 }
0x1320   : > { %v8189_v49 = vadd.f32 %v3144_v42, %v3143_v47 }
0x1322   : > { %v3149_v52 = vrot.slane %v8189_v49, 7  ;;  %v3402_v51 = vrot.slane %v8189_v49, 1 }
0x1324   : > { %3150 = vrot.lane.b32.xlu1 %v3149_v52, %s8850_s26 }
0x1396   : > { %v3151_v54 = vpop.permute.xlu1 %3150 }
0x1397   : > { %6508 = vmatmul.mubr.msk.f32.vlgmr.msra.gmra.mrb[30].mxu1 %vm642_vm3, %v3151_v54  ;;  %6519 = vmatmul.mubr.msk.f32.vlgmr.msra.gmra.mrb[28].mxu0 %vm642_vm3, %v3151_v54 }
0x1398   : > { %7026 = vmatpush3.bf16.msra.mxu1 %v8128_v35  ;;  %6529 = vmatprep.mubr.msk.f32.mxu1 %vm7593_vm0, %v7594_v17 }
0x1399   : > { %7027 = vmatprep.subr.bf16.mxu1 %v7590_v6  ;;  %7032 = vmatpush3.bf16.msra.mxu0 %v8055_v48 }
0x139a   : > { %7033 = vmatprep.subr.bf16.mxu0 %v7590_v6  ;;  %6540 = vmatprep.mubr.msk.f32.mxu0 %vm7593_vm0, %v7594_v17 }
0x139c   : > { %7029 = vmatpush3.bf16.msra.mxu1 %v8140_v41 }
0x139d   : > { %7036 = vmatprep.subr.bf16.mxu1 %v7590_v6  ;;  %7035 = vmatpush3.bf16.msra.mxu0 %v8063_v53 }
0x139e   : > { %7042 = vmatprep.subr.bf16.mxu0 %v7590_v6 }
0x139f   : > { %6530 = vmatmul.mubr.msk.f32.vlgmr.msra.gmra.mrb[32].mxu1 %vm642_vm3, %v3151_v54 }
0x13a0   : > { %7038 = vmatpush3.bf16.msra.mxu1 %v8125_v32  ;;  %6551 = vmatprep.mubr.msk.f32.mxu1 %vm7593_vm0, %v7594_v17 }
0x13a1   : > { %7039 = vmatprep.subr.bf16.mxu1 %v7590_v6 }
0x13a4   : > { %7041 = vmatpush3.bf16.msra.mxu1 %v8135_v40 }
0x13a5   : > { %7048 = vmatprep.subr.bf16.mxu1 %v7590_v6 }
0x146a   : > { %v3220_v55 = vpop.f32.mrb[30].mxu1  ;;  %v3300_v56 = vpop.f32.mrb[28].mxu0 }
0x146b   : > { %v3225_v57 = vrot.slane %v3220_v55, 2  ;;  %v3305_v58 = vrot.slane %v3300_v56, 2  ;;  %v6509_v59 = vpop.f32.mrb[31].mxu1  ;;  %v6520_v60 = vpop.f32.mrb[29].mxu0 }
0x146d   : > { %v3227_v61 = vadd.f32 %v3225_v57, %v8175_v7  ;;  %3306 = vrot.lane.b32.xlu1 %v3305_v58, %s8852_s3 }
0x146f   : > { %v5803_v63 = vmul.f32 -1.442695, %v3227_v61 }
0x1471   : > { %7347 = vpow2.f32 %v5803_v63 }
0x1472   : > { %v3382_v0 = vpop.f32.mrb[32].mxu1 }
0x1473   : > { %v6531_v2 = vpop.f32.mrb[33].mxu1  ;;  %v3383_v10 = vadd.f32 %v3382_v0, %v8182_v23 }
0x1475   : > { %v3387_v11 = vrot.slane %v3383_v10, 2 }
0x147b   : > { %v7348_v3 = vpop.eup %7347 }
0x147c   : > { %v3231_v8 = vadd.f32 1.0, %v7348_v3 }
0x147e   : > { %7349 = vrcp.f32 %v3231_v8 }
0x1488   : > { %v7350_v12 = vpop.eup %7349 }
0x1489   : > { %v3389_v14 = vmul.f32 %v7350_v12, %v3387_v11 }
0x148b   : > { %3391 = vrot.lane.b32.xlu0 %v3389_v14, %s8851_s27 }
0x14df   : > { %v3307_v19 = vpop.permute.xlu1 %3306 }
0x14e0   : > { %v3309_v20 = vadd.f32 %v3307_v19, %v8175_v7 }
0x14e2   : > { %v5805_v9 = vmul.f32 -1.442695, %v3309_v20 }
0x14fd   : > { %v3392_v15 = vpop.permute.xlu0 %3391 }
0x14fe   : > { %v3394_v16 = vadd.f32 %v3392_v15, %v8171_v62 }
0x1500   : > { %7351 = vtanh.f32 %v3394_v16 }
0x1501   : > { %7353 = vpow2.f32 %v5805_v9 }
0x150a   : > { %v7352_v18 = vpop.eup %7351 }
0x150b   : > { %3398 = vrot.lane.b32.xlu0 %v7352_v18, %s8850_s26  ;;  %v7354_v31 = vpop.eup %7353 }
0x150c   : > { %v3313_v4 = vadd.f32 1.0, %v7354_v31 }
0x150e   : > { %7355 = vrcp.f32 %v3313_v4 }
0x1518   : > { %v7356_v25 = vpop.eup %7355 }
0x1519   : > { %v3396_v26 = vsub.f32 1.0, %v7356_v25  ;;  %v3404_v13 = vmul.f32 %v7356_v25, %v3402_v51 }
0x157d   : > { %v3399_v39 = vpop.permute.xlu0 %3398 }
0x157e   : > { %v3401_v27 = vmul.f32 %v3399_v39, %v3396_v26 }
0x1580   : > { %v8222_v28 = vadd.f32 %v3404_v13, %v3401_v27 }
0x1582   : > { %v3409_v29 = vrot.slane %v8222_v28, 6  ;;  %v3662_v16 = vrot.slane %v8222_v28, 1 }
0x1584   : > { %3410 = vrot.lane.b32.xlu1 %v3409_v29, %s8850_s26 }
0x15f6   : > { %v3411_v30 = vpop.permute.xlu1 %3410 }
0x15f7   : > { %6541 = vmatmul.mubr.msk.f32.vlgmr.msra.gmra.mrb[30].mxu0 %vm642_vm3, %v3411_v30  ;;  %6552 = vmatmul.mubr.msk.f32.vlgmr.msra.gmra.mrb[34].mxu1 %vm642_vm3, %v3411_v30 }
0x15f8   : > { %7044 = vmatpush3.bf16.msra.mxu0 %v8128_v35  ;;  %6562 = vmatprep.mubr.msk.f32.mxu0 %vm7593_vm0, %v7594_v17 }
0x15f9   : > { %7045 = vmatprep.subr.bf16.mxu0 %v7590_v6  ;;  %7050 = vmatpush3.bf16.msra.mxu1 %v8055_v48 }
0x15fa   : > { %7051 = vmatprep.subr.bf16.mxu1 %v7590_v6  ;;  %6573 = vmatprep.mubr.msk.f32.mxu1 %vm7593_vm0, %v7594_v17 }
0x15fc   : > { %7047 = vmatpush3.bf16.msra.mxu0 %v8140_v41 }
0x15fd   : > { %7054 = vmatprep.subr.bf16.mxu0 %v7590_v6  ;;  %7053 = vmatpush3.bf16.msra.mxu1 %v8063_v53 }
0x15fe   : > { %7060 = vmatprep.subr.bf16.mxu1 %v7590_v6 }
0x15ff   : > { %6563 = vmatmul.mubr.msk.f32.vlgmr.msra.gmra.mrb[32].mxu0 %vm642_vm3, %v3411_v30 }
0x1600   : > { %7056 = vmatpush3.bf16.msra.mxu0 %v8125_v32  ;;  %6584 = vmatprep.mubr.msk.f32.mxu0 %vm7593_vm0, %v7594_v17 }
0x1601   : > { %7057 = vmatprep.subr.bf16.mxu0 %v7590_v6 }
0x1604   : > { %7059 = vmatpush3.bf16.msra.mxu0 %v8135_v40 }
0x1605   : > { %7066 = vmatprep.subr.bf16.mxu0 %v7590_v6 }
0x16ca   : > { %v3480_v33 = vpop.f32.mrb[30].mxu0  ;;  %v3560_v34 = vpop.f32.mrb[34].mxu1 }
0x16cb   : > { %v3485_v38 = vrot.slane %v3480_v33, 3  ;;  %v3565_v36 = vrot.slane %v3560_v34, 3  ;;  %v6542_v37 = vpop.f32.mrb[31].mxu0  ;;  %v6553_v42 = vpop.f32.mrb[35].mxu1 }
0x16cd   : > { %v3487_v47 = vadd.f32 %v3485_v38, %v8175_v7  ;;  %3566 = vrot.lane.b32.xlu1 %v3565_v36, %s8852_s3 }
0x16cf   : > { %v5808_v52 = vmul.f32 -1.442695, %v3487_v47 }
0x16d1   : > { %7357 = vpow2.f32 %v5808_v52 }
0x16d2   : > { %v3642_v54 = vpop.f32.mrb[32].mxu0 }
0x16d3   : > { %v6564_v55 = vpop.f32.mrb[33].mxu0  ;;  %v3643_v58 = vadd.f32 %v3642_v54, %v8182_v23 }
0x16d5   : > { %v3647_v59 = vrot.slane %v3643_v58, 3 }
0x16db   : > { %v7358_v56 = vpop.eup %7357 }
0x16dc   : > { %v3491_v57 = vadd.f32 1.0, %v7358_v56 }
0x16de   : > { %7359 = vrcp.f32 %v3491_v57 }
0x16e8   : > { %v7360_v60 = vpop.eup %7359 }
0x16e9   : > { %v3649_v61 = vmul.f32 %v7360_v60, %v3647_v59 }
0x16eb   : > { %3651 = vrot.lane.b32.xlu0 %v3649_v61, %s8851_s27 }
0x173f   : > { %v3567_v3 = vpop.permute.xlu1 %3566 }
0x1740   : > { %v3569_v8 = vadd.f32 %v3567_v3, %v8175_v7 }
0x1742   : > { %v5810_v10 = vmul.f32 -1.442695, %v3569_v8 }
0x175d   : > { %v3652_v63 = vpop.permute.xlu0 %3651 }
0x175e   : > { %v3654_v0 = vadd.f32 %v3652_v63, %v8171_v62 }
0x1760   : > { %7361 = vtanh.f32 %v3654_v0 }
0x1761   : > { %7363 = vpow2.f32 %v5810_v10 }
0x176a   : > { %v7362_v2 = vpop.eup %7361 }
0x176b   : > { %3658 = vrot.lane.b32.xlu0 %v7362_v2, %s8850_s26  ;;  %v7364_v11 = vpop.eup %7363 }
0x176c   : > { %v3573_v12 = vadd.f32 1.0, %v7364_v11 }
0x176e   : > { %7365 = vrcp.f32 %v3573_v12 }
0x1778   : > { %v7366_v14 = vpop.eup %7365 }
0x1779   : > { %v3656_v15 = vsub.f32 1.0, %v7366_v14  ;;  %v3664_v19 = vmul.f32 %v7366_v14, %v3662_v16 }
0x17dd   : > { %v3659_v18 = vpop.permute.xlu0 %3658 }
0x17de   : > { %v3661_v20 = vmul.f32 %v3659_v18, %v3656_v15 }
0x17e0   : > { %v8255_v9 = vadd.f32 %v3664_v19, %v3661_v20 }
0x17e2   : > { %v3669_v31 = vrot.slane %v8255_v9, 5  ;;  %v3922_v0 = vrot.slane %v8255_v9, 1 }
0x17e4   : > { %3670 = vrot.lane.b32.xlu1 %v3669_v31, %s8850_s26 }
0x1856   : > { %v3671_v4 = vpop.permute.xlu1 %3670 }
0x1857   : > { %6574 = vmatmul.mubr.msk.f32.vlgmr.msra.gmra.mrb[36].mxu1 %vm642_vm3, %v3671_v4  ;;  %6585 = vmatmul.mubr.msk.f32.vlgmr.msra.gmra.mrb[34].mxu0 %vm642_vm3, %v3671_v4 }
0x1858   : > { %7062 = vmatpush3.bf16.msra.mxu1 %v8128_v35  ;;  %6595 = vmatprep.mubr.msk.f32.mxu1 %vm7593_vm0, %v7594_v17 }
0x1859   : > { %7063 = vmatprep.subr.bf16.mxu1 %v7590_v6  ;;  %7068 = vmatpush3.bf16.msra.mxu0 %v8055_v48 }
0x185a   : > { %7069 = vmatprep.subr.bf16.mxu0 %v7590_v6  ;;  %6606 = vmatprep.mubr.msk.f32.mxu0 %vm7593_vm0, %v7594_v17 }
0x185c   : > { %7065 = vmatpush3.bf16.msra.mxu1 %v8140_v41 }
0x185d   : > { %7072 = vmatprep.subr.bf16.mxu1 %v7590_v6  ;;  %7071 = vmatpush3.bf16.msra.mxu0 %v8063_v53 }
0x185e   : > { %7078 = vmatprep.subr.bf16.mxu0 %v7590_v6 }
0x185f   : > { %6596 = vmatmul.mubr.msk.f32.vlgmr.msra.gmra.mrb[38].mxu1 %vm642_vm3, %v3671_v4 }
0x1860   : > { %7074 = vmatpush3.bf16.msra.mxu1 %v8125_v32  ;;  %6617 = vmatprep.mubr.msk.f32.mxu1 %vm7593_vm0, %v7594_v17 }
0x1861   : > { %7075 = vmatprep.subr.bf16.mxu1 %v7590_v6 }
0x1864   : > { %7077 = vmatpush3.bf16.msra.mxu1 %v8135_v40 }
0x1865   : > { %7084 = vmatprep.subr.bf16.mxu1 %v7590_v6 }
0x192a   : > { %v3740_v25 = vpop.f32.mrb[36].mxu1  ;;  %v3820_v51 = vpop.f32.mrb[34].mxu0 }
0x192b   : > { %v3745_v26 = vrot.slane %v3740_v25, 4  ;;  %v3825_v39 = vrot.slane %v3820_v51, 4  ;;  %v6575_v27 = vpop.f32.mrb[37].mxu1  ;;  %v6586_v13 = vpop.f32.mrb[35].mxu0 }
0x192d   : > { %v3747_v29 = vadd.f32 %v3745_v26, %v8175_v7  ;;  %3826 = vrot.lane.b32.xlu1 %v3825_v39, %s8852_s3 }
0x192f   : > { %v5813_v30 = vmul.f32 -1.442695, %v3747_v29 }
0x1931   : > { %7367 = vpow2.f32 %v5813_v30 }
0x1932   : > { %v3902_v33 = vpop.f32.mrb[38].mxu1 }
0x1933   : > { %v6597_v34 = vpop.f32.mrb[39].mxu1  ;;  %v3903_v37 = vadd.f32 %v3902_v33, %v8182_v23 }
0x1935   : > { %v3907_v42 = vrot.slane %v3903_v37, 4 }
0x193b   : > { %v7368_v38 = vpop.eup %7367 }
0x193c   : > { %v3751_v36 = vadd.f32 1.0, %v7368_v38 }
0x193e   : > { %7369 = vrcp.f32 %v3751_v36 }
0x1948   : > { %v7370_v47 = vpop.eup %7369 }
0x1949   : > { %v3909_v52 = vmul.f32 %v7370_v47, %v3907_v42 }
0x194b   : > { %3911 = vrot.lane.b32.xlu0 %v3909_v52, %s8851_s27 }
0x199f   : > { %v3827_v57 = vpop.permute.xlu1 %3826 }
0x19a0   : > { %v3829_v58 = vadd.f32 %v3827_v57, %v8175_v7 }
0x19a2   : > { %v5815_v59 = vmul.f32 -1.442695, %v3829_v58 }
0x19bd   : > { %v3912_v54 = vpop.permute.xlu0 %3911 }
0x19be   : > { %v3914_v55 = vadd.f32 %v3912_v54, %v8171_v62 }
0x19c0   : > { %7371 = vtanh.f32 %v3914_v55 }
0x19c1   : > { %7373 = vpow2.f32 %v5815_v59 }
0x19ca   : > { %v7372_v56 = vpop.eup %7371 }
0x19cb   : > { %3918 = vrot.lane.b32.xlu0 %v7372_v56, %s8850_s26  ;;  %v7374_v60 = vpop.eup %7373 }
0x19cc   : > { %v3833_v61 = vadd.f32 1.0, %v7374_v60 }
0x19ce   : > { %7375 = vrcp.f32 %v3833_v61 }
0x19d8   : > { %v7376_v63 = vpop.eup %7375 }
0x19d9   : > { %v3916_v2 = vsub.f32 1.0, %v7376_v63  ;;  %v3924_v10 = vmul.f32 %v7376_v63, %v3922_v0 }
0x1a3d   : > { %v3919_v3 = vpop.permute.xlu0 %3918 }
0x1a3e   : > { %v3921_v8 = vmul.f32 %v3919_v3, %v3916_v2 }
0x1a40   : > { %v8288_v11 = vadd.f32 %v3924_v10, %v3921_v8 }
0x1a42   : > { %v3929_v12 = vrot.slane %v8288_v11, 4  ;;  %v4182_v57 = vrot.slane %v8288_v11, 1 }
0x1a44   : > { %3930 = vrot.lane.b32.xlu1 %v3929_v12, %s8850_s26 }
0x1ab6   : > { %v3931_v14 = vpop.permute.xlu1 %3930 }
0x1ab7   : > { %6607 = vmatmul.mubr.msk.f32.vlgmr.msra.gmra.mrb[36].mxu0 %vm642_vm3, %v3931_v14  ;;  %6618 = vmatmul.mubr.msk.f32.vlgmr.msra.gmra.mrb[40].mxu1 %vm642_vm3, %v3931_v14 }
0x1ab8   : > { %7080 = vmatpush3.bf16.msra.mxu0 %v8128_v35  ;;  %6628 = vmatprep.mubr.msk.f32.mxu0 %vm7593_vm0, %v7594_v17 }
0x1ab9   : > { %7081 = vmatprep.subr.bf16.mxu0 %v7590_v6  ;;  %7086 = vmatpush3.bf16.msra.mxu1 %v8055_v48 }
0x1aba   : > { %7087 = vmatprep.subr.bf16.mxu1 %v7590_v6  ;;  %6639 = vmatprep.mubr.msk.f32.mxu1 %vm7593_vm0, %v7594_v17 }
0x1abc   : > { %7083 = vmatpush3.bf16.msra.mxu0 %v8140_v41 }
0x1abd   : > { %7090 = vmatprep.subr.bf16.mxu0 %v7590_v6  ;;  %7089 = vmatpush3.bf16.msra.mxu1 %v8063_v53 }
0x1abe   : > { %7096 = vmatprep.subr.bf16.mxu1 %v7590_v6 }
0x1abf   : > { %6629 = vmatmul.mubr.msk.f32.vlgmr.msra.gmra.mrb[38].mxu0 %vm642_vm3, %v3931_v14 }
0x1ac0   : > { %7092 = vmatpush3.bf16.msra.mxu0 %v8125_v32  ;;  %6650 = vmatprep.mubr.msk.f32.mxu0 %vm7593_vm0, %v7594_v17 }
0x1ac1   : > { %7093 = vmatprep.subr.bf16.mxu0 %v7590_v6 }
0x1ac4   : > { %7095 = vmatpush3.bf16.msra.mxu0 %v8135_v40 }
0x1ac5   : > { %7102 = vmatprep.subr.bf16.mxu0 %v7590_v6 }
0x1b8a   : > { %v4000_v15 = vpop.f32.mrb[36].mxu0  ;;  %v4080_v16 = vpop.f32.mrb[40].mxu1 }
0x1b8b   : > { %v4005_v18 = vrot.slane %v4000_v15, 5  ;;  %v4085_v19 = vrot.slane %v4080_v16, 5  ;;  %v6608_v20 = vpop.f32.mrb[37].mxu0  ;;  %v6619_v31 = vpop.f32.mrb[41].mxu1 }
0x1b8d   : > { %v4007_v4 = vadd.f32 %v4005_v18, %v8175_v7  ;;  %4086 = vrot.lane.b32.xlu1 %v4085_v19, %s8852_s3 }
0x1b8f   : > { %v5818_v25 = vmul.f32 -1.442695, %v4007_v4 }
0x1b91   : > { %7377 = vpow2.f32 %v5818_v25 }
0x1b92   : > { %v4162_v51 = vpop.f32.mrb[38].mxu0 }
0x1b93   : > { %v6630_v26 = vpop.f32.mrb[39].mxu0  ;;  %v4163_v13 = vadd.f32 %v4162_v51, %v8182_v23 }
0x1b95   : > { %v4167_v29 = vrot.slane %v4163_v13, 5 }
0x1b9b   : > { %v7378_v39 = vpop.eup %7377 }
0x1b9c   : > { %v4011_v27 = vadd.f32 1.0, %v7378_v39 }
0x1b9e   : > { %7379 = vrcp.f32 %v4011_v27 }
0x1ba8   : > { %v7380_v30 = vpop.eup %7379 }
0x1ba9   : > { %v4169_v33 = vmul.f32 %v7380_v30, %v4167_v29 }
0x1bab   : > { %4171 = vrot.lane.b32.xlu0 %v4169_v33, %s8851_s27 }
0x1bff   : > { %v4087_v37 = vpop.permute.xlu1 %4086 }
0x1c00   : > { %v4089_v42 = vadd.f32 %v4087_v37, %v8175_v7 }
0x1c02   : > { %v5820_v47 = vmul.f32 -1.442695, %v4089_v42 }
0x1c1d   : > { %v4172_v34 = vpop.permute.xlu0 %4171 }
0x1c1e   : > { %v4174_v38 = vadd.f32 %v4172_v34, %v8171_v62 }
0x1c20   : > { %7381 = vtanh.f32 %v4174_v38 }
0x1c21   : > { %7383 = vpow2.f32 %v5820_v47 }
0x1c2a   : > { %v7382_v36 = vpop.eup %7381 }
0x1c2b   : > { %4178 = vrot.lane.b32.xlu0 %v7382_v36, %s8850_s26  ;;  %v7384_v52 = vpop.eup %7383 }
0x1c2c   : > { %v4093_v54 = vadd.f32 1.0, %v7384_v52 }
0x1c2e   : > { %7385 = vrcp.f32 %v4093_v54 }
0x1c38   : > { %v7386_v55 = vpop.eup %7385 }
0x1c39   : > { %v4176_v56 = vsub.f32 1.0, %v7386_v55  ;;  %v4184_v59 = vmul.f32 %v7386_v55, %v4182_v57 }
0x1c9d   : > { %v4179_v58 = vpop.permute.xlu0 %4178 }
0x1c9e   : > { %v4181_v60 = vmul.f32 %v4179_v58, %v4176_v56 }
0x1ca0   : > { %v8321_v61 = vadd.f32 %v4184_v59, %v4181_v60 }
0x1ca2   : > { %v4189_v63 = vrot.slane %v8321_v61, 3  ;;  %v4442_v37 = vrot.slane %v8321_v61, 1 }
0x1ca4   : > { %4190 = vrot.lane.b32.xlu1 %v4189_v63, %s8850_s26 }
0x1d16   : > { %v4191_v0 = vpop.permute.xlu1 %4190 }
0x1d17   : > { %6640 = vmatmul.mubr.msk.f32.vlgmr.msra.gmra.mrb[42].mxu1 %vm642_vm3, %v4191_v0  ;;  %6651 = vmatmul.mubr.msk.f32.vlgmr.msra.gmra.mrb[40].mxu0 %vm642_vm3, %v4191_v0 }
0x1d18   : > { %7098 = vmatpush3.bf16.msra.mxu1 %v8128_v35  ;;  %6661 = vmatprep.mubr.msk.f32.mxu1 %vm7593_vm0, %v7594_v17 }
0x1d19   : > { %7099 = vmatprep.subr.bf16.mxu1 %v7590_v6  ;;  %7104 = vmatpush3.bf16.msra.mxu0 %v8055_v48 }
0x1d1a   : > { %7105 = vmatprep.subr.bf16.mxu0 %v7590_v6  ;;  %6672 = vmatprep.mubr.msk.f32.mxu0 %vm7593_vm0, %v7594_v17 }
0x1d1c   : > { %7101 = vmatpush3.bf16.msra.mxu1 %v8140_v41 }
0x1d1d   : > { %7108 = vmatprep.subr.bf16.mxu1 %v7590_v6  ;;  %7107 = vmatpush3.bf16.msra.mxu0 %v8063_v53 }
0x1d1e   : > { %7114 = vmatprep.subr.bf16.mxu0 %v7590_v6 }
0x1d1f   : > { %6662 = vmatmul.mubr.msk.f32.vlgmr.msra.gmra.mrb[44].mxu1 %vm642_vm3, %v4191_v0 }
0x1d20   : > { %7110 = vmatpush3.bf16.msra.mxu1 %v8125_v32  ;;  %6683 = vmatprep.mubr.msk.f32.mxu1 %vm7593_vm0, %v7594_v17 }
0x1d21   : > { %7111 = vmatprep.subr.bf16.mxu1 %v7590_v6 }
0x1d24   : > { %7113 = vmatpush3.bf16.msra.mxu1 %v8135_v40 }
0x1d25   : > { %7120 = vmatprep.subr.bf16.mxu1 %v7590_v6 }
0x1dea   : > { %v4260_v2 = vpop.f32.mrb[42].mxu1  ;;  %v4340_v3 = vpop.f32.mrb[40].mxu0 }
0x1deb   : > { %v4265_v8 = vrot.slane %v4260_v2, 6  ;;  %v4345_v10 = vrot.slane %v4340_v3, 6  ;;  %v6641_v12 = vpop.f32.mrb[43].mxu1  ;;  %v6652_v14 = vpop.f32.mrb[41].mxu0 }
0x1ded   : > { %v4267_v15 = vadd.f32 %v4265_v8, %v8175_v7  ;;  %4346 = vrot.lane.b32.xlu1 %v4345_v10, %s8852_s3 }
0x1def   : > { %v5823_v16 = vmul.f32 -1.442695, %v4267_v15 }
0x1df1   : > { %7387 = vpow2.f32 %v5823_v16 }
0x1df2   : > { %v4422_v18 = vpop.f32.mrb[44].mxu1 }
0x1df3   : > { %v6663_v19 = vpop.f32.mrb[45].mxu1  ;;  %v4423_v4 = vadd.f32 %v4422_v18, %v8182_v23 }
0x1df5   : > { %v4427_v25 = vrot.slane %v4423_v4, 6 }
0x1dfb   : > { %v7388_v20 = vpop.eup %7387 }
0x1dfc   : > { %v4271_v31 = vadd.f32 1.0, %v7388_v20 }
0x1dfe   : > { %7389 = vrcp.f32 %v4271_v31 }
0x1e08   : > { %v7390_v51 = vpop.eup %7389 }
0x1e09   : > { %v4429_v26 = vmul.f32 %v7390_v51, %v4427_v25 }
0x1e0b   : > { %4431 = vrot.lane.b32.xlu0 %v4429_v26, %s8851_s27 }
0x1e5f   : > { %v4347_v29 = vpop.permute.xlu1 %4346 }
0x1e60   : > { %v4349_v30 = vadd.f32 %v4347_v29, %v8175_v7 }
0x1e62   : > { %v5825_v33 = vmul.f32 -1.442695, %v4349_v30 }
0x1e7d   : > { %v4432_v39 = vpop.permute.xlu0 %4431 }
0x1e7e   : > { %v4434_v27 = vadd.f32 %v4432_v39, %v8171_v62 }
0x1e80   : > { %7391 = vtanh.f32 %v4434_v27 }
0x1e81   : > { %7393 = vpow2.f32 %v5825_v33 }
0x1e8a   : > { %v7392_v13 = vpop.eup %7391 }
0x1e8b   : > { %4438 = vrot.lane.b32.xlu0 %v7392_v13, %s8850_s26  ;;  %v7394_v34 = vpop.eup %7393 }
0x1e8c   : > { %v4353_v38 = vadd.f32 1.0, %v7394_v34 }
0x1e8e   : > { %7395 = vrcp.f32 %v4353_v38 }
0x1e98   : > { %v7396_v36 = vpop.eup %7395 }
0x1e99   : > { %v4436_v42 = vsub.f32 1.0, %v7396_v36  ;;  %v4444_v54 = vmul.f32 %v7396_v36, %v4442_v37  ;;  %v2657_v36 = vrot.slane %v8165_v44, 1 }
0x1efd   : > { %v4439_v47 = vpop.permute.xlu0 %4438 }
0x1efe   : > { %v4441_v52 = vmul.f32 %v4439_v47, %v4436_v42 }
0x1f00   : > { %v8354_v55 = vadd.f32 %v4444_v54, %v4441_v52 }
0x1f02   : > { %v4449_v56 = vrot.slane %v8354_v55, 2  ;;  %v4702_v27 = vrot.slane %v8354_v55, 1 }
0x1f04   : > { %4450 = vrot.lane.b32.xlu1 %v4449_v56, %s8850_s26  ;;  %v2754_v56 = vrot.slane %v8070_v5, 7 }
0x1f76   : > { %v4451_v57 = vpop.permute.xlu1 %4450 }
0x1f77   : > { %6673 = vmatmul.mubr.msk.f32.vlgmr.msra.gmra.mrb[42].mxu0 %vm642_vm3, %v4451_v57  ;;  %6684 = vmatmul.mubr.msk.f32.vlgmr.msra.gmra.mrb[46].mxu1 %vm642_vm3, %v4451_v57 }
0x1f78   : > { %7116 = vmatpush3.bf16.msra.mxu0 %v8128_v35  ;;  %6694 = vmatprep.mubr.msk.f32.mxu0 %vm7593_vm0, %v7594_v17 }
0x1f79   : > { %7117 = vmatprep.subr.bf16.mxu0 %v7590_v6  ;;  %7122 = vmatpush3.bf16.msra.mxu1 %v8055_v48 }
0x1f7a   : > { %7123 = vmatprep.subr.bf16.mxu1 %v7590_v6  ;;  %6705 = vmatprep.mubr.msk.f32.mxu1 %vm7593_vm0, %v7594_v17 }
0x1f7c   : > { %7119 = vmatpush3.bf16.msra.mxu0 %v8140_v41 }
0x1f7d   : > { %7126 = vmatprep.subr.bf16.mxu0 %v7590_v6  ;;  %7125 = vmatpush3.bf16.msra.mxu1 %v8063_v53 }
0x1f7e   : > { %7132 = vmatprep.subr.bf16.mxu1 %v7590_v6 }
0x1f7f   : > { %6695 = vmatmul.mubr.msk.f32.vlgmr.msra.gmra.mrb[44].mxu0 %vm642_vm3, %v4451_v57 }
0x1f80   : > { %7128 = vmatpush3.bf16.msra.mxu0 %v8125_v32  ;;  %6716 = vmatprep.mubr.msk.f32.mxu0 %vm7593_vm0, %v7594_v17 }
0x1f81   : > { %7129 = vmatprep.subr.bf16.mxu0 %v7590_v6 }
0x1f84   : > { %7131 = vmatpush3.bf16.msra.mxu0 %v8135_v40 }
0x1f85   : > { %7138 = vmatprep.subr.bf16.mxu0 %v7590_v6 }
0x204a   : > { %v4520_v48 = vpop.f32.mrb[42].mxu0  ;;  %v4600_v58 = vpop.f32.mrb[46].mxu1 }
0x204b   : > { %v4525_v59 = vrot.slane %v4520_v48, 7  ;;  %v4605_v60 = vrot.slane %v4600_v58, 7  ;;  %v6674_v53 = vpop.f32.mrb[43].mxu0  ;;  %v6685_v63 = vpop.f32.mrb[47].mxu1 }
0x204d   : > { %v4527_v0 = vadd.f32 %v4525_v59, %v8175_v7  ;;  %4606 = vrot.lane.b32.xlu1 %v4605_v60, %s8852_s3 }
0x204f   : > { %v5828_v32 = vmul.f32 -1.442695, %v4527_v0 }
0x2051   : > { %7397 = vpow2.f32 %v5828_v32 }
0x2052   : > { %v4682_v2 = vpop.f32.mrb[44].mxu0 }
0x2053   : > { %v6696_v3 = vpop.f32.mrb[45].mxu0  ;;  %v4683_v40 = vadd.f32 %v4682_v2, %v8182_v23 }
0x2055   : > { %v4687_v12 = vrot.slane %v4683_v40, 7 }
0x205b   : > { %v7398_v8 = vpop.eup %7397 }
0x205c   : > { %v4531_v10 = vadd.f32 1.0, %v7398_v8 }
0x205e   : > { %7399 = vrcp.f32 %v4531_v10 }
0x2068   : > { %v7400_v14 = vpop.eup %7399 }
0x2069   : > { %v4689_v15 = vmul.f32 %v7400_v14, %v4687_v12  ;;  %v4961_v12 = vld [vmem:[%s8853_s5] sm:$0xff]  ;;  %v4962_v14 = vld [vmem:[%s8853_s5 + $0x8] sm:$0xff] }
0x206b   : > { %4691 = vrot.lane.b32.xlu0 %v4689_v15, %s8851_s27  ;;  %v7139_v15 = vpack.c.bf16 %v4962_v14, %v4961_v12  ;;  %v5186_v12 = vld [vmem:[%s8810_s9 + $0x20] sm:$0xff] }
0x20bf   : > { %v4607_v20 = vpop.permute.xlu1 %4606 }
0x20c0   : > { %v4609_v31 = vadd.f32 %v4607_v20, %v8175_v7  ;;  %v4963_v20 = vld [vmem:[%s8853_s5 + $0x10] sm:$0xff] }
0x20c2   : > { %v5830_v4 = vmul.f32 -1.442695, %v4609_v31  ;;  %v5072_v31 = vld [vmem:[%s8808_s7 + $0x10] sm:$0xff] }
0x20dd   : > { %v4692_v16 = vpop.permute.xlu0 %4691 }
0x20de   : > { %v4694_v18 = vadd.f32 %v4692_v16, %v8171_v62  ;;  %v5071_v16 = vld [vmem:[%s8808_s7 + $0x8] sm:$0xff] }
0x20e0   : > { %7401 = vtanh.f32 %v4694_v18 }
0x20e1   : > { %7403 = vpow2.f32 %v5830_v4 }
0x20ea   : > { %v7402_v19 = vpop.eup %7401 }
0x20eb   : > { %4698 = vrot.lane.b32.xlu0 %v7402_v19, %s8850_s26  ;;  %v7404_v25 = vpop.eup %7403 }
0x20ec   : > { %v4613_v51 = vadd.f32 1.0, %v7404_v25 }
0x20ee   : > { %7405 = vrcp.f32 %v4613_v51  ;;  %v4965_v51 = vld [vmem:[%s8853_s5 + $0x20] sm:$0xff] }
0x20ef   : > { %2743 = vrot.lane.b32.xlu0 %v8180_v22, %s8851_s27 }
0x20f8   : > { %v7406_v26 = vpop.eup %7405 }
0x20f9   : > { %v4696_v39 = vsub.f32 1.0, %v7406_v26  ;;  %v4704_v29 = vmul.f32 %v7406_v26, %v4702_v27  ;;  %v4966_v26 = vld [vmem:[%s8853_s5 + $0x28] sm:$0xff] }
0x20fa   : > { %v7145_v27 = vpack.c.bf16 %v4966_v26, %v4965_v51 }
0x215d   : > { %v4699_v13 = vpop.permute.xlu0 %4698 }
0x215e   : > { %v4701_v30 = vmul.f32 %v4699_v13, %v4696_v39  ;;  %v5074_v39 = vld [vmem:[%s8808_s7 + $0x20] sm:$0xff]  ;;  %v5075_v13 = vld [vmem:[%s8808_s7 + $0x28] sm:$0xff] }
0x2160   : > { %v8389_v33 = vadd.f32 %v4704_v29, %v4701_v30  ;;  %v4967_v29 = vld [vmem:[%s8853_s5 + $0x30] sm:$0xff]  ;;  %v4968_v30 = vld [vmem:[%s8853_s5 + $0x38] sm:$0xff] }
0x2161   : > { %v2744_v34 = vpop.permute.xlu0 %2743 }
0x2162   : > { %v2746_v22 = vadd.f32 %v2744_v34, %v7844_v45  ;;  %v4709_v38 = vrot.slane %v8389_v33, 1  ;;  %v7157_v34 = vpack.c.bf16 %v5075_v13, %v5074_v39 }
0x2164   : > { %7407 = vtanh.f32 %v2746_v22  ;;  %4710 = vrot.lane.b32.xlu1 %v4709_v38, %s8850_s26  ;;  %v5076_v22 = vld [vmem:[%s8808_s7 + $0x30] sm:$0xff] }
0x2168   : > { %2658 = vrot.lane.b32.xlu1 %v2657_v36, %s8852_s3  ;;  %v5077_v36 = vld [vmem:[%s8808_s7 + $0x38] sm:$0xff] }
0x216e   : > { %v7408_v37 = vpop.eup %7407 }
0x216f   : > { %2750 = vrot.lane.b32.xlu1 %v7408_v37, %s8850_s26 }
0x2173   : > { %1444 = vrot.lane.b32.xlu1 %v7920_v24, %s8850_s26 }
0x2177   : > { %1970 = vrot.lane.b32.xlu1 %v7986_v43, %s8850_s26 }
0x21d6   : > { %v4711_v45 = vpop.permute.xlu1 %4710 }
0x21d7   : > { %6706 = vmatmul.mubr.msk.f32.vlgmr.msra.gmra.mrb[48].mxu1 %vm642_vm3, %v4711_v45  ;;  %6717 = vmatmul.mubr.msk.f32.vlgmr.msra.gmra.mrb[46].mxu0 %vm642_vm3, %v4711_v45 }
0x21d8   : > { %7134 = vmatpush3.bf16.msra.mxu1 %v8128_v35  ;;  %6727 = vmatprep.mubr.msk.f32.mxu1 %vm7593_vm0, %v7594_v17 }
0x21d9   : > { %7135 = vmatprep.subr.bf16.mxu1 %v7590_v6  ;;  %6746 = vmatprep.mubr.msk.f32.mxu0 %vm7593_vm0, %v7594_v17 }
0x21da   : > { %v2659_v44 = vpop.permute.xlu1 %2658  ;;  %7140 = vmatpush3.bf16.msra.mxu0 %v7139_v15  ;;  %v5187_v15 = vld [vmem:[%s8810_s9 + $0x28] sm:$0xff] }
0x21db   : > { %v2661_v24 = vadd.f32 %v2659_v44, %v7847_v46  ;;  %7141 = vmatprep.subr.bf16.mxu0 %v7590_v6  ;;  %v7160_v44 = vpack.c.bf16 %v5077_v36, %v5076_v22 }
0x21dc   : > { %7137 = vmatpush3.bf16.msra.mxu1 %v8140_v41 }
0x21dd   : > { %v5781_v43 = vmul.f32 -1.442695, %v2661_v24  ;;  %7150 = vmatprep.subr.bf16.mxu1 %v7590_v6 }
0x21df   : > { %7409 = vpow2.f32 %v5781_v43  ;;  %6728 = vmatmul.mubr.msk.f32.vlgmr.msra.gmra.mrb[50].mxu1 %vm642_vm3, %v4711_v45  ;;  %v7148_v45 = vpack.c.bf16 %v4968_v30, %v4967_v29  ;;  %vm2499_vm3 = vcmask 260102  }
0x21e0   : > { %6765 = vmatprep.mubr.msk.f32.mxu1 %vm7593_vm0, %v7594_v17 }
0x21e1   : > { %v2751_v35 = vpop.permute.xlu1 %2750 }
0x21e5   : > { %v1445_v42 = vpop.permute.xlu1 %1444 }
0x21e6   : > { %1448 = vst.msk [vmem:[#allocation2] sm:$0x4] %vm1447_vm4, %v1445_v42  ;;  %vm3406_vm4 = vcmask 522502  }
0x21e7   : > { %4447 = vst.msk [vmem:[#allocation2] sm:$0x4] %vm4446_vm5, %v8354_v55  ;;  %vm5191_vm5 = vcmask 64512  }
0x21e9   : > { %v7410_v46 = vpop.eup %7409  ;;  %v1971_v41 = vpop.permute.xlu1 %1970 }
0x21ea   : > { %v2665_v47 = vadd.f32 1.0, %v7410_v46  ;;  %1974 = vst.msk [vmem:[#allocation2] sm:$0x10] %vm1973_vm6, %v1971_v41 }
0x21eb   : > { %3927 = vst.msk [vmem:[#allocation2] sm:$0x10] %vm3926_vm7, %v8288_v11 }
0x21ec   : > { %7411 = vrcp.f32 %v2665_v47 }
0x21f6   : > { %v7412_v52 = vpop.eup %7411 }
0x21f7   : > { %v2748_v54 = vsub.f32 1.0, %v7412_v52  ;;  %v2756_v57 = vmul.f32 %v7412_v52, %v2754_v56 }
0x21f9   : > { %v2753_v48 = vmul.f32 %v2751_v35, %v2748_v54 }
0x21fb   : > { %v2757_v58 = vadd.f32 %v2756_v57, %v2753_v48 }
0x22aa   : > { %v4780_v59 = vpop.f32.mrb[48].mxu1  ;;  %v4857_v60 = vpop.f32.mrb[46].mxu0 }
0x22ab   : > { %v4784_v55 = vadd.f32 %v4780_v59, %v8175_v7  ;;  %v6707_v53 = vpop.f32.mrb[49].mxu1  ;;  %v6718_v63 = vpop.f32.mrb[47].mxu0 }
0x22ac   : > { %v5183_v63 = vld [vmem:[%s8810_s9 + $0x8] sm:$0xff] }
0x22ad   : > { %v5833_v0 = vmul.f32 -1.442695, %v4784_v55  ;;  %v5182_v55 = vld [vmem:[%s8810_s9] sm:$0xff] }
0x22af   : > { %7413 = vpow2.f32 %v5833_v0  ;;  %v5184_v0 = vld [vmem:[%s8810_s9 + $0x10] sm:$0xff] }
0x22b2   : > { %v4938_v32 = vpop.f32.mrb[50].mxu1 }
0x22b3   : > { %v6729_v2 = vpop.f32.mrb[51].mxu1  ;;  %v4939_v8 = vadd.f32 %v4938_v32, %v8182_v23  ;;  %v5070_v23 = vld [vmem:[%s8808_s7] sm:$0xff] }
0x22b4   : > { %v7151_v18 = vpack.c.bf16 %v5071_v16, %v5070_v23  ;;  %v5185_v2 = vld [vmem:[%s8810_s9 + $0x18] sm:$0xff] }
0x22b6   : > { %7152 = vmatpush3.bf16.msra.mxu1 %v7151_v18 }
0x22b7   : > { %7153 = vmatprep.subr.bf16.mxu1 %v7590_v6 }
0x22b9   : > { %v7414_v3 = vpop.eup %7413 }
0x22ba   : > { %v4788_v11 = vadd.f32 1.0, %v7414_v3 }
0x22bc   : > { %7415 = vrcp.f32 %v4788_v11 }
0x22c6   : > { %v7416_v10 = vpop.eup %7415 }
0x22c7   : > { %v4942_v40 = vmul.f32 %v7416_v10, %v4939_v8 }
0x22c9   : > { %4944 = vrot.lane.b32.xlu0 %v4942_v40, %s8851_s27  ;;  %s5462_s27 = sand.u32 1, %s7701_s22  }
0x22ca   : > { %s8632_s4 = scalar_lea.sflag [#allocation6], %s5462_s27 }
0x22cd   : > { %4862 = vrot.lane.b32.xlu0 %v4857_v60, %s8852_s3 }
0x22d1   : > { %1181 = vrot.lane.b32.xlu0 %v7887_v50, %s8850_s26 }
0x22d5   : > { %1707 = vrot.lane.b32.xlu0 %v7953_v1, %s8850_s26  ;;  %v4964_v1 = vld [vmem:[%s8853_s5 + $0x18] sm:$0xff] }
0x22d6   : > { %v7142_v4 = vpack.c.bf16 %v4964_v1, %v4963_v20 }
0x22d8   : > { %7143 = vmatpush3.bf16.msra.mxu0 %v7142_v4  ;;  %v5190_v4 = vld [vmem:[%s8810_s9 + $0x40] sm:$0xf] }
0x22d9   : > { %2233 = vrot.lane.b32.xlu0 %v8019_v21, %s8850_s26  ;;  %v5073_v21 = vld [vmem:[%s8808_s7 + $0x18] sm:$0xff]  ;;  %7144 = vmatprep.subr.bf16.mxu0 %v7590_v6 }
0x22da   : > { %v7154_v25 = vpack.c.bf16 %v5073_v21, %v5072_v31  ;;  %v5189_v31 = vld [vmem:[%s8810_s9 + $0x38] sm:$0xff] }
0x22dc   : > { %7155 = vmatpush3.bf16.msra.mxu1 %v7154_v25  ;;  %7146 = vmatpush3.bf16.msra.mxu0 %v7145_v27 }
0x22dd   : > { %2759 = vrot.lane.b32.xlu0 %v2757_v58, %s8850_s26  ;;  %7156 = vmatprep.subr.bf16.mxu1 %v7590_v6 }
0x22de   : > { %7147 = vmatprep.subr.bf16.mxu0 %v7590_v6 }
0x22e0   : > { %7158 = vmatpush3.bf16.msra.mxu1 %v7157_v34  ;;  %7149 = vmatpush3.bf16.msra.mxu0 %v7148_v45 }
0x22e1   : > { %7159 = vmatprep.subr.bf16.mxu1 %v7590_v6  ;;  %6768 = vmatprep.subr.mxu0 %v7594_v17 }
0x22e4   : > { %7161 = vmatpush3.bf16.msra.mxu1 %v7160_v44 }
0x22e5   : > { %6797 = vmatprep.subr.mxu1 %v7594_v17 }
0x233b   : > { %v4945_v50 = vpop.permute.xlu0 %4944 }
0x233c   : > { %v4947_v19 = vadd.f32 %v4945_v50, %v8171_v62  ;;  %v5188_v50 = vld [vmem:[%s8810_s9 + $0x30] sm:$0xff] }
0x233e   : > { %7417 = vtanh.f32 %v4947_v19 }
0x233f   : > { %v4863_v62 = vpop.permute.xlu0 %4862 }
0x2343   : > { %v1182_v37 = vpop.permute.xlu0 %1181 }
0x2344   : > { %1185 = vst.msk [vmem:[#allocation2] sm:$0x2] %vm1184_vm8, %v1182_v37 }
0x2345   : > { %4707 = vst.msk [vmem:[#allocation2] sm:$0x2] %vm4706_vm9, %v8389_v33  ;;  %v5839_v33 = vld [vmem:[%s8809_s8] ss:$0 sm:$0xff] }
0x2347   : > { %v1708_v24 = vpop.permute.xlu0 %1707 }
0x2348   : > { %v7418_v43 = vpop.eup %7417  ;;  %1711 = vst.msk [vmem:[#allocation2] sm:$0x8] %vm1710_vm10, %v1708_v24 }
0x2349   : > { %4187 = vst.msk [vmem:[#allocation2] sm:$0x8] %vm4186_vm11, %v8321_v61  ;;  %4951 = vrot.lane.b32.xlu1 %v7418_v43, %s8850_s26  ;;  %v4865_v61 = vadd.f32 %v4863_v62, %v8175_v7 }
0x234b   : > { %v2234_v35 = vpop.permute.xlu0 %2233  ;;  %v5835_v42 = vmul.f32 -1.442695, %v4865_v61 }
0x234c   : > { %2237 = vst.msk [vmem:[#allocation2] sm:$0x20] %vm2236_vm12, %v2234_v35 }
0x234d   : > { %3667 = vst.msk [vmem:[#allocation2] sm:$0x20] %vm3666_vm13, %v8255_v9  ;;  %2496 = vrot.lane.b32.xlu1 %v8070_v5, %s8850_s26  ;;  %7419 = vpow2.f32 %v5835_v42  ;;  %s8506_s26 = sand.u32 1, %s7580_s19  }
0x234e   : > { %s5738_s3 = sshll.u32 %s8506_s26, 3  ;;  %s8829_s24 = scalar_lea.vmem [#allocation3], %s8506_s26 }
0x234f   : > { %v2760_v6 = vpop.permute.xlu0 %2759  ;;  %s8524_s30 = scalar_lea.vmem [#allocation8], %s5738_s3  ;;  %s8574_s16 = scalar_lea.vmem [#allocation7], %s5738_s3 }
0x2350   : > { %2763 = vst.msk [vmem:[#allocation2] sm:$0x80] %vm2762_vm14, %v2760_v6  ;;  %s497_s3 = scalar_lea.vmem [#allocation5], %s8506_s26 }
0x2351   : > { %3147 = vst.msk [vmem:[#allocation2] sm:$0x80] %vm3146_vm15, %v8189_v49  ;;  %s5508_s23 = sshll.u32 %s497_s3, 4  ;;  %s8625_s23 = int_to_ptr.vmem [resolvable:$true] %s5508_s23 }
0x2352   : > { %p7441_p0 = scmp.lt.s32.totalorder %s8625_s23, %s7439_s29 }
0x2357   : > { %v7420_v46 = vpop.eup %7419 }
0x2358   : > { %v4869_v41 = vadd.f32 1.0, %v7420_v46 }
0x235a   : > { %7421 = vrcp.f32 %v4869_v41 }
0x2364   : > { %v7422_v47 = vpop.eup %7421 }
0x2365   : > { %v4949_v52 = vsub.f32 1.0, %v7422_v47  ;;  %v4956_v5 = vmul.f32 %v7422_v47, %v4709_v38 }
0x23bb   : > { %v4952_v54 = vpop.permute.xlu1 %4951 }
0x23bc   : > { %v4954_v9 = vmul.f32 %v4952_v54, %v4949_v52 }
0x23be   : > { %v4957_v56 = vadd.f32 %v4956_v5, %v4954_v9 }
0x23bf   : > { %v2497_v49 = vpop.permute.xlu1 %2496 }
0x23c0   : > { %4959 = vst.msk [vmem:[#allocation2] sm:$0x1] %vm4958_vm2, %v4957_v56 }
0x23c1   : > { %2500 = vst.msk [vmem:[#allocation2] sm:$0x40] %vm2499_vm3, %v2497_v49 }
0x23c2   : > { %3407 = vst.msk [vmem:[#allocation2] sm:$0x40] %vm3406_vm4, %v8222_v28  ;;  %v5837_v28 = vld [vmem:[%s8854_s6] ss:$0 sm:$0xff] }
0x23c9   : > { %v4960_v7 = vld [vmem:[#allocation2] sm:$0xff] }
0x23ca   : > { %6747 = vmatmul.mubr.msk.f32.vlgmr.msra.gmra.mrb[48].mxu0 %vm561_vm1, %v4960_v7  ;;  %6766 = vmatmul.mubr.msk.f32.vlgmr.msra.gmra.mrb[52].mxu1 %vm561_vm1, %v4960_v7  ;;  %vm5050_vm1 = vcmask 80896  }
0x23cb   : > { %6770 = vmatprep.mubr.msk.f32.mxu0 %vm7593_vm0, %v7594_v17  ;;  %6799 = vmatprep.mubr.msk.f32.mxu1 %vm7593_vm0, %v7594_v17 }
0x249d   : > { %v5045_v38 = vpop.f32.mrb[48].mxu0  ;;  %v5151_v57 = vpop.f32.mrb[52].mxu1 }
0x249e   : > { %v5046_v48 = vadd.f32 %v5837_v28, %v5045_v38  ;;  %v8515_v58 = vadd.f32 %v5839_v33, %v5151_v57  ;;  %v6748_v59 = vpop.f32.mrb[49].mxu0  ;;  %v6767_v60 = vpop.f32.mrb[53].mxu1 }
0x24a0   : > { %7423 = vtanh.f32 %v5046_v48  ;;  %v5841_v53 = vmul.f32 -1.442695, %v8515_v58  ;;  %6798 = vmatpush3.msra.mxu1 %v8515_v58  ;;  %5181 = vst.msk [vmem:[%s8524_s30] sm:$0xff] %vm5050_vm1, %v8515_v58 }
0x24a1   : > { %6800 = vmatmul.mubr.msk.f32.vlgmr.msra.gmra.mrb[54].mxu1 %vm5191_vm5, %v5182_v55 }
0x24a2   : > { %7425 = vpow2.f32 %v5841_v53  ;;  %6802 = vmatprep.mubr.msk.f32.mxu1 %vm7593_vm0, %v7594_v17 }
0x24a5   : > { %6803 = vmatmul.mubr.msk.f32.gmra.mrb[56].mxu1 %vm5191_vm5, %v5183_v63 }
0x24a6   : > { %6805 = vmatprep.mubr.msk.f32.mxu1 %vm7593_vm0, %v7594_v17 }
0x24a9   : > { %6806 = vmatmul.mubr.msk.f32.gmra.mrb[58].mxu1 %vm5191_vm5, %v5184_v0 }
0x24aa   : > { %v7424_v32 = vpop.eup %7423  ;;  %6808 = vmatprep.mubr.msk.f32.mxu1 %vm7593_vm0, %v7594_v17 }
0x24ab   : > { %v5051_v3 = vsel %vm5050_vm1, %v7424_v32, -inf }
0x24ac   : > { %v7426_v11 = vpop.eup %7425  ;;  %v5052_v8 = vrot.slane %v5051_v3, 4 }
0x24ad   : > { %v5158_v10 = vadd.f32 1.0, %v7426_v11  ;;  %6809 = vmatmul.mubr.msk.f32.gmra.mrb[60].mxu1 %vm5191_vm5, %v5185_v2 }
0x24ae   : > { %v5053_v40 = vmax.f32 %v5051_v3, %v5052_v8  ;;  %6811 = vmatprep.mubr.msk.f32.mxu1 %vm7593_vm0, %v7594_v17 }
0x24af   : > { %7427 = vrcp.f32 %v5158_v10 }
0x24b0   : > { %v5054_v14 = vrot.slane %v5053_v40, 2 }
0x24b1   : > { %6812 = vmatmul.mubr.msk.f32.gmra.mrb[62].mxu1 %vm5191_vm5, %v5186_v12 }
0x24b2   : > { %v5055_v23 = vmax.f32 %v5053_v40, %v5054_v14  ;;  %6814 = vmatprep.mubr.msk.f32.mxu1 %vm7593_vm0, %v7594_v17 }
0x24b4   : > { %v5056_v16 = vrot.slane %v5055_v23, 1 }
0x24b5   : > { %6815 = vmatmul.mubr.msk.f32.gmra.mrb[64].mxu1 %vm5191_vm5, %v5187_v15 }
0x24b6   : > { %v5057_v18 = vmax.f32 %v5055_v23, %v5056_v16  ;;  %6817 = vmatprep.mubr.msk.f32.mxu1 %vm7593_vm0, %v7594_v17 }
0x24b8   : > { %v5058_v19 = vsub.f32 %v7424_v32, %v5057_v18 }
0x24b9   : > { %v7428_v20 = vpop.eup %7427  ;;  %6818 = vmatmul.mubr.msk.f32.gmra.mrb[66].mxu1 %vm5191_vm5, %v5188_v50 }
0x24ba   : > { %v5059_v1 = vmul.f32 1.442695, %v5058_v19  ;;  %6769 = vmatpush3.msra.mxu0 %v7428_v20  ;;  %6820 = vmatprep.mubr.msk.f32.mxu1 %vm7593_vm0, %v7594_v17  ;;  %5180 = vst.msk [vmem:[%s8574_s16] sm:$0xff] %vm5050_vm1, %v7428_v20 }
0x24bb   : > { %6771 = vmatmul.mubr.msk.f32.vlgmr.msra.gmra.mrb[50].mxu0 %vm5191_vm5, %v5182_v55 }
0x24bc   : > { %7429 = vpow2.f32 %v5059_v1  ;;  %6773 = vmatprep.mubr.msk.f32.mxu0 %vm7593_vm0, %v7594_v17 }
0x24bd   : > { %6821 = vmatmul.mubr.msk.f32.gmra.mrb[68].mxu1 %vm5191_vm5, %v5189_v31 }
0x24be   : > { %6823 = vmatprep.mubr.msk.f32.mxu1 %vm7593_vm0, %v7594_v17 }
0x24bf   : > { %6774 = vmatmul.mubr.msk.f32.gmra.mrb[52].mxu0 %vm5191_vm5, %v5183_v63 }
0x24c0   : > { %6776 = vmatprep.mubr.msk.f32.mxu0 %vm7593_vm0, %v7594_v17 }
0x24c1   : > { %6824 = vmatmul.mubr.msk.f32.gmra.mrb[70].mxu1 %vm5191_vm5, %v5190_v4 }
0x24c3   : > { %6777 = vmatmul.mubr.msk.f32.gmra.mrb[54].mxu0 %vm5191_vm5, %v5184_v0 }
0x24c4   : > { %6779 = vmatprep.mubr.msk.f32.mxu0 %vm7593_vm0, %v7594_v17 }
0x24c6   : > { %v7430_v21 = vpop.eup %7429 }
0x24c7   : > { %v5061_v25 = vsel %vm5050_vm1, %v7430_v21, 0.0  ;;  %6780 = vmatmul.mubr.msk.f32.gmra.mrb[56].mxu0 %vm5191_vm5, %v5185_v2 }
0x24c8   : > { %v5062_v62 = vrot.slane %v5061_v25, 4  ;;  %6782 = vmatprep.mubr.msk.f32.mxu0 %vm7593_vm0, %v7594_v17 }
0x24ca   : > { %v5063_v51 = vadd.f32 %v5062_v62, %v5061_v25 }
0x24cb   : > { %6783 = vmatmul.mubr.msk.f32.gmra.mrb[58].mxu0 %vm5191_vm5, %v5186_v12 }
0x24cc   : > { %v5064_v26 = vrot.slane %v5063_v51, 2  ;;  %6785 = vmatprep.mubr.msk.f32.mxu0 %vm7593_vm0, %v7594_v17 }
0x24ce   : > { %v5065_v39 = vadd.f32 %v5064_v26, %v5063_v51 }
0x24cf   : > { %6786 = vmatmul.mubr.msk.f32.gmra.mrb[60].mxu0 %vm5191_vm5, %v5187_v15 }
0x24d0   : > { %v5066_v27 = vrot.slane %v5065_v39, 1  ;;  %6788 = vmatprep.mubr.msk.f32.mxu0 %vm7593_vm0, %v7594_v17 }
0x24d2   : > { %v5067_v13 = vadd.f32 %v5066_v27, %v5065_v39 }
0x24d3   : > { %6789 = vmatmul.mubr.msk.f32.gmra.mrb[62].mxu0 %vm5191_vm5, %v5188_v50 }
0x24d4   : > { %7431 = vrcp.f32 %v5067_v13  ;;  %6791 = vmatprep.mubr.msk.f32.mxu0 %vm7593_vm0, %v7594_v17 }
0x24d7   : > { %6792 = vmatmul.mubr.msk.f32.gmra.mrb[64].mxu0 %vm5191_vm5, %v5189_v31 }
0x24d8   : > { %6794 = vmatprep.mubr.msk.f32.mxu0 %vm7593_vm0, %v7594_v17  ;;  %vm5169_vm0 = vcmask 73728  }
0x24db   : > { %6795 = vmatmul.mubr.msk.f32.gmra.mrb[66].mxu0 %vm5191_vm5, %v5190_v4 }
0x24de   : > { %v7432_v29 = vpop.eup %7431 }
0x24df   : > { %v5069_v30 = vmul.f32 %v7432_v29, %v7430_v21 }
0x24e1   : > { %v5161_v34 = vmul.f32 %v7428_v20, %v5069_v30  ;;  %v5171_v22 = vmul.f32 %v8515_v58, %v5069_v30 }
0x24e3   : > { %v5172_v36 = vsel %vm5050_vm1, %v5171_v22, 0.0  ;;  %v5162_v37 = vsel %vm5050_vm1, %v5161_v34, 0.0 }
0x24e4   : > { %v5173_v45 = vrot.slane %v5172_v36, 4  ;;  %v5163_v44 = vrot.slane %v5162_v37, 4 }
0x24e6   : > { %v5174_v24 = vadd.f32 %v5173_v45, %v5172_v36  ;;  %v5164_v17 = vadd.f32 %v5163_v44, %v5162_v37 }
0x24e8   : > { %v5175_v43 = vrot.slane %v5174_v24, 2  ;;  %v5165_v35 = vrot.slane %v5164_v17, 2 }
0x24ea   : > { %v5176_v6 = vadd.f32 %v5175_v43, %v5174_v24  ;;  %v5166_v61 = vadd.f32 %v5165_v35, %v5164_v17 }
0x24ec   : > { %v5177_v42 = vrot.slane %v5176_v6, 1  ;;  %v5167_v46 = vrot.slane %v5166_v61, 1 }
0x24ee   : > { %v5178_v41 = vadd.f32 %v5177_v42, %v5176_v6  ;;  %v5168_v47 = vadd.f32 %v5167_v46, %v5166_v61 }
0x24f0   : > { %5179 = vst.msk [vmem:[%s497_s3] sm:$0x1] %vm5169_vm0, %v5178_v41  ;;  %5170 = vst.msk [vmem:[%s8829_s24] sm:$0x1] %vm5169_vm0, %v5168_v47  ;;  %s7434_s24 = scalar_lea.vmem %s8625_s23, 16  ;;  %s7440_s3 = scalar_lea.vmem %s7439_s29, 32 }
0x24f1   : > { %p7435_p11 = scmp.ne.s32.totalorder %s8625_s23, %s7434_s24  ;;  %p7442_p1 = scmp.lt.s32.totalorder %s7440_s3, %s7434_s24 }
0x24f3   : > { %p7436_p12 = pnand %p7435_p11, %p7720_p5  ;;  %p7443_p2 = por %p7442_p1, %p7441_p0 }
0x24f5   : > { %p7437_p13 = pneg %p7436_p12 }
0x24f7   : > { %p7444_p3 = pnand %p7443_p2, %p7437_p13 }
0x24f9   : > { %7447 = shalt.err (!%p7444_p3)
}
0x24fa   : > { %s7448_s1 = scalar_lea.hbm %s8623_s18, 16  ;;  %s7452_s17 = scalar_lea.hbm %s8812_s11, 32 }
0x24fb   : > { %p7449_p4 = scmp.ne.s32.totalorder %s8623_s18, %s7448_s1  ;;  %p7453_p9 = scmp.lt.u32.totalorder %s8623_s18, %s8812_s11 }
0x24fc   : > { %p7454_p10 = scmp.lt.u32.totalorder %s7452_s17, %s7448_s1  ;;  %p7456_p12 = scmp.lt.u32.totalorder %s7448_s1, %s8623_s18 }
0x24fd   : > { %p7450_p7 = pnand %p7449_p4, %p7720_p5 }
0x24fe   : > { %p7455_p11 = por %p7454_p10, %p7453_p9 }
0x24ff   : > { %p7451_p8 = pneg %p7450_p7 }
0x2500   : > { %p7457_p13 = por %p7456_p12, %p7455_p11 }
0x2502   : > { %p7458_p0 = pnand %p7457_p13, %p7451_p8 }
0x2504   : > { %7461 = shalt.err (!%p7458_p0)
}
0x2505   : > { %7164 = dma.vmem_to_hbm [thread:$0]  (%p7720_p5), %s8625_s23, 16, %s8623_s18, %s8632_s4  }
0x2506   : > { %s8855_s24 = scalar_lea.vmem [#allocation3], %s8506_s26  ;;  %s8830_s27 = sshll.u32 %s7701_s22, 7 }
0x2507   : > { %s5495_s3 = sshll.u32 %s8855_s24, 4  ;;  %s8666_s17 = scalar_lea.hbm %s8813_s12, %s8830_s27  ;;  %s8659_s3 = int_to_ptr.vmem [resolvable:$true] %s5495_s3 }
0x2508   : > { %s5459_s0 = scalar_lea.sflag [#allocation4], %s8506_s26  ;;  %s7462_s29 = scalar_lea.vmem %s8659_s3, 16 }
0x2509   : > { %p7463_p1 = scmp.ne.s32.totalorder %s8659_s3, %s7462_s29  ;;  %s7597_s18 = smov [#allocation3]  }
0x250a   : > { %s7466_s23 = sshll.u32 %s7597_s18, 4  ;;  %s7467_s23 = int_to_ptr.vmem [resolvable:$false] %s7466_s23 }
0x250b   : > { %p7464_p2 = pnand %p7463_p1, %p7720_p5  ;;  %s7468_s24 = scalar_lea.vmem %s7467_s23, 32 }
0x250c   : > { %p7469_p4 = scmp.lt.s32.totalorder %s8659_s3, %s7467_s23  ;;  %p7470_p7 = scmp.lt.s32.totalorder %s7468_s24, %s7462_s29 }
0x250d   : > { %p7465_p3 = pneg %p7464_p2 }
0x250e   : > { %p7471_p8 = por %p7470_p7, %p7469_p4 }
0x2510   : > { %p7472_p9 = pnand %p7471_p8, %p7465_p3 }
0x2512   : > { %7475 = shalt.err (!%p7472_p9)
}
0x2513   : > { %s7476_s1 = scalar_lea.hbm %s8630_s2, 16  ;;  %s7480_s18 = scalar_lea.hbm %s8811_s10, 32 }
0x2514   : > { %p7477_p10 = scmp.ne.s32.totalorder %s8630_s2, %s7476_s1  ;;  %p7481_p13 = scmp.lt.u32.totalorder %s8630_s2, %s8811_s10 }
0x2515   : > { %p7482_p0 = scmp.lt.u32.totalorder %s7480_s18, %s7476_s1  ;;  %p7484_p2 = scmp.lt.u32.totalorder %s7476_s1, %s8630_s2 }
0x2516   : > { %p7478_p11 = pnand %p7477_p10, %p7720_p5 }
0x2517   : > { %p7483_p1 = por %p7482_p0, %p7481_p13 }
0x2518   : > { %p7479_p12 = pneg %p7478_p11 }
0x2519   : > { %p7485_p3 = por %p7484_p2, %p7483_p1 }
0x251b   : > { %p7486_p4 = pnand %p7485_p3, %p7479_p12 }
0x251d   : > { %7489 = shalt.err (!%p7486_p4)
}
0x251e   : > { %7163 = dma.vmem_to_hbm [thread:$0]  (%p7720_p5), %s8659_s3, 16, %s8630_s2, %s5459_s0  }
0x251f   : > { %s5521_s27 = sshll.u32 %s8574_s16, 4  ;;  %s8856_s29 = sshll.u32 %s7701_s22, 7  ;;  %s5522_s27 = int_to_ptr.vmem [resolvable:$true] %s5521_s27 }
0x2520   : > { %s8696_s25 = scalar_lea.hbm %s8814_s13, %s8856_s29  ;;  %s7490_s1 = scalar_lea.vmem %s5522_s27, 128 }
0x2521   : > { %p7491_p7 = scmp.ne.s32.totalorder %s5522_s27, %s7490_s1  ;;  %s7598_s18 = smov [#allocation7]  }
0x2522   : > { %s7494_s23 = sshll.u32 %s7598_s18, 4  ;;  %s7495_s23 = int_to_ptr.vmem [resolvable:$false] %s7494_s23 }
0x2523   : > { %p7492_p8 = pnand %p7491_p7, %p7720_p5  ;;  %s7496_s6 = scalar_lea.vmem %s7495_s23, 256 }
0x2524   : > { %p7497_p10 = scmp.lt.s32.totalorder %s5522_s27, %s7495_s23  ;;  %p7498_p11 = scmp.lt.s32.totalorder %s7496_s6, %s7490_s1 }
0x2525   : > { %p7493_p9 = pneg %p7492_p8 }
0x2526   : > { %p7499_p12 = por %p7498_p11, %p7497_p10 }
0x2528   : > { %p7500_p13 = pnand %p7499_p12, %p7493_p9 }
0x252a   : > { %7503 = shalt.err (!%p7500_p13)
}
0x252b   : > { %s7504_s2 = scalar_lea.hbm %s8666_s17, 128  ;;  %s7508_s3 = scalar_lea.hbm %s8813_s12, 256 }
0x252c   : > { %p7505_p0 = scmp.ne.s32.totalorder %s8666_s17, %s7504_s2  ;;  %p7509_p3 = scmp.lt.u32.totalorder %s8666_s17, %s8813_s12 }
0x252d   : > { %p7510_p4 = scmp.lt.u32.totalorder %s7508_s3, %s7504_s2  ;;  %p7512_p8 = scmp.lt.u32.totalorder %s7504_s2, %s8666_s17 }
0x252e   : > { %p7506_p1 = pnand %p7505_p0, %p7720_p5 }
0x252f   : > { %p7511_p7 = por %p7510_p4, %p7509_p3 }
0x2530   : > { %p7507_p2 = pneg %p7506_p1 }
0x2531   : > { %p7513_p9 = por %p7512_p8, %p7511_p7 }
0x2533   : > { %p7514_p10 = pnand %p7513_p9, %p7507_p2 }
0x2535   : > { %7517 = shalt.err (!%p7514_p10)
}
0x2536   : > { %7165 = dma.vmem_to_hbm [thread:$0]  (%p7720_p5), %s5522_s27, 128, %s8666_s17, %s8632_s4  }
0x2537   : > { %s5534_s6 = sshll.u32 %s8524_s30, 4  ;;  %s5472_s24 = scalar_lea.sflag [#allocation9], %s8506_s26  ;;  %s5535_s6 = int_to_ptr.vmem [resolvable:$true] %s5534_s6 }
0x2538   : > { %s7518_s5 = scalar_lea.vmem %s5535_s6, 128  ;;  %s7599_s1 = smov [#allocation8]  }
0x2539   : > { %p7519_p11 = scmp.ne.s32.totalorder %s5535_s6, %s7518_s5  ;;  %s7522_s18 = sshll.u32 %s7599_s1, 4  ;;  %s7523_s18 = int_to_ptr.vmem [resolvable:$false] %s7522_s18 }
0x253a   : > { %s7524_s23 = scalar_lea.vmem %s7523_s18, 256  ;;  %p7525_p0 = scmp.lt.s32.totalorder %s5535_s6, %s7523_s18 }
0x253b   : > { %p7520_p12 = pnand %p7519_p11, %p7720_p5  ;;  %p7526_p1 = scmp.lt.s32.totalorder %s7524_s23, %s7518_s5 }
0x253d   : > { %p7521_p13 = pneg %p7520_p12  ;;  %p7527_p2 = por %p7526_p1, %p7525_p0 }
0x253f   : > { %p7528_p3 = pnand %p7527_p2, %p7521_p13 }
0x2541   : > { %7531 = shalt.err (!%p7528_p3)
}
0x2542   : > { %s7532_s4 = scalar_lea.hbm %s8696_s25, 128  ;;  %s7536_s17 = scalar_lea.hbm %s8814_s13, 256 }
0x2543   : > { %p7533_p4 = scmp.ne.s32.totalorder %s8696_s25, %s7532_s4  ;;  %p7537_p9 = scmp.lt.u32.totalorder %s8696_s25, %s8814_s13 }
0x2544   : > { %p7538_p10 = scmp.lt.u32.totalorder %s7536_s17, %s7532_s4  ;;  %p7540_p12 = scmp.lt.u32.totalorder %s7532_s4, %s8696_s25 }
0x2545   : > { %p7534_p7 = pnand %p7533_p4, %p7720_p5 }
0x2546   : > { %p7539_p11 = por %p7538_p10, %p7537_p9 }
0x2547   : > { %p7535_p8 = pneg %p7534_p7 }
0x2548   : > { %p7541_p13 = por %p7540_p12, %p7539_p11 }
0x254a   : > { %p7542_p0 = pnand %p7541_p13, %p7535_p8 }
0x254c   : > { %7545 = shalt.err (!%p7542_p0)
}
0x254d   : > { %7166 = dma.vmem_to_hbm [thread:$0]  (%p7720_p5), %s5535_s6, 128, %s8696_s25, %s5472_s24   ;;  %vm5337_vm6 = vcmask 76800  }
0x254e   : > { %s7162_s22 = smul.u32 72, %s7776_s20 }
0x2550   : > { %s8739_s0 = scalar_lea.vmem %s8816_s15, %s7162_s22  ;;  %s8756_s25 = scalar_lea.vmem %s8815_s14, %s7162_s22 }
0x2574   : > { %v5405_v52 = vpop.f32.mrb[54].mxu1 }
0x2575   : > { %5449 = vst.msk [vmem:[%s8739_s0] sm:$0xff] %vm5050_vm1, %v5405_v52  ;;  %v6801_v54 = vpop.f32.mrb[55].mxu1 }
0x2578   : > { %v5410_v9 = vpop.f32.mrb[56].mxu1 }
0x2579   : > { %5450 = vst.msk [vmem:[%s8739_s0 + $0x8] sm:$0xff] %vm5050_vm1, %v5410_v9  ;;  %v6804_v5 = vpop.f32.mrb[57].mxu1 }
0x257c   : > { %v5415_v56 = vpop.f32.mrb[58].mxu1 }
0x257d   : > { %5451 = vst.msk [vmem:[%s8739_s0 + $0x10] sm:$0xff] %vm5050_vm1, %v5415_v56  ;;  %v6807_v49 = vpop.f32.mrb[59].mxu1 }
0x2580   : > { %v5420_v7 = vpop.f32.mrb[60].mxu1 }
0x2581   : > { %5452 = vst.msk [vmem:[%s8739_s0 + $0x18] sm:$0xff] %vm5050_vm1, %v5420_v7  ;;  %v6810_v28 = vpop.f32.mrb[61].mxu1 }
0x2584   : > { %v5425_v33 = vpop.f32.mrb[62].mxu1 }
0x2585   : > { %5453 = vst.msk [vmem:[%s8739_s0 + $0x20] sm:$0xff] %vm5050_vm1, %v5425_v33  ;;  %v6813_v38 = vpop.f32.mrb[63].mxu1 }
0x2588   : > { %v5430_v57 = vpop.f32.mrb[64].mxu1 }
0x2589   : > { %5454 = vst.msk [vmem:[%s8739_s0 + $0x28] sm:$0xff] %vm5050_vm1, %v5430_v57  ;;  %v6816_v48 = vpop.f32.mrb[65].mxu1 }
0x258c   : > { %v5435_v58 = vpop.f32.mrb[66].mxu1 }
0x258d   : > { %5455 = vst.msk [vmem:[%s8739_s0 + $0x30] sm:$0xff] %vm5050_vm1, %v5435_v58  ;;  %v6819_v59 = vpop.f32.mrb[67].mxu1 }
0x258e   : > { %v5285_v60 = vpop.f32.mrb[50].mxu0 }
0x258f   : > { %5329 = vst.msk [vmem:[%s8756_s25] sm:$0xff] %vm5050_vm1, %v5285_v60  ;;  %v6772_v55 = vpop.f32.mrb[51].mxu0 }
0x2590   : > { %v5440_v53 = vpop.f32.mrb[68].mxu1 }
0x2591   : > { %5456 = vst.msk [vmem:[%s8739_s0 + $0x38] sm:$0xff] %vm5050_vm1, %v5440_v53  ;;  %v6822_v63 = vpop.f32.mrb[69].mxu1 }
0x2592   : > { %v5290_v0 = vpop.f32.mrb[52].mxu0 }
0x2593   : > { %5330 = vst.msk [vmem:[%s8756_s25 + $0x8] sm:$0xff] %vm5050_vm1, %v5290_v0  ;;  %v6775_v32 = vpop.f32.mrb[53].mxu0 }
0x2594   : > { %v5445_v2 = vpop.f32.mrb[70].mxu1 }
0x2595   : > { %5457 = vst.msk [vmem:[%s8739_s0 + $0x40] sm:$0xf] %vm5337_vm6, %v5445_v2  ;;  %v6825_v3 = vpop.f32.mrb[71].mxu1 }
0x2596   : > { %v5295_v11 = vpop.f32.mrb[54].mxu0 }
0x2597   : > { %5331 = vst.msk [vmem:[%s8756_s25 + $0x10] sm:$0xff] %vm5050_vm1, %v5295_v11  ;;  %v6778_v8 = vpop.f32.mrb[55].mxu0 }
0x259a   : > { %v5300_v10 = vpop.f32.mrb[56].mxu0 }
0x259b   : > { %5332 = vst.msk [vmem:[%s8756_s25 + $0x18] sm:$0xff] %vm5050_vm1, %v5300_v10  ;;  %v6781_v40 = vpop.f32.mrb[57].mxu0 }
0x259e   : > { %v5305_v12 = vpop.f32.mrb[58].mxu0 }
0x259f   : > { %5333 = vst.msk [vmem:[%s8756_s25 + $0x20] sm:$0xff] %vm5050_vm1, %v5305_v12  ;;  %v6784_v14 = vpop.f32.mrb[59].mxu0 }
0x25a2   : > { %v5310_v23 = vpop.f32.mrb[60].mxu0 }
0x25a3   : > { %5334 = vst.msk [vmem:[%s8756_s25 + $0x28] sm:$0xff] %vm5050_vm1, %v5310_v23  ;;  %v6787_v15 = vpop.f32.mrb[61].mxu0 }
0x25a6   : > { %v5315_v16 = vpop.f32.mrb[62].mxu0 }
0x25a7   : > { %5335 = vst.msk [vmem:[%s8756_s25 + $0x30] sm:$0xff] %vm5050_vm1, %v5315_v16  ;;  %v6790_v18 = vpop.f32.mrb[63].mxu0 }
0x25aa   : > { %v5320_v50 = vpop.f32.mrb[64].mxu0 }
0x25ab   : > { %5336 = vst.msk [vmem:[%s8756_s25 + $0x38] sm:$0xff] %vm5050_vm1, %v5320_v50  ;;  %v6793_v19 = vpop.f32.mrb[65].mxu0 }
0x25ae   : > { %v5325_v20 = vpop.f32.mrb[66].mxu0 }
0x25af   : > { %5338 = vst.msk [vmem:[%s8756_s25 + $0x40] sm:$0xf] %vm5337_vm6, %v5325_v20  ;;  %v6796_v1 = vpop.f32.mrb[67].mxu0 }
0x25b0 PF: > { %s8857_s29 = sld [smem:[#allocation13_spill]]  ;;  %p7184_p5 = scmp.ge.s32.totalorder %s7588_s21, 2 }
0x25b2   : > { %p7172_p1 = pnand %p7184_p5, %p7724_p6 }
0x25b6   : > { %s5552_s24 = sand.u32 1, %s8857_s29  }
0x25b7   : > { %s5553_s5 = scalar_lea.sflag [#allocation4], %s5552_s24 }
0x25b8   : > { %7563 = dma.done.wait (!%p7172_p1), %s5553_s5, 16  }
0x25b9   : > { %7565 = vsyncadd (!%p7172_p1), %s5553_s5, 4294967280  ;;  %s8859_s1 = sadd.s32 4294967294, %s7588_s21  }
0x25ba   : > { %s5560_s18 = sand.u32 1, %s8859_s1  }
0x25bb   : > { %s5561_s23 = scalar_lea.sflag [#allocation6], %s5560_s18 }
0x25bc   : > { %7567 = dma.done.wait (!%p7172_p1), %s5561_s23, 144  }
0x25bd   : > { %7569 = vsyncadd (!%p7172_p1), %s5561_s23, 4294967152  ;;  %s5578_s4 = scalar_lea.sflag [#allocation9], %s5552_s24 }
0x25be   : > { %7571 = dma.done.wait (!%p7172_p1), %s5578_s4, 128  }
0x25bf   : > { %7573 = vsyncadd (!%p7172_p1), %s5578_s4, 4294967168  ;;  %s8860_s21 = sld [smem:[#allocation15_spill]]  ;;  %s8861_s26 = sld [smem:[#allocation14_spill]] }
0x25c0   : > { %s8862_s20 = sld [smem:[#allocation16_spill]]  ;;  %s8863_s18 = smov %s7580_s19 }
0x25c5   : > { %p32_p2 = scmp.ge.s32.totalorder %s8860_s21, 4   ;;  %s8864_s19 = smov %s8861_s26 }
0x25c7   :  { %34 = sbr.rel (!%p32_p2) target bundleno = 15 (0xf), region = 172 }
0x25ce   :  { %5599 = vsyncpa [#allocation4], 1 }
0x25cf   :  { %5601 = vsyncpa [#allocation4 + $0x1], 1 }
0x25d0   :  { %5602 = vsyncpa [#allocation6], 1 }
0x25d1   :  { %5604 = vsyncpa [#allocation6 + $0x1], 1 }
0x25d2   :  { %5605 = vsyncpa [#allocation9], 1 }
0x25d3   :  { %5607 = vsyncpa [#allocation9 + $0x1], 1 }

</bundles_post_ra>
